<compile_context>
chip_gen: v5e
topology: v5e:2x2
jax: 0.10.0
libtpu: 0.0.40
codegen_flags: <defaults>
</compile_context>

<pallas_src>
import jax
import jax.numpy as jnp
from jax import lax
from jax.experimental import pallas as pl
from jax.experimental.pallas import tpu as pltpu

IN_DIM = 32 * 32 * 3   # 3072
H1 = 512
H2 = 256
OUT = 10
OUT_PAD = 128          # lane-dense logits block
NEG_BIG = float(jnp.finfo(jnp.float32).min)


def _round_up(x, m):
    return ((x + m - 1) // m) * m


def mlp_kernel(x_ref, w1_ref, b1_ref, w2_ref, b2_ref, w3_ref, b3_ref, o_ref):
    # in-kernel f32 -> bf16 cast of the activation tile (hidden under the fc1 MXU)
    x = x_ref[...].astype(jnp.bfloat16)
    # fc1 + relu (bf16 inputs, f32 accumulation on the MXU)
    h1 = jnp.dot(x, w1_ref[...], preferred_element_type=jnp.float32)
    h1 = jnp.maximum(h1 + b1_ref[...], 0.0).astype(jnp.bfloat16)
    # fc2 + relu
    h2 = jnp.dot(h1, w2_ref[...], preferred_element_type=jnp.float32)
    h2 = jnp.maximum(h2 + b2_ref[...], 0.0).astype(jnp.bfloat16)
    # fc3 -> padded (tile_b, 128) logits, f32
    logits = jnp.dot(h2, w3_ref[...], preferred_element_type=jnp.float32) + b3_ref[...]
    # mask padded classes with a large finite negative so log_softmax only sees
    # the 10 real logits (finite value avoids inf/NaN propagation downstream)
    col = lax.broadcasted_iota(jnp.int32, logits.shape, 1)
    logits = jnp.where(col < OUT, logits, NEG_BIG)
    # stable log_softmax over dim=1
    m = jnp.max(logits, axis=-1, keepdims=True)
    lse = m + jnp.log(jnp.sum(jnp.exp(logits - m), axis=-1, keepdims=True))
    o_ref[...] = (logits - lse).astype(o_ref.dtype)


def prepare_params(params):
    """One-time (per weight update) device-side prep: bf16 cast + lane padding.

    Do this once and reuse the result across forward calls so the per-call path
    carries zero weight-conversion HBM traffic.
    """
    w1, b1, w2, b2, w3, b3 = params
    w1b = w1.astype(jnp.bfloat16)
    w2b = w2.astype(jnp.bfloat16)
    w3b = jnp.pad(w3, ((0, 0), (0, OUT_PAD - OUT))).astype(jnp.bfloat16)
    b3p = jnp.pad(b3, ((0, 0), (0, OUT_PAD - OUT)))
    return (w1b, b1, w2b, b2, w3b, b3p)


def net_forward(x, prepared):
    """x: (B, 3, 32, 32) float32 (NCHW). prepared: output of prepare_params.

    Returns (B, 10) log-probabilities (float32).
    """
    w1b, b1, w2b, b2, w3b, b3p = prepared
    B = x.shape[0]
    x_flat = x.reshape(B, IN_DIM)  # free; matches x.view(-1, 32*32*3); stays f32

    # batch tile: aim for >= 2 grid steps (keeps both v7x TensorCores busy),
    # multiple of 8 sublanes, capped at 512 rows so the double-buffered f32 x
    # tile + resident bf16 weights stay well inside v7x's default scoped VMEM.
    tile_b = min(512, _round_up(max(1, -(-B // 2)), 8))
    b_pad = _round_up(B, tile_b)
    if b_pad != B:
        x_flat = jnp.pad(x_flat, ((0, b_pad - B), (0, 0)))

    grid = (b_pad // tile_b,)

    flops = 2 * b_pad * (IN_DIM * H1 + H1 * H2 + H2 * OUT_PAD)
    bytes_accessed = (
        b_pad * IN_DIM * 4                                   # f32 x read
        + (IN_DIM * H1 + H1 * H2 + H2 * OUT_PAD) * 2         # bf16 weights (read once)
        + (H1 + H2 + OUT_PAD) * 4                            # f32 biases
        + b_pad * OUT_PAD * 4                                # f32 log-prob writeback
    )

    out = pl.pallas_call(
        mlp_kernel,
        out_shape=jax.ShapeDtypeStruct((b_pad, OUT_PAD), jnp.float32),
        grid=grid,
        in_specs=[
            pl.BlockSpec((tile_b, IN_DIM), lambda i: (i, 0)),   # x: tiled over batch (f32)
            pl.BlockSpec((IN_DIM, H1), lambda i: (0, 0)),       # weights: constant index_map
            pl.BlockSpec((1, H1), lambda i: (0, 0)),            #   -> DMA'd once, VMEM-resident
            pl.BlockSpec((H1, H2), lambda i: (0, 0)),
            pl.BlockSpec((1, H2), lambda i: (0, 0)),
            pl.BlockSpec((H2, OUT_PAD), lambda i: (0, 0)),
            pl.BlockSpec((1, OUT_PAD), lambda i: (0, 0)),
        ],
        out_specs=pl.BlockSpec((tile_b, OUT_PAD), lambda i: (i, 0)),
        compiler_params=pltpu.CompilerParams(
            dimension_semantics=("parallel",),
        ),
        cost_estimate=pl.CostEstimate(
            flops=flops,
            transcendentals=b_pad * OUT_PAD + b_pad,
            bytes_accessed=bytes_accessed,
        ),
    )(x_flat, w1b, b1, w2b, b2, w3b, b3p)

    return out[:B, :OUT]


def init_params(key):
    """Deterministic synthetic weights with PyTorch Linear-style uniform bounds."""
    ks = jax.random.split(key, 6)

    def linear(kw, kb, fan_in, fan_out):
        bound = 1.0 / jnp.sqrt(fan_in)
        # stored as (in, out) so kernel does x @ W
        w = jax.random.uniform(kw, (fan_in, fan_out), jnp.float32, -bound, bound)
        b = jax.random.uniform(kb, (1, fan_out), jnp.float32, -bound, bound)
        return w, b

    w1, b1 = linear(ks[0], ks[1], IN_DIM, H1)
    w2, b2 = linear(ks[2], ks[3], H1, H2)
    w3, b3 = linear(ks[4], ks[5], H2, OUT)
    return (w1, b1, w2, b2, w3, b3)


if __name__ == "__main__":
    key = jax.random.PRNGKey(0)
    k_x, k_p = jax.random.split(key)
    params = init_params(k_p)
    prepared = prepare_params(params)          # hoisted out of the per-call path
    prepared = jax.block_until_ready(prepared)

    x = jax.random.normal(k_x, (8, 3, 32, 32), jnp.float32)  # small CIFAR-like batch

    out = net_forward(x, prepared)
    out = jax.block_until_ready(out)

    # sanity: log_softmax rows should sum to ~1 in prob space, and be finite
    assert out.shape == (8, OUT)
    assert bool(jnp.all(jnp.isfinite(out)))
    probs_sum = jnp.sum(jnp.exp(out), axis=-1)
    assert jnp.allclose(probs_sum, jnp.ones_like(probs_sum), atol=1e-3)
    print("KERNEL_OK")
</pallas_src>

<mosaic_0001>
module attributes {stable_mosaic.version = 11 : i64} {
  func.func @mlp_kernel(%arg0: i32, %arg1: memref<8x3072xf32, #tpu.memory_space<vmem>>, %arg2: memref<3072x512xbf16, #tpu.memory_space<vmem>>, %arg3: memref<1x512xf32, #tpu.memory_space<vmem>>, %arg4: memref<512x256xbf16, #tpu.memory_space<vmem>>, %arg5: memref<1x256xf32, #tpu.memory_space<vmem>>, %arg6: memref<256x128xbf16, #tpu.memory_space<vmem>>, %arg7: memref<1x128xf32, #tpu.memory_space<vmem>>, %arg8: memref<8x128xf32, #tpu.memory_space<vmem>>) attributes {dimension_semantics = [#tpu.dimension_semantics<parallel>], iteration_bounds = array<i64: 1>, scalar_prefetch = 0 : i64, scratch_operands = 0 : i64, tpu.core_type = #tpu.core_type<tc>, window_params = [{transform_indices = @transform_0, window_bounds = array<i64: 8, 3072>}, {pipeline_mode = #tpu.pipeline_mode<synchronous>, transform_indices = @transform_1, window_bounds = array<i64: 3072, 512>}, {pipeline_mode = #tpu.pipeline_mode<synchronous>, transform_indices = @transform_2, window_bounds = array<i64: 1, 512>}, {pipeline_mode = #tpu.pipeline_mode<synchronous>, transform_indices = @transform_3, window_bounds = array<i64: 512, 256>}, {pipeline_mode = #tpu.pipeline_mode<synchronous>, transform_indices = @transform_4, window_bounds = array<i64: 1, 256>}, {pipeline_mode = #tpu.pipeline_mode<synchronous>, transform_indices = @transform_5, window_bounds = array<i64: 256, 128>}, {pipeline_mode = #tpu.pipeline_mode<synchronous>, transform_indices = @transform_6, window_bounds = array<i64: 1, 128>}, {transform_indices = @transform_7, window_bounds = array<i64: 8, 128>}]} {
    %c0 = arith.constant 0 : index
    %c0_0 = arith.constant 0 : index
    %0 = vector.load %arg1[%c0, %c0_0] : memref<8x3072xf32, #tpu.memory_space<vmem>>, vector<8x3072xf32>
    %1 = arith.truncf %0 : vector<8x3072xf32> to vector<8x3072xbf16>
    %c0_1 = arith.constant 0 : index
    %c0_2 = arith.constant 0 : index
    %2 = vector.load %arg2[%c0_1, %c0_2] : memref<3072x512xbf16, #tpu.memory_space<vmem>>, vector<3072x512xbf16>
    %cst = arith.constant dense<0.000000e+00> : vector<8x512xf32>
    %3 = tpu.matmul %1, %2, %cst {dimension_numbers = #tpu.dot_dimension_numbers<[1], [0], [0], [1], [0, 0, 1, 1], [], []>} : vector<8x3072xbf16>, vector<3072x512xbf16>, vector<8x512xf32> -> vector<8x512xf32>
    %c0_3 = arith.constant 0 : index
    %c0_4 = arith.constant 0 : index
    %4 = vector.load %arg3[%c0_3, %c0_4] : memref<1x512xf32, #tpu.memory_space<vmem>>, vector<1x512xf32>
    %5 = vector.broadcast %4 : vector<1x512xf32> to vector<8x512xf32>
    %6 = arith.addf %3, %5 : vector<8x512xf32>
    %cst_5 = arith.constant 0.000000e+00 : f32
    %7 = vector.broadcast %cst_5 : f32 to vector<8x512xf32>
    %8 = arith.maximumf %6, %7 : vector<8x512xf32>
    %9 = arith.truncf %8 : vector<8x512xf32> to vector<8x512xbf16>
    %c0_6 = arith.constant 0 : index
    %c0_7 = arith.constant 0 : index
    %10 = vector.load %arg4[%c0_6, %c0_7] : memref<512x256xbf16, #tpu.memory_space<vmem>>, vector<512x256xbf16>
    %cst_8 = arith.constant dense<0.000000e+00> : vector<8x256xf32>
    %11 = tpu.matmul %9, %10, %cst_8 {dimension_numbers = #tpu.dot_dimension_numbers<[1], [0], [0], [1], [0, 0, 1, 1], [], []>} : vector<8x512xbf16>, vector<512x256xbf16>, vector<8x256xf32> -> vector<8x256xf32>
    %c0_9 = arith.constant 0 : index
    %c0_10 = arith.constant 0 : index
    %12 = vector.load %arg5[%c0_9, %c0_10] : memref<1x256xf32, #tpu.memory_space<vmem>>, vector<1x256xf32>
    %13 = vector.broadcast %12 : vector<1x256xf32> to vector<8x256xf32>
    %14 = arith.addf %11, %13 : vector<8x256xf32>
    %cst_11 = arith.constant 0.000000e+00 : f32
    %15 = vector.broadcast %cst_11 : f32 to vector<8x256xf32>
    %16 = arith.maximumf %14, %15 : vector<8x256xf32>
    %17 = arith.truncf %16 : vector<8x256xf32> to vector<8x256xbf16>
    %c0_12 = arith.constant 0 : index
    %c0_13 = arith.constant 0 : index
    %18 = vector.load %arg6[%c0_12, %c0_13] : memref<256x128xbf16, #tpu.memory_space<vmem>>, vector<256x128xbf16>
    %cst_14 = arith.constant dense<0.000000e+00> : vector<8x128xf32>
    %19 = tpu.matmul %17, %18, %cst_14 {dimension_numbers = #tpu.dot_dimension_numbers<[1], [0], [0], [1], [0, 0, 1, 1], [], []>} : vector<8x256xbf16>, vector<256x128xbf16>, vector<8x128xf32> -> vector<8x128xf32>
    %c0_15 = arith.constant 0 : index
    %c0_16 = arith.constant 0 : index
    %20 = vector.load %arg7[%c0_15, %c0_16] : memref<1x128xf32, #tpu.memory_space<vmem>>, vector<1x128xf32>
    %21 = vector.broadcast %20 : vector<1x128xf32> to vector<8x128xf32>
    %22 = arith.addf %19, %21 : vector<8x128xf32>
    %23 = tpu.iota {dimensions = array<i32: 1>} : vector<8x128xi32>
    %c10_i32 = arith.constant 10 : i32
    %24 = vector.broadcast %c10_i32 : i32 to vector<8x128xi32>
    %25 = arith.cmpi slt, %23, %24 : vector<8x128xi32>
    %cst_17 = arith.constant -3.40282347E+38 : f32
    %26 = vector.broadcast %cst_17 : f32 to vector<8x128xf32>
    %27 = arith.select %25, %22, %26 : vector<8x128xi1>, vector<8x128xf32>
    %cst_18 = arith.constant dense<0xFF800000> : vector<8xf32>
    %28 = vector.multi_reduction <maximumf>, %27, %cst_18 [1] : vector<8x128xf32> to vector<8xf32>
    %29 = vector.shape_cast %28 : vector<8xf32> to vector<8x1xf32>
    %30 = vector.broadcast %29 : vector<8x1xf32> to vector<8x128xf32>
    %31 = arith.subf %27, %30 : vector<8x128xf32>
    %32 = math.exp %31 : vector<8x128xf32>
    %cst_19 = arith.constant dense<0.000000e+00> : vector<8xf32>
    %33 = vector.multi_reduction <add>, %32, %cst_19 [1] : vector<8x128xf32> to vector<8xf32>
    %34 = vector.shape_cast %33 : vector<8xf32> to vector<8x1xf32>
    %35 = math.log %34 : vector<8x1xf32>
    %36 = arith.addf %29, %35 : vector<8x1xf32>
    %37 = vector.broadcast %36 : vector<8x1xf32> to vector<8x128xf32>
    %38 = arith.subf %27, %37 : vector<8x128xf32>
    %c0_20 = arith.constant 0 : index
    %c0_21 = arith.constant 0 : index
    %39 = vector.load %arg8[%c0_20, %c0_21] : memref<8x128xf32, #tpu.memory_space<vmem>>, vector<8x128xf32>
    tpu.vector_store %arg8[%c0_20, %c0_21], %38 {strides = array<i32>} : memref<8x128xf32, #tpu.memory_space<vmem>>, vector<8x128xf32>,
    return
  }
  func.func @transform_0(%arg0: i32) -> (i32, i32) {
    %c0_i32 = arith.constant 0 : i32
    %c0_i32_0 = arith.constant 0 : i32
    return %arg0, %c0_i32 : i32, i32
  }
  func.func @transform_1(%arg0: i32) -> (i32, i32) {
    %c0_i32 = arith.constant 0 : i32
    %c0_i32_0 = arith.constant 0 : i32
    %c0_i32_1 = arith.constant 0 : i32
    return %c0_i32, %c0_i32_0 : i32, i32
  }
  func.func @transform_2(%arg0: i32) -> (i32, i32) {
    %c0_i32 = arith.constant 0 : i32
    %c0_i32_0 = arith.constant 0 : i32
    %c0_i32_1 = arith.constant 0 : i32
    return %c0_i32, %c0_i32_0 : i32, i32
  }
  func.func @transform_3(%arg0: i32) -> (i32, i32) {
    %c0_i32 = arith.constant 0 : i32
    %c0_i32_0 = arith.constant 0 : i32
    %c0_i32_1 = arith.constant 0 : i32
    return %c0_i32, %c0_i32_0 : i32, i32
  }
  func.func @transform_4(%arg0: i32) -> (i32, i32) {
    %c0_i32 = arith.constant 0 : i32
    %c0_i32_0 = arith.constant 0 : i32
    %c0_i32_1 = arith.constant 0 : i32
    return %c0_i32, %c0_i32_0 : i32, i32
  }
  func.func @transform_5(%arg0: i32) -> (i32, i32) {
    %c0_i32 = arith.constant 0 : i32
    %c0_i32_0 = arith.constant 0 : i32
    %c0_i32_1 = arith.constant 0 : i32
    return %c0_i32, %c0_i32_0 : i32, i32
  }
  func.func @transform_6(%arg0: i32) -> (i32, i32) {
    %c0_i32 = arith.constant 0 : i32
    %c0_i32_0 = arith.constant 0 : i32
    %c0_i32_1 = arith.constant 0 : i32
    return %c0_i32, %c0_i32_0 : i32, i32
  }
  func.func @transform_7(%arg0: i32) -> (i32, i32) {
    %c0_i32 = arith.constant 0 : i32
    %c0_i32_0 = arith.constant 0 : i32
    return %arg0, %c0_i32 : i32, i32
  }
}

</mosaic_0001>

<bundles_post_ra>
// kernel: tpu_custom_call.1
= control target key start
LH: loop header
LB: loop body
LE: loop exit
PB: predicated region body
PF: predicated region fallthrough
CT: control target
= control target key end

     0   :  { %12 = vsyncpa [#allocation3], 0  ;;  %s11503_s0 = inlined_call_operand.hbm [shape: f32[8,3072], index: 0, kind: input, shape index: {}]   ;;  %s11504_s1 = inlined_call_operand.hbm [shape: bf16[3072,512], index: 1, kind: input, shape index: {}]   ;;  %s11505_s2 = inlined_call_operand.hbm [shape: f32[1,512], index: 2, kind: input, shape index: {}]   ;;  %s11506_s3 = inlined_call_operand.hbm [shape: bf16[512,256], index: 3, kind: input, shape index: {}]   ;;  %s11507_s4 = inlined_call_operand.hbm [shape: f32[1,256], index: 4, kind: input, shape index: {}]   ;;  %s11508_s5 = inlined_call_operand.hbm [shape: bf16[256,128], index: 5, kind: input, shape index: {}]   ;;  %s11509_s6 = inlined_call_operand.hbm [shape: f32[1,128], index: 6, kind: input, shape index: {}]   ;;  %s11510_s7 = inlined_call_operand.hbm [shape: f32[8,128], index: 7, kind: output, shape index: {}]  }
   0x1   :  { %13 = vsyncpa [#allocation6], 0 }
   0x2   :  { %14 = vsyncpa [#allocation9], 0 }
   0x3   :  { %15 = vsyncpa [#allocation12], 0  ;;  %s32_s26 = sshll.u32 %s11504_s1, 4  ;;  %s33_s26 = int_to_ptr.hbm [resolvable:$true] %s32_s26 }
   0x4   :  { %16 = vsyncpa [#allocation4], 0  ;;  %s11206_s27 = smov [#allocation5]   ;;  %s56_s8 = sshll.u32 %s11506_s3, 4  ;;  %s57_s8 = int_to_ptr.hbm [resolvable:$true] %s56_s8 }
   0x5   :  { %s34_s28 = sshll.u32 %s11206_s27, 4  ;;  %s11207_s9 = smov 256   ;;  %s35_s28 = int_to_ptr.vmem [resolvable:$true] %s34_s28 }
   0x6   :  { %s11208_s10 = smov 16   ;;  %s11209_s11 = smov [#allocation8]  }
   0x7   :  { %40 = dma.hbm_to_vmem [thread:$0]  %s33_s26, 98304, %s35_s28, [#allocation6], %s11207_s9, %s11207_s9, %s11208_s10  }
   0x8   :  { %s58_s12 = sshll.u32 %s11209_s11, 4  ;;  %s11210_s13 = smov 128   ;;  %s59_s12 = int_to_ptr.vmem [resolvable:$true] %s58_s12 }
   0x9   :  { %s11211_s14 = smov 8   ;;  %s80_s16 = sshll.u32 %s11508_s5, 4  ;;  %s81_s16 = int_to_ptr.hbm [resolvable:$true] %s80_s16 }
   0xa   :  { %64 = dma.hbm_to_vmem [thread:$0]  %s57_s8, 8192, %s59_s12, [#allocation9], %s11210_s13, %s11210_s13, %s11211_s14  }
   0xb   :  { %s11212_s17 = smov [#allocation11]   ;;  %s22_s20 = sshll.u32 %s11503_s0, 4  ;;  %s23_s20 = int_to_ptr.hbm [resolvable:$true] %s22_s20 }
   0xc   :  { %s82_s18 = sshll.u32 %s11212_s17, 4  ;;  %s11213_s21 = smov 64   ;;  %s83_s18 = int_to_ptr.vmem [resolvable:$true] %s82_s18 }
   0xd   :  { %s11214_s22 = smov 4   ;;  %s11215_s23 = smov [#allocation2]  }
   0xe   :  { %88 = dma.hbm_to_vmem [thread:$0]  %s81_s16, 2048, %s83_s18, [#allocation12], %s11213_s21, %s11213_s21, %s11214_s22  }
   0xf   :  { %s24_s24 = sshll.u32 %s11215_s23, 4  ;;  %s46_s27 = sshll.u32 %s11505_s2, 4  ;;  %s25_s24 = int_to_ptr.vmem [resolvable:$true] %s24_s24  ;;  %s47_s27 = int_to_ptr.hbm [resolvable:$true] %s46_s27 }
  0x10   :  { %27 = dma.hbm_to_vmem [thread:$0]  %s23_s20, 3072, %s25_s24, [#allocation3]  }
  0x11   :  { %s70_s29 = sshll.u32 %s11507_s4, 4  ;;  %s11216_s30 = smov [#allocation7]   ;;  %s71_s29 = int_to_ptr.hbm [resolvable:$true] %s70_s29 }
  0x12   :  { %s48_s8 = sshll.u32 %s11216_s30, 4  ;;  %s11217_s0 = smov [#allocation10]   ;;  %s49_s8 = int_to_ptr.vmem [resolvable:$true] %s48_s8 }
  0x13   :  { %51 = dma.hbm_to_vmem [thread:$0]  %s47_s27, 64, %s49_s8, [#allocation6]  }
  0x14   :  { %s72_s9 = sshll.u32 %s11217_s0, 4  ;;  %s94_s12 = sshll.u32 %s11509_s6, 4  ;;  %s73_s9 = int_to_ptr.vmem [resolvable:$true] %s72_s9  ;;  %s95_s12 = int_to_ptr.hbm [resolvable:$true] %s94_s12 }
  0x15   :  { %75 = dma.hbm_to_vmem [thread:$0]  %s71_s29, 32, %s73_s9, [#allocation9]  }
  0x16   :  { %s11218_s2 = smov [#allocation13]  }
  0x17   :  { %s96_s13 = sshll.u32 %s11218_s2, 4  ;;  %s97_s13 = int_to_ptr.vmem [resolvable:$true] %s96_s13 }
  0x18   :  { %99 = dma.hbm_to_vmem [thread:$0]  %s95_s12, 16, %s97_s13, [#allocation12]  }
  0x19   :  { %11196 = dma.done.wait [#allocation3], 3072  }
  0x1a   :  { %11197 = vsyncadd [#allocation3], 4294964224 }
  0x1b   :  { %11198 = dma.done.wait [#allocation6], 98368  }
  0x1c   :  { %11199 = vsyncadd [#allocation6], 4294868928 }
  0x1d   :  { %11200 = dma.done.wait [#allocation9], 8224  }
  0x1e   :  { %11201 = vsyncadd [#allocation9], 4294959072 }
  0x1f   :  { %11202 = dma.done.wait [#allocation12], 2064  }
  0x20   :  { %11203 = vsyncadd [#allocation12], 4294965232  ;;  %v6856_v0 = vld [vmem:[#allocation5 + $0xe0] sm:$0xf]  ;;  %v10164_v1 = vld [vmem:[#allocation5 + $0xec] sm:$0xf0] }
  0x21   :  { %v6984_v2 = vld [vmem:[#allocation5 + $0x1e0] sm:$0xf]  ;;  %v6857_v3 = vor.u32 %v10164_v1, %v6856_v0  ;;  %v10196_v4 = vld [vmem:[#allocation5 + $0x1ec] sm:$0xf0]  ;;  %s11219_s4 = smov [#allocation14]   ;;  %s6729_s15 = sshll.u32 %s11510_s7, 4  ;;  %s6730_s15 = int_to_ptr.hbm [resolvable:$true] %s6729_s15 }
  0x22   :  { %v7112_v5 = vld [vmem:[#allocation5 + $0x2e0] sm:$0xf]  ;;  %v10228_v6 = vld [vmem:[#allocation5 + $0x2ec] sm:$0xf0]  ;;  %v6985_v7 = vor.u32 %v10196_v4, %v6984_v2  ;;  %s6727_s6 = sshll.u32 %s11219_s4, 4  ;;  %s6728_s6 = int_to_ptr.vmem [resolvable:$true] %s6727_s6 }
  0x23   :  { %v7113_v8 = vor.u32 %v10228_v6, %v7112_v5  ;;  %v7240_v9 = vld [vmem:[#allocation5 + $0x3e0] sm:$0xf]  ;;  %v10260_v10 = vld [vmem:[#allocation5 + $0x3ec] sm:$0xf0]  ;;  %4794 = vmatpush.bf16.msra.mxu0 %v6857_v3 }
  0x24   :  { %v6840_v11 = vld [vmem:[#allocation5 + $0xc0] sm:$0xf]  ;;  %v7241_v12 = vor.u32 %v10260_v10, %v7240_v9  ;;  %v10160_v13 = vld [vmem:[#allocation5 + $0xcc] sm:$0xf0]  ;;  %4807 = vmatpush.bf16.msra.mxu1 %v6985_v7 }
  0x25   :  { %v6968_v14 = vld [vmem:[#allocation5 + $0x1c0] sm:$0xf]  ;;  %v10192_v15 = vld [vmem:[#allocation5 + $0x1cc] sm:$0xf0]  ;;  %4820 = vmatpush.bf16.msra.mxu2 %v7113_v8  ;;  %v6841_v16 = vor.u32 %v10160_v13, %v6840_v11 }
  0x26   :  { %v6969_v17 = vor.u32 %v10192_v15, %v6968_v14  ;;  %v7096_v18 = vld [vmem:[#allocation5 + $0x2c0] sm:$0xf]  ;;  %v10224_v19 = vld [vmem:[#allocation5 + $0x2cc] sm:$0xf0]  ;;  %4833 = vmatpush.bf16.msra.mxu3 %v7241_v12 }
  0x27   :  { %v7224_v20 = vld [vmem:[#allocation5 + $0x3c0] sm:$0xf]  ;;  %v7097_v21 = vor.u32 %v10224_v19, %v7096_v18  ;;  %v10256_v22 = vld [vmem:[#allocation5 + $0x3cc] sm:$0xf0]  ;;  %4795 = vmatpush.bf16.msra.mxu0 %v6841_v16 }
  0x28   :  { %v6824_v23 = vld [vmem:[#allocation5 + $0xa0] sm:$0xf]  ;;  %v10156_v24 = vld [vmem:[#allocation5 + $0xac] sm:$0xf0]  ;;  %v7225_v25 = vor.u32 %v10256_v22, %v7224_v20  ;;  %4808 = vmatpush.bf16.msra.mxu1 %v6969_v17 }
  0x29   :  { %v6952_v26 = vld [vmem:[#allocation5 + $0x1a0] sm:$0xf]  ;;  %v10188_v27 = vld [vmem:[#allocation5 + $0x1ac] sm:$0xf0]  ;;  %v6825_v29 = vor.u32 %v10156_v24, %v6824_v23  ;;  %4821 = vmatpush.bf16.msra.mxu2 %v7097_v21 }
  0x2a   :  { %v7080_v28 = vld [vmem:[#allocation5 + $0x2a0] sm:$0xf]  ;;  %v10220_v30 = vld [vmem:[#allocation5 + $0x2ac] sm:$0xf0]  ;;  %v6953_v33 = vor.u32 %v10188_v27, %v6952_v26  ;;  %4834 = vmatpush.bf16.msra.mxu3 %v7225_v25 }
  0x2b   :  { %v7208_v31 = vld [vmem:[#allocation5 + $0x3a0] sm:$0xf]  ;;  %v10252_v32 = vld [vmem:[#allocation5 + $0x3ac] sm:$0xf0]  ;;  %v7081_v34 = vor.u32 %v10220_v30, %v7080_v28  ;;  %4796 = vmatpush.bf16.msra.mxu0 %v6825_v29 }
  0x2c   :  { %v6808_v35 = vld [vmem:[#allocation5 + $0x80] sm:$0xf]  ;;  %v10152_v36 = vld [vmem:[#allocation5 + $0x8c] sm:$0xf0]  ;;  %v7209_v38 = vor.u32 %v10252_v32, %v7208_v31  ;;  %4809 = vmatpush.bf16.msra.mxu1 %v6953_v33 }
  0x2d   :  { %v6936_v37 = vld [vmem:[#allocation5 + $0x180] sm:$0xf]  ;;  %v10184_v39 = vld [vmem:[#allocation5 + $0x18c] sm:$0xf0]  ;;  %v6809_v44 = vor.u32 %v10152_v36, %v6808_v35  ;;  %4822 = vmatpush.bf16.msra.mxu2 %v7081_v34 }
  0x2e   :  { %v7064_v40 = vld [vmem:[#allocation5 + $0x280] sm:$0xf]  ;;  %v10216_v41 = vld [vmem:[#allocation5 + $0x28c] sm:$0xf0]  ;;  %v6937_v45 = vor.u32 %v10184_v39, %v6936_v37  ;;  %4835 = vmatpush.bf16.msra.mxu3 %v7209_v38 }
  0x2f   :  { %v7192_v42 = vld [vmem:[#allocation5 + $0x380] sm:$0xf]  ;;  %v10248_v43 = vld [vmem:[#allocation5 + $0x38c] sm:$0xf0]  ;;  %v7065_v46 = vor.u32 %v10216_v41, %v7064_v40  ;;  %4797 = vmatpush.bf16.msra.mxu0 %v6809_v44 }
  0x30   :  { %v6792_v47 = vld [vmem:[#allocation5 + $0x60] sm:$0xf]  ;;  %v10148_v48 = vld [vmem:[#allocation5 + $0x6c] sm:$0xf0]  ;;  %v7193_v50 = vor.u32 %v10248_v43, %v7192_v42  ;;  %4810 = vmatpush.bf16.msra.mxu1 %v6937_v45 }
  0x31   :  { %v6920_v49 = vld [vmem:[#allocation5 + $0x160] sm:$0xf]  ;;  %v10180_v51 = vld [vmem:[#allocation5 + $0x16c] sm:$0xf0]  ;;  %v6793_v56 = vor.u32 %v10148_v48, %v6792_v47  ;;  %4823 = vmatpush.bf16.msra.mxu2 %v7065_v46 }
  0x32   :  { %v7048_v52 = vld [vmem:[#allocation5 + $0x260] sm:$0xf]  ;;  %v10212_v53 = vld [vmem:[#allocation5 + $0x26c] sm:$0xf0]  ;;  %v6921_v57 = vor.u32 %v10180_v51, %v6920_v49  ;;  %4836 = vmatpush.bf16.msra.mxu3 %v7193_v50 }
  0x33   :  { %v7176_v54 = vld [vmem:[#allocation5 + $0x360] sm:$0xf]  ;;  %v10244_v55 = vld [vmem:[#allocation5 + $0x36c] sm:$0xf0]  ;;  %v7049_v58 = vor.u32 %v10212_v53, %v7048_v52  ;;  %4798 = vmatpush.bf16.msra.mxu0 %v6793_v56 }
  0x34   :  { %v6776_v59 = vld [vmem:[#allocation5 + $0x40] sm:$0xf]  ;;  %v10144_v60 = vld [vmem:[#allocation5 + $0x4c] sm:$0xf0]  ;;  %v7177_v62 = vor.u32 %v10244_v55, %v7176_v54  ;;  %4811 = vmatpush.bf16.msra.mxu1 %v6921_v57 }
  0x35   :  { %v6904_v61 = vld [vmem:[#allocation5 + $0x140] sm:$0xf]  ;;  %v10176_v63 = vld [vmem:[#allocation5 + $0x14c] sm:$0xf0]  ;;  %v6777_v4 = vor.u32 %v10144_v60, %v6776_v59  ;;  %4824 = vmatpush.bf16.msra.mxu2 %v7049_v58 }
  0x36   :  { %v7032_v0 = vld [vmem:[#allocation5 + $0x240] sm:$0xf]  ;;  %v10208_v1 = vld [vmem:[#allocation5 + $0x24c] sm:$0xf0]  ;;  %v6905_v5 = vor.u32 %v10176_v63, %v6904_v61  ;;  %4837 = vmatpush.bf16.msra.mxu3 %v7177_v62 }
  0x37   :  { %v7160_v2 = vld [vmem:[#allocation5 + $0x340] sm:$0xf]  ;;  %v10240_v3 = vld [vmem:[#allocation5 + $0x34c] sm:$0xf0]  ;;  %v7033_v6 = vor.u32 %v10208_v1, %v7032_v0  ;;  %4799 = vmatpush.bf16.msra.mxu0 %v6777_v4 }
  0x38   :  { %v6760_v7 = vld [vmem:[#allocation5 + $0x20] sm:$0xf]  ;;  %v10140_v8 = vld [vmem:[#allocation5 + $0x2c] sm:$0xf0]  ;;  %v7161_v10 = vor.u32 %v10240_v3, %v7160_v2  ;;  %4812 = vmatpush.bf16.msra.mxu1 %v6905_v5 }
  0x39   :  { %v6888_v9 = vld [vmem:[#allocation5 + $0x120] sm:$0xf]  ;;  %v10172_v11 = vld [vmem:[#allocation5 + $0x12c] sm:$0xf0]  ;;  %v6761_v16 = vor.u32 %v10140_v8, %v6760_v7  ;;  %4825 = vmatpush.bf16.msra.mxu2 %v7033_v6 }
  0x3a   :  { %v7016_v12 = vld [vmem:[#allocation5 + $0x220] sm:$0xf]  ;;  %v10204_v13 = vld [vmem:[#allocation5 + $0x22c] sm:$0xf0]  ;;  %v6889_v19 = vor.u32 %v10172_v11, %v6888_v9  ;;  %4838 = vmatpush.bf16.msra.mxu3 %v7161_v10  ;;  %v131_v10 = vld [vmem:[#allocation2 + $0x18] sm:$0xff] }
  0x3b   :  { %v7144_v14 = vld [vmem:[#allocation5 + $0x320] sm:$0xf]  ;;  %v10236_v15 = vld [vmem:[#allocation5 + $0x32c] sm:$0xf0]  ;;  %v7017_v20 = vor.u32 %v10204_v13, %v7016_v12  ;;  %4800 = vmatpush.bf16.msra.mxu0 %v6761_v16 }
  0x3c   :  { %v6744_v17 = vld [vmem:[#allocation5] sm:$0xf]  ;;  %v10136_v18 = vld [vmem:[#allocation5 + $0xc] sm:$0xf0]  ;;  %v7145_v24 = vor.u32 %v10236_v15, %v7144_v14  ;;  %4813 = vmatpush.bf16.msra.mxu1 %v6889_v19  ;;  %v11285_v15 = vpack.c.bf16 %v131_v10, %v131_v10  ;;  %v129_v19 = vld [vmem:[#allocation2 + $0x8] sm:$0xff] }
  0x3d   :  { %v6872_v21 = vld [vmem:[#allocation5 + $0x100] sm:$0xf]  ;;  %v10168_v22 = vld [vmem:[#allocation5 + $0x10c] sm:$0xf0]  ;;  %v6745_v31 = vor.u32 %v10136_v18, %v6744_v17  ;;  %4826 = vmatpush.bf16.msra.mxu2 %v7017_v20 }
  0x3e   :  { %v7000_v23 = vld [vmem:[#allocation5 + $0x200] sm:$0xf]  ;;  %v10200_v25 = vld [vmem:[#allocation5 + $0x20c] sm:$0xf0]  ;;  %v6873_v35 = vor.u32 %v10168_v22, %v6872_v21  ;;  %4839 = vmatpush.bf16.msra.mxu3 %v7145_v24 }
  0x3f   :  { %v7128_v26 = vld [vmem:[#allocation5 + $0x300] sm:$0xf]  ;;  %v10232_v27 = vld [vmem:[#allocation5 + $0x30c] sm:$0xf0]  ;;  %v7001_v36 = vor.u32 %v10200_v25, %v7000_v23  ;;  %4801 = vmatpush.bf16.msra.mxu0 %v6745_v31  ;;  %v11290_v25 = vpack.c.bf16 %v129_v19, %v129_v19 }
  0x40   :  { %v7368_v28 = vld [vmem:[#allocation5 + $0x4e0] sm:$0xf]  ;;  %v10292_v29 = vld [vmem:[#allocation5 + $0x4ec] sm:$0xf0]  ;;  %v7129_v39 = vor.u32 %v10232_v27, %v7128_v26  ;;  %4814 = vmatpush.bf16.msra.mxu1 %v6873_v35 }
  0x41   :  { %v7496_v30 = vld [vmem:[#allocation5 + $0x5e0] sm:$0xf]  ;;  %v10324_v32 = vld [vmem:[#allocation5 + $0x5ec] sm:$0xf0]  ;;  %v7369_v40 = vor.u32 %v10292_v29, %v7368_v28  ;;  %4827 = vmatpush.bf16.msra.mxu2 %v7001_v36 }
  0x42   :  { %v7624_v33 = vld [vmem:[#allocation5 + $0x6e0] sm:$0xf]  ;;  %v10356_v34 = vld [vmem:[#allocation5 + $0x6ec] sm:$0xf0]  ;;  %v7497_v41 = vor.u32 %v10324_v32, %v7496_v30  ;;  %4840 = vmatpush.bf16.msra.mxu3 %v7129_v39 }
  0x43   :  { %v7752_v37 = vld [vmem:[#allocation5 + $0x7e0] sm:$0xf]  ;;  %v10388_v38 = vld [vmem:[#allocation5 + $0x7ec] sm:$0xf0]  ;;  %v7625_v42 = vor.u32 %v10356_v34, %v7624_v33  ;;  %4846 = vmatpush.bf16.msrb.mxu0 %v7369_v40  ;;  %4815 = vmatmul.bf16.vlgmr.msra.gmra.mxu1 %v11290_v25 }
  0x44   :  { %v7352_v43 = vld [vmem:[#allocation5 + $0x4c0] sm:$0xf]  ;;  %v10288_v44 = vld [vmem:[#allocation5 + $0x4cc] sm:$0xf0]  ;;  %v7753_v46 = vor.u32 %v10388_v38, %v7752_v37  ;;  %4859 = vmatpush.bf16.msrb.mxu1 %v7497_v41 }
  0x45   :  { %v7480_v45 = vld [vmem:[#allocation5 + $0x5c0] sm:$0xf]  ;;  %v10320_v47 = vld [vmem:[#allocation5 + $0x5cc] sm:$0xf0]  ;;  %v7353_v52 = vor.u32 %v10288_v44, %v7352_v43  ;;  %4872 = vmatpush.bf16.msrb.mxu2 %v7625_v42  ;;  %4841 = vmatmul.bf16.vlgmr.msra.gmra.mxu3 %v11285_v15 }
  0x46   :  { %v7608_v48 = vld [vmem:[#allocation5 + $0x6c0] sm:$0xf]  ;;  %v10352_v49 = vld [vmem:[#allocation5 + $0x6cc] sm:$0xf0]  ;;  %v7481_v54 = vor.u32 %v10320_v47, %v7480_v45  ;;  %4885 = vmatpush.bf16.msrb.mxu3 %v7753_v46 }
  0x47   :  { %v7736_v50 = vld [vmem:[#allocation5 + $0x7c0] sm:$0xf]  ;;  %v10384_v51 = vld [vmem:[#allocation5 + $0x7cc] sm:$0xf0]  ;;  %v7609_v55 = vor.u32 %v10352_v49, %v7608_v48  ;;  %4847 = vmatpush.bf16.msrb.mxu0 %v7353_v52 }
  0x48   :  { %v7336_v53 = vld [vmem:[#allocation5 + $0x4a0] sm:$0xf]  ;;  %v10284_v56 = vld [vmem:[#allocation5 + $0x4ac] sm:$0xf0]  ;;  %v7737_v59 = vor.u32 %v10384_v51, %v7736_v50  ;;  %4860 = vmatpush.bf16.msrb.mxu1 %v7481_v54 }
  0x49   :  { %v7464_v57 = vld [vmem:[#allocation5 + $0x5a0] sm:$0xf]  ;;  %v10316_v58 = vld [vmem:[#allocation5 + $0x5ac] sm:$0xf0]  ;;  %v7337_v0 = vor.u32 %v10284_v56, %v7336_v53  ;;  %4873 = vmatpush.bf16.msrb.mxu2 %v7609_v55 }
  0x4a   :  { %v7592_v60 = vld [vmem:[#allocation5 + $0x6a0] sm:$0xf]  ;;  %v10348_v61 = vld [vmem:[#allocation5 + $0x6ac] sm:$0xf0]  ;;  %v7465_v1 = vor.u32 %v10316_v58, %v7464_v57  ;;  %4886 = vmatpush.bf16.msrb.mxu3 %v7737_v59 }
  0x4b   :  { %v7720_v62 = vld [vmem:[#allocation5 + $0x7a0] sm:$0xf]  ;;  %v10380_v63 = vld [vmem:[#allocation5 + $0x7ac] sm:$0xf0]  ;;  %v7593_v5 = vor.u32 %v10348_v61, %v7592_v60  ;;  %4848 = vmatpush.bf16.msrb.mxu0 %v7337_v0 }
  0x4c   :  { %v7320_v2 = vld [vmem:[#allocation5 + $0x480] sm:$0xf]  ;;  %v130_v3 = vld [vmem:[#allocation2 + $0x10] sm:$0xff]  ;;  %v7721_v11 = vor.u32 %v10380_v63, %v7720_v62  ;;  %4861 = vmatpush.bf16.msrb.mxu1 %v7465_v1 }
  0x4d   :  { %v128_v4 = vld [vmem:[#allocation2] sm:$0xff]  ;;  %v10280_v6 = vld [vmem:[#allocation5 + $0x48c] sm:$0xf0]  ;;  %v11281_v8 = vpack.c.bf16 %v130_v3, %v130_v3  ;;  %4874 = vmatpush.bf16.msrb.mxu2 %v7593_v5 }
  0x4e   :  { %v7448_v7 = vld [vmem:[#allocation5 + $0x580] sm:$0xf]  ;;  %v11283_v9 = vpack.c.bf16 %v128_v4, %v128_v4  ;;  %v10312_v12 = vld [vmem:[#allocation5 + $0x58c] sm:$0xf0]  ;;  %v7321_v18 = vor.u32 %v10280_v6, %v7320_v2  ;;  %4887 = vmatpush.bf16.msrb.mxu3 %v7721_v11 }
  0x4f   :  { %v7576_v13 = vld [vmem:[#allocation5 + $0x680] sm:$0xf]  ;;  %v10344_v14 = vld [vmem:[#allocation5 + $0x68c] sm:$0xf0]  ;;  %4828 = vmatmul.bf16.vlgmr.msra.gmra.mxu2 %v11281_v8  ;;  %v7449_v20 = vor.u32 %v10312_v12, %v7448_v7 }
  0x50   :  { %v7704_v16 = vld [vmem:[#allocation5 + $0x780] sm:$0xf]  ;;  %v10376_v17 = vld [vmem:[#allocation5 + $0x78c] sm:$0xf0]  ;;  %4802 = vmatmul.bf16.vlgmr.msra.gmra.mxu0 %v11283_v9  ;;  %v7577_v21 = vor.u32 %v10344_v14, %v7576_v13 }
  0x51   :  { %v7304_v22 = vld [vmem:[#allocation5 + $0x460] sm:$0xf]  ;;  %v10276_v23 = vld [vmem:[#allocation5 + $0x46c] sm:$0xf0]  ;;  %v7705_v26 = vor.u32 %v10376_v17, %v7704_v16  ;;  %4849 = vmatpush.bf16.msrb.mxu0 %v7321_v18  ;;  %4862 = vmatpush.bf16.msrb.mxu1 %v7449_v20 }
  0x52   :  { %v7432_v24 = vld [vmem:[#allocation5 + $0x560] sm:$0xf]  ;;  %v10308_v27 = vld [vmem:[#allocation5 + $0x56c] sm:$0xf0]  ;;  %v7305_v32 = vor.u32 %v10276_v23, %v7304_v22  ;;  %4875 = vmatpush.bf16.msrb.mxu2 %v7577_v21  ;;  %v135_v23 = vld [vmem:[#allocation2 + $0x38] sm:$0xff] }
  0x53   :  { %v7560_v28 = vld [vmem:[#allocation5 + $0x660] sm:$0xf]  ;;  %v10340_v29 = vld [vmem:[#allocation5 + $0x66c] sm:$0xf0]  ;;  %v7433_v33 = vor.u32 %v10308_v27, %v7432_v24  ;;  %4888 = vmatpush.bf16.msrb.mxu3 %v7705_v26 }
  0x54   :  { %v7688_v30 = vld [vmem:[#allocation5 + $0x760] sm:$0xf]  ;;  %v10372_v31 = vld [vmem:[#allocation5 + $0x76c] sm:$0xf0]  ;;  %v7561_v34 = vor.u32 %v10340_v29, %v7560_v28  ;;  %v133_v29 = vld [vmem:[#allocation2 + $0x28] sm:$0xff] }
  0x55   :  { %v7288_v35 = vld [vmem:[#allocation5 + $0x440] sm:$0xf]  ;;  %v10272_v36 = vld [vmem:[#allocation5 + $0x44c] sm:$0xf0]  ;;  %v7689_v38 = vor.u32 %v10372_v31, %v7688_v30  ;;  %4850 = vmatpush.bf16.msrb.mxu0 %v7305_v32  ;;  %4863 = vmatpush.bf16.msrb.mxu1 %v7433_v33 }
  0x56   :  { %v7416_v37 = vld [vmem:[#allocation5 + $0x540] sm:$0xf]  ;;  %v10304_v39 = vld [vmem:[#allocation5 + $0x54c] sm:$0xf0]  ;;  %v7289_v44 = vor.u32 %v10272_v36, %v7288_v35  ;;  %4876 = vmatpush.bf16.msrb.mxu2 %v7561_v34 }
  0x57   :  { %v7544_v40 = vld [vmem:[#allocation5 + $0x640] sm:$0xf]  ;;  %v10336_v41 = vld [vmem:[#allocation5 + $0x64c] sm:$0xf0]  ;;  %v7417_v45 = vor.u32 %v10304_v39, %v7416_v37  ;;  %4889 = vmatpush.bf16.msrb.mxu3 %v7689_v38  ;;  %v11297_v38 = vpack.c.bf16 %v135_v23, %v135_v23 }
  0x58   :  { %v7672_v42 = vld [vmem:[#allocation5 + $0x740] sm:$0xf]  ;;  %v10368_v43 = vld [vmem:[#allocation5 + $0x74c] sm:$0xf0]  ;;  %v7545_v46 = vor.u32 %v10336_v41, %v7544_v40  ;;  %v11299_v40 = vpack.c.bf16 %v133_v29, %v133_v29 }
  0x59   :  { %v7272_v47 = vld [vmem:[#allocation5 + $0x420] sm:$0xf]  ;;  %v10268_v48 = vld [vmem:[#allocation5 + $0x42c] sm:$0xf0]  ;;  %v7673_v50 = vor.u32 %v10368_v43, %v7672_v42  ;;  %4851 = vmatpush.bf16.msrb.mxu0 %v7289_v44  ;;  %4864 = vmatpush.bf16.msrb.mxu1 %v7417_v45 }
  0x5a   :  { %v7400_v49 = vld [vmem:[#allocation5 + $0x520] sm:$0xf]  ;;  %v10300_v51 = vld [vmem:[#allocation5 + $0x52c] sm:$0xf0]  ;;  %v7273_v56 = vor.u32 %v10268_v48, %v7272_v47  ;;  %4877 = vmatpush.bf16.msrb.mxu2 %v7545_v46 }
  0x5b   :  { %v7528_v52 = vld [vmem:[#allocation5 + $0x620] sm:$0xf]  ;;  %v10332_v53 = vld [vmem:[#allocation5 + $0x62c] sm:$0xf0]  ;;  %v7401_v59 = vor.u32 %v10300_v51, %v7400_v49  ;;  %4890 = vmatpush.bf16.msrb.mxu3 %v7673_v50 }
  0x5c   :  { %v7656_v54 = vld [vmem:[#allocation5 + $0x720] sm:$0xf]  ;;  %v10364_v55 = vld [vmem:[#allocation5 + $0x72c] sm:$0xf0]  ;;  %v7529_v60 = vor.u32 %v10332_v53, %v7528_v52 }
  0x5d   :  { %v7256_v57 = vld [vmem:[#allocation5 + $0x400] sm:$0xf]  ;;  %v10264_v58 = vld [vmem:[#allocation5 + $0x40c] sm:$0xf0]  ;;  %v7657_v0 = vor.u32 %v10364_v55, %v7656_v54  ;;  %4852 = vmatpush.bf16.msrb.mxu0 %v7273_v56  ;;  %4865 = vmatpush.bf16.msrb.mxu1 %v7401_v59 }
  0x5e   :  { %v7384_v61 = vld [vmem:[#allocation5 + $0x500] sm:$0xf]  ;;  %v10296_v62 = vld [vmem:[#allocation5 + $0x50c] sm:$0xf0]  ;;  %v7257_v7 = vor.u32 %v10264_v58, %v7256_v57  ;;  %4878 = vmatpush.bf16.msrb.mxu2 %v7529_v60 }
  0x5f   :  { %v7512_v63 = vld [vmem:[#allocation5 + $0x600] sm:$0xf]  ;;  %v10328_v1 = vld [vmem:[#allocation5 + $0x60c] sm:$0xf0]  ;;  %v7385_v13 = vor.u32 %v10296_v62, %v7384_v61  ;;  %4891 = vmatpush.bf16.msrb.mxu3 %v7657_v0 }
  0x60   :  { %v7640_v2 = vld [vmem:[#allocation5 + $0x700] sm:$0xf]  ;;  %v10360_v3 = vld [vmem:[#allocation5 + $0x70c] sm:$0xf0]  ;;  %v7513_v14 = vor.u32 %v10328_v1, %v7512_v63 }
  0x61   :  { %v7880_v4 = vld [vmem:[#allocation5 + $0x8e0] sm:$0xf]  ;;  %v10420_v5 = vld [vmem:[#allocation5 + $0x8ec] sm:$0xf0]  ;;  %v7641_v19 = vor.u32 %v10360_v3, %v7640_v2  ;;  %4853 = vmatpush.bf16.msrb.mxu0 %v7257_v7  ;;  %4866 = vmatpush.bf16.msrb.mxu1 %v7385_v13 }
  0x62   :  { %v8008_v6 = vld [vmem:[#allocation5 + $0x9e0] sm:$0xf]  ;;  %v10452_v10 = vld [vmem:[#allocation5 + $0x9ec] sm:$0xf0]  ;;  %v7881_v20 = vor.u32 %v10420_v5, %v7880_v4  ;;  %4879 = vmatpush.bf16.msrb.mxu2 %v7513_v14 }
  0x63   :  { %v8136_v11 = vld [vmem:[#allocation5 + $0xae0] sm:$0xf]  ;;  %v10484_v12 = vld [vmem:[#allocation5 + $0xaec] sm:$0xf0]  ;;  %v8009_v24 = vor.u32 %v10452_v10, %v8008_v6  ;;  %4892 = vmatpush.bf16.msrb.mxu3 %v7641_v19 }
  0x64   :  { %v8264_v16 = vld [vmem:[#allocation5 + $0xbe0] sm:$0xf]  ;;  %v10516_v17 = vld [vmem:[#allocation5 + $0xbec] sm:$0xf0]  ;;  %v8137_v26 = vor.u32 %v10484_v12, %v8136_v11  ;;  %4867 = vmatmul.bf16.vlgmr.msrb.gmra.mxu1 %v11299_v40 }
  0x65   :  { %v134_v18 = vld [vmem:[#allocation2 + $0x30] sm:$0xff]  ;;  %v7864_v21 = vld [vmem:[#allocation5 + $0x8c0] sm:$0xf]  ;;  %v8265_v30 = vor.u32 %v10516_v17, %v8264_v16  ;;  %4898 = vmatpush.bf16.msra.mxu0 %v7881_v20  ;;  %4911 = vmatpush.bf16.msra.mxu1 %v8009_v24 }
  0x66   :  { %v132_v22 = vld [vmem:[#allocation2 + $0x20] sm:$0xff]  ;;  %v10416_v27 = vld [vmem:[#allocation5 + $0x8cc] sm:$0xf0]  ;;  %v11293_v34 = vpack.c.bf16 %v134_v18, %v134_v18  ;;  %4924 = vmatpush.bf16.msra.mxu2 %v8137_v26  ;;  %4893 = vmatmul.bf16.vlgmr.msrb.gmra.mxu3 %v11297_v38 }
  0x67   :  { %v7992_v28 = vld [vmem:[#allocation5 + $0x9c0] sm:$0xf]  ;;  %v10448_v31 = vld [vmem:[#allocation5 + $0x9cc] sm:$0xf0]  ;;  %v11295_v37 = vpack.c.bf16 %v132_v22, %v132_v22  ;;  %v7865_v39 = vor.u32 %v10416_v27, %v7864_v21  ;;  %4937 = vmatpush.bf16.msra.mxu3 %v8265_v30 }
  0x68   :  { %v8120_v32 = vld [vmem:[#allocation5 + $0xac0] sm:$0xf]  ;;  %v10480_v33 = vld [vmem:[#allocation5 + $0xacc] sm:$0xf0]  ;;  %v7993_v41 = vor.u32 %v10448_v31, %v7992_v28  ;;  %4880 = vmatmul.bf16.vlgmr.msrb.gmra.mxu2 %v11293_v34 }
  0x69   :  { %v8248_v35 = vld [vmem:[#allocation5 + $0xbc0] sm:$0xf]  ;;  %v10512_v36 = vld [vmem:[#allocation5 + $0xbcc] sm:$0xf0]  ;;  %v8121_v42 = vor.u32 %v10480_v33, %v8120_v32  ;;  %4854 = vmatmul.bf16.vlgmr.msrb.gmra.mxu0 %v11295_v37 }
  0x6a   :  { %v7848_v43 = vld [vmem:[#allocation5 + $0x8a0] sm:$0xf]  ;;  %v10412_v44 = vld [vmem:[#allocation5 + $0x8ac] sm:$0xf0]  ;;  %v8249_v46 = vor.u32 %v10512_v36, %v8248_v35  ;;  %4899 = vmatpush.bf16.msra.mxu0 %v7865_v39  ;;  %4912 = vmatpush.bf16.msra.mxu1 %v7993_v41 }
  0x6b   :  { %v7976_v45 = vld [vmem:[#allocation5 + $0x9a0] sm:$0xf]  ;;  %v10444_v47 = vld [vmem:[#allocation5 + $0x9ac] sm:$0xf0]  ;;  %v7849_v52 = vor.u32 %v10412_v44, %v7848_v43  ;;  %4925 = vmatpush.bf16.msra.mxu2 %v8121_v42 }
  0x6c   :  { %v8104_v48 = vld [vmem:[#allocation5 + $0xaa0] sm:$0xf]  ;;  %v10476_v49 = vld [vmem:[#allocation5 + $0xaac] sm:$0xf0]  ;;  %v7977_v53 = vor.u32 %v10444_v47, %v7976_v45  ;;  %4938 = vmatpush.bf16.msra.mxu3 %v8249_v46 }
  0x6d   :  { %v8232_v50 = vld [vmem:[#allocation5 + $0xba0] sm:$0xf]  ;;  %v10508_v51 = vld [vmem:[#allocation5 + $0xbac] sm:$0xf0]  ;;  %v8105_v54 = vor.u32 %v10476_v49, %v8104_v48 }
  0x6e   :  { %v7832_v55 = vld [vmem:[#allocation5 + $0x880] sm:$0xf]  ;;  %v10408_v56 = vld [vmem:[#allocation5 + $0x88c] sm:$0xf0]  ;;  %v8233_v58 = vor.u32 %v10508_v51, %v8232_v50  ;;  %4900 = vmatpush.bf16.msra.mxu0 %v7849_v52  ;;  %4913 = vmatpush.bf16.msra.mxu1 %v7977_v53 }
  0x6f   :  { %v7960_v57 = vld [vmem:[#allocation5 + $0x980] sm:$0xf]  ;;  %v10440_v59 = vld [vmem:[#allocation5 + $0x98c] sm:$0xf0]  ;;  %v7833_v0 = vor.u32 %v10408_v56, %v7832_v55  ;;  %4926 = vmatpush.bf16.msra.mxu2 %v8105_v54 }
  0x70   :  { %v8088_v60 = vld [vmem:[#allocation5 + $0xa80] sm:$0xf]  ;;  %v10472_v61 = vld [vmem:[#allocation5 + $0xa8c] sm:$0xf0]  ;;  %v7961_v1 = vor.u32 %v10440_v59, %v7960_v57  ;;  %4939 = vmatpush.bf16.msra.mxu3 %v8233_v58 }
  0x71   :  { %v8216_v62 = vld [vmem:[#allocation5 + $0xb80] sm:$0xf]  ;;  %v10504_v63 = vld [vmem:[#allocation5 + $0xb8c] sm:$0xf0]  ;;  %v8089_v2 = vor.u32 %v10472_v61, %v8088_v60 }
  0x72   :  { %v7816_v3 = vld [vmem:[#allocation5 + $0x860] sm:$0xf]  ;;  %v10404_v4 = vld [vmem:[#allocation5 + $0x86c] sm:$0xf0]  ;;  %v8217_v6 = vor.u32 %v10504_v63, %v8216_v62  ;;  %4901 = vmatpush.bf16.msra.mxu0 %v7833_v0  ;;  %4914 = vmatpush.bf16.msra.mxu1 %v7961_v1 }
  0x73   :  { %v7944_v5 = vld [vmem:[#allocation5 + $0x960] sm:$0xf]  ;;  %v10436_v7 = vld [vmem:[#allocation5 + $0x96c] sm:$0xf0]  ;;  %v7817_v14 = vor.u32 %v10404_v4, %v7816_v3  ;;  %4927 = vmatpush.bf16.msra.mxu2 %v8089_v2 }
  0x74   :  { %v8072_v10 = vld [vmem:[#allocation5 + $0xa60] sm:$0xf]  ;;  %v10468_v11 = vld [vmem:[#allocation5 + $0xa6c] sm:$0xf0]  ;;  %v7945_v16 = vor.u32 %v10436_v7, %v7944_v5  ;;  %4940 = vmatpush.bf16.msra.mxu3 %v8217_v6  ;;  %v137_v7 = vld [vmem:[#allocation2 + $0x48] sm:$0xff] }
  0x75   :  { %v8200_v12 = vld [vmem:[#allocation5 + $0xb60] sm:$0xf]  ;;  %v10500_v13 = vld [vmem:[#allocation5 + $0xb6c] sm:$0xf0]  ;;  %v8073_v17 = vor.u32 %v10468_v11, %v8072_v10  ;;  %v139_v10 = vld [vmem:[#allocation2 + $0x58] sm:$0xff] }
  0x76   :  { %v7800_v18 = vld [vmem:[#allocation5 + $0x840] sm:$0xf]  ;;  %v10400_v19 = vld [vmem:[#allocation5 + $0x84c] sm:$0xf0]  ;;  %v8201_v21 = vor.u32 %v10500_v13, %v8200_v12  ;;  %4902 = vmatpush.bf16.msra.mxu0 %v7817_v14  ;;  %4915 = vmatpush.bf16.msra.mxu1 %v7945_v16 }
  0x77   :  { %v7928_v20 = vld [vmem:[#allocation5 + $0x940] sm:$0xf]  ;;  %v10432_v22 = vld [vmem:[#allocation5 + $0x94c] sm:$0xf0]  ;;  %v7801_v28 = vor.u32 %v10400_v19, %v7800_v18  ;;  %4928 = vmatpush.bf16.msra.mxu2 %v8073_v17 }
  0x78   :  { %v8056_v23 = vld [vmem:[#allocation5 + $0xa40] sm:$0xf]  ;;  %v10464_v24 = vld [vmem:[#allocation5 + $0xa4c] sm:$0xf0]  ;;  %v7929_v29 = vor.u32 %v10432_v22, %v7928_v20  ;;  %4941 = vmatpush.bf16.msra.mxu3 %v8201_v21 }
  0x79   :  { %v8184_v26 = vld [vmem:[#allocation5 + $0xb40] sm:$0xf]  ;;  %v10496_v27 = vld [vmem:[#allocation5 + $0xb4c] sm:$0xf0]  ;;  %v8057_v30 = vor.u32 %v10464_v24, %v8056_v23  ;;  %v11309_v23 = vpack.c.bf16 %v137_v7, %v137_v7 }
  0x7a   :  { %v7784_v31 = vld [vmem:[#allocation5 + $0x820] sm:$0xf]  ;;  %v10396_v32 = vld [vmem:[#allocation5 + $0x82c] sm:$0xf0]  ;;  %v8185_v35 = vor.u32 %v10496_v27, %v8184_v26  ;;  %4903 = vmatpush.bf16.msra.mxu0 %v7801_v28  ;;  %4916 = vmatpush.bf16.msra.mxu1 %v7929_v29  ;;  %v11311_v27 = vpack.c.bf16 %v139_v10, %v139_v10 }
  0x7b   :  { %v7912_v33 = vld [vmem:[#allocation5 + $0x920] sm:$0xf]  ;;  %v10428_v36 = vld [vmem:[#allocation5 + $0x92c] sm:$0xf0]  ;;  %v7785_v44 = vor.u32 %v10396_v32, %v7784_v31  ;;  %4929 = vmatpush.bf16.msra.mxu2 %v8057_v30 }
  0x7c   :  { %v8040_v39 = vld [vmem:[#allocation5 + $0xa20] sm:$0xf]  ;;  %v10460_v41 = vld [vmem:[#allocation5 + $0xa2c] sm:$0xf0]  ;;  %v7913_v48 = vor.u32 %v10428_v36, %v7912_v33  ;;  %4942 = vmatpush.bf16.msra.mxu3 %v8185_v35 }
  0x7d   :  { %v8168_v42 = vld [vmem:[#allocation5 + $0xb20] sm:$0xf]  ;;  %v10492_v43 = vld [vmem:[#allocation5 + $0xb2c] sm:$0xf0]  ;;  %v8041_v49 = vor.u32 %v10460_v41, %v8040_v39 }
  0x7e   :  { %v7768_v45 = vld [vmem:[#allocation5 + $0x800] sm:$0xf]  ;;  %v10392_v46 = vld [vmem:[#allocation5 + $0x80c] sm:$0xf0]  ;;  %v8169_v53 = vor.u32 %v10492_v43, %v8168_v42  ;;  %4904 = vmatpush.bf16.msra.mxu0 %v7785_v44  ;;  %4917 = vmatpush.bf16.msra.mxu1 %v7913_v48 }
  0x7f   :  { %v7896_v47 = vld [vmem:[#allocation5 + $0x900] sm:$0xf]  ;;  %v10424_v50 = vld [vmem:[#allocation5 + $0x90c] sm:$0xf0]  ;;  %v7769_v59 = vor.u32 %v10392_v46, %v7768_v45  ;;  %4930 = vmatpush.bf16.msra.mxu2 %v8041_v49 }
  0x80   :  { %v8024_v51 = vld [vmem:[#allocation5 + $0xa00] sm:$0xf]  ;;  %v10456_v52 = vld [vmem:[#allocation5 + $0xa0c] sm:$0xf0]  ;;  %v7897_v63 = vor.u32 %v10424_v50, %v7896_v47  ;;  %4943 = vmatpush.bf16.msra.mxu3 %v8169_v53 }
  0x81   :  { %v8152_v54 = vld [vmem:[#allocation5 + $0xb00] sm:$0xf]  ;;  %v10488_v55 = vld [vmem:[#allocation5 + $0xb0c] sm:$0xf0]  ;;  %v8025_v0 = vor.u32 %v10456_v52, %v8024_v51 }
  0x82   :  { %v8392_v56 = vld [vmem:[#allocation5 + $0xce0] sm:$0xf]  ;;  %v10548_v57 = vld [vmem:[#allocation5 + $0xcec] sm:$0xf0]  ;;  %v8153_v4 = vor.u32 %v10488_v55, %v8152_v54  ;;  %4905 = vmatpush.bf16.msra.mxu0 %v7769_v59  ;;  %4918 = vmatpush.bf16.msra.mxu1 %v7897_v63 }
  0x83   :  { %v8520_v58 = vld [vmem:[#allocation5 + $0xde0] sm:$0xf]  ;;  %v10580_v60 = vld [vmem:[#allocation5 + $0xdec] sm:$0xf0]  ;;  %v8393_v5 = vor.u32 %v10548_v57, %v8392_v56  ;;  %4931 = vmatpush.bf16.msra.mxu2 %v8025_v0 }
  0x84   :  { %v8648_v61 = vld [vmem:[#allocation5 + $0xee0] sm:$0xf]  ;;  %v10612_v62 = vld [vmem:[#allocation5 + $0xeec] sm:$0xf0]  ;;  %v8521_v11 = vor.u32 %v10580_v60, %v8520_v58  ;;  %4944 = vmatpush.bf16.msra.mxu3 %v8153_v4 }
  0x85   :  { %v8776_v1 = vld [vmem:[#allocation5 + $0xfe0] sm:$0xf]  ;;  %v10644_v2 = vld [vmem:[#allocation5 + $0xfec] sm:$0xf0]  ;;  %v8649_v12 = vor.u32 %v10612_v62, %v8648_v61  ;;  %4919 = vmatmul.bf16.vlgmr.msra.gmra.mxu1 %v11309_v23 }
  0x86   :  { %v136_v3 = vld [vmem:[#allocation2 + $0x40] sm:$0xff]  ;;  %v138_v6 = vld [vmem:[#allocation2 + $0x50] sm:$0xff]  ;;  %v8777_v17 = vor.u32 %v10644_v2, %v8776_v1  ;;  %4950 = vmatpush.bf16.msrb.mxu0 %v8393_v5  ;;  %4963 = vmatpush.bf16.msrb.mxu1 %v8521_v11 }
  0x87   :  { %v8376_v13 = vld [vmem:[#allocation5 + $0xcc0] sm:$0xf]  ;;  %v10544_v14 = vld [vmem:[#allocation5 + $0xccc] sm:$0xf0]  ;;  %v11305_v18 = vpack.c.bf16 %v136_v3, %v136_v3  ;;  %v11307_v22 = vpack.c.bf16 %v138_v6, %v138_v6  ;;  %4976 = vmatpush.bf16.msrb.mxu2 %v8649_v12  ;;  %4945 = vmatmul.bf16.vlgmr.msra.gmra.mxu3 %v11311_v27 }
  0x88   :  { %v8504_v16 = vld [vmem:[#allocation5 + $0xdc0] sm:$0xf]  ;;  %v10576_v19 = vld [vmem:[#allocation5 + $0xdcc] sm:$0xf0]  ;;  %v8377_v28 = vor.u32 %v10544_v14, %v8376_v13  ;;  %4989 = vmatpush.bf16.msrb.mxu3 %v8777_v17 }
  0x89   :  { %v8632_v20 = vld [vmem:[#allocation5 + $0xec0] sm:$0xf]  ;;  %v10608_v21 = vld [vmem:[#allocation5 + $0xecc] sm:$0xf0]  ;;  %v8505_v29 = vor.u32 %v10576_v19, %v8504_v16  ;;  %4906 = vmatmul.bf16.vlgmr.msra.gmra.mxu0 %v11305_v18  ;;  %4932 = vmatmul.bf16.vlgmr.msra.gmra.mxu2 %v11307_v22 }
  0x8a   :  { %v8760_v24 = vld [vmem:[#allocation5 + $0xfc0] sm:$0xf]  ;;  %v10640_v26 = vld [vmem:[#allocation5 + $0xfcc] sm:$0xf0]  ;;  %v8633_v30 = vor.u32 %v10608_v21, %v8632_v20  ;;  %4951 = vmatpush.bf16.msrb.mxu0 %v8377_v28 }
  0x8b   :  { %v8360_v31 = vld [vmem:[#allocation5 + $0xca0] sm:$0xf]  ;;  %v10540_v32 = vld [vmem:[#allocation5 + $0xcac] sm:$0xf0]  ;;  %v8761_v35 = vor.u32 %v10640_v26, %v8760_v24  ;;  %4964 = vmatpush.bf16.msrb.mxu1 %v8505_v29 }
  0x8c   :  { %v8488_v33 = vld [vmem:[#allocation5 + $0xda0] sm:$0xf]  ;;  %v10572_v36 = vld [vmem:[#allocation5 + $0xdac] sm:$0xf0]  ;;  %v8361_v44 = vor.u32 %v10540_v32, %v8360_v31  ;;  %4977 = vmatpush.bf16.msrb.mxu2 %v8633_v30 }
  0x8d   :  { %v8616_v39 = vld [vmem:[#allocation5 + $0xea0] sm:$0xf]  ;;  %v10604_v41 = vld [vmem:[#allocation5 + $0xeac] sm:$0xf0]  ;;  %v8489_v45 = vor.u32 %v10572_v36, %v8488_v33  ;;  %4990 = vmatpush.bf16.msrb.mxu3 %v8761_v35 }
  0x8e   :  { %v8744_v42 = vld [vmem:[#allocation5 + $0xfa0] sm:$0xf]  ;;  %v10636_v43 = vld [vmem:[#allocation5 + $0xfac] sm:$0xf0]  ;;  %v8617_v46 = vor.u32 %v10604_v41, %v8616_v39  ;;  %4952 = vmatpush.bf16.msrb.mxu0 %v8361_v44 }
  0x8f   :  { %v8344_v47 = vld [vmem:[#allocation5 + $0xc80] sm:$0xf]  ;;  %v10536_v48 = vld [vmem:[#allocation5 + $0xc8c] sm:$0xf0]  ;;  %v8745_v50 = vor.u32 %v10636_v43, %v8744_v42  ;;  %4965 = vmatpush.bf16.msrb.mxu1 %v8489_v45 }
  0x90   :  { %v8472_v49 = vld [vmem:[#allocation5 + $0xd80] sm:$0xf]  ;;  %v10568_v51 = vld [vmem:[#allocation5 + $0xd8c] sm:$0xf0]  ;;  %v8345_v56 = vor.u32 %v10536_v48, %v8344_v47  ;;  %4978 = vmatpush.bf16.msrb.mxu2 %v8617_v46 }
  0x91   :  { %v8600_v52 = vld [vmem:[#allocation5 + $0xe80] sm:$0xf]  ;;  %v10600_v53 = vld [vmem:[#allocation5 + $0xe8c] sm:$0xf0]  ;;  %v8473_v57 = vor.u32 %v10568_v51, %v8472_v49  ;;  %4991 = vmatpush.bf16.msrb.mxu3 %v8745_v50 }
  0x92   :  { %v8728_v54 = vld [vmem:[#allocation5 + $0xf80] sm:$0xf]  ;;  %v10632_v55 = vld [vmem:[#allocation5 + $0xf8c] sm:$0xf0]  ;;  %v8601_v58 = vor.u32 %v10600_v53, %v8600_v52  ;;  %4953 = vmatpush.bf16.msrb.mxu0 %v8345_v56 }
  0x93   :  { %v8328_v59 = vld [vmem:[#allocation5 + $0xc60] sm:$0xf]  ;;  %v10532_v60 = vld [vmem:[#allocation5 + $0xc6c] sm:$0xf0]  ;;  %v8729_v62 = vor.u32 %v10632_v55, %v8728_v54  ;;  %4966 = vmatpush.bf16.msrb.mxu1 %v8473_v57 }
  0x94   :  { %v8456_v61 = vld [vmem:[#allocation5 + $0xd60] sm:$0xf]  ;;  %v10564_v63 = vld [vmem:[#allocation5 + $0xd6c] sm:$0xf0]  ;;  %v8329_v4 = vor.u32 %v10532_v60, %v8328_v59  ;;  %4979 = vmatpush.bf16.msrb.mxu2 %v8601_v58 }
  0x95   :  { %v8584_v0 = vld [vmem:[#allocation5 + $0xe60] sm:$0xf]  ;;  %v10596_v1 = vld [vmem:[#allocation5 + $0xe6c] sm:$0xf0]  ;;  %v8457_v5 = vor.u32 %v10564_v63, %v8456_v61  ;;  %4992 = vmatpush.bf16.msrb.mxu3 %v8729_v62 }
  0x96   :  { %v8712_v2 = vld [vmem:[#allocation5 + $0xf60] sm:$0xf]  ;;  %v10628_v3 = vld [vmem:[#allocation5 + $0xf6c] sm:$0xf0]  ;;  %v8585_v6 = vor.u32 %v10596_v1, %v8584_v0  ;;  %4954 = vmatpush.bf16.msrb.mxu0 %v8329_v4  ;;  %v143_v4 = vld [vmem:[#allocation2 + $0x78] sm:$0xff] }
  0x97   :  { %v8312_v7 = vld [vmem:[#allocation5 + $0xc40] sm:$0xf]  ;;  %v10528_v10 = vld [vmem:[#allocation5 + $0xc4c] sm:$0xf0]  ;;  %v8713_v12 = vor.u32 %v10628_v3, %v8712_v2  ;;  %4967 = vmatpush.bf16.msrb.mxu1 %v8457_v5  ;;  %v141_v3 = vld [vmem:[#allocation2 + $0x68] sm:$0xff] }
  0x98   :  { %v8440_v11 = vld [vmem:[#allocation5 + $0xd40] sm:$0xf]  ;;  %v10560_v13 = vld [vmem:[#allocation5 + $0xd4c] sm:$0xf0]  ;;  %v8313_v20 = vor.u32 %v10528_v10, %v8312_v7  ;;  %4980 = vmatpush.bf16.msrb.mxu2 %v8585_v6 }
  0x99   :  { %v8568_v14 = vld [vmem:[#allocation5 + $0xe40] sm:$0xf]  ;;  %v10592_v16 = vld [vmem:[#allocation5 + $0xe4c] sm:$0xf0]  ;;  %v8441_v21 = vor.u32 %v10560_v13, %v8440_v11  ;;  %4993 = vmatpush.bf16.msrb.mxu3 %v8713_v12 }
  0x9a   :  { %v8696_v17 = vld [vmem:[#allocation5 + $0xf40] sm:$0xf]  ;;  %v10624_v19 = vld [vmem:[#allocation5 + $0xf4c] sm:$0xf0]  ;;  %v8569_v24 = vor.u32 %v10592_v16, %v8568_v14  ;;  %4955 = vmatpush.bf16.msrb.mxu0 %v8313_v20  ;;  %v11321_v20 = vpack.c.bf16 %v141_v3, %v141_v3 }
  0x9b   :  { %v8296_v26 = vld [vmem:[#allocation5 + $0xc20] sm:$0xf]  ;;  %v10524_v28 = vld [vmem:[#allocation5 + $0xc2c] sm:$0xf0]  ;;  %v8697_v30 = vor.u32 %v10624_v19, %v8696_v17  ;;  %4968 = vmatpush.bf16.msrb.mxu1 %v8441_v21 }
  0x9c   :  { %v8424_v29 = vld [vmem:[#allocation5 + $0xd20] sm:$0xf]  ;;  %v10556_v31 = vld [vmem:[#allocation5 + $0xd2c] sm:$0xf0]  ;;  %v8297_v39 = vor.u32 %v10524_v28, %v8296_v26  ;;  %4981 = vmatpush.bf16.msrb.mxu2 %v8569_v24  ;;  %v11323_v26 = vpack.c.bf16 %v143_v4, %v143_v4 }
  0x9d   :  { %v8552_v32 = vld [vmem:[#allocation5 + $0xe20] sm:$0xf]  ;;  %v10588_v33 = vld [vmem:[#allocation5 + $0xe2c] sm:$0xf0]  ;;  %v8425_v43 = vor.u32 %v10556_v31, %v8424_v29  ;;  %4994 = vmatpush.bf16.msrb.mxu3 %v8697_v30 }
  0x9e   :  { %v8680_v35 = vld [vmem:[#allocation5 + $0xf20] sm:$0xf]  ;;  %v10620_v36 = vld [vmem:[#allocation5 + $0xf2c] sm:$0xf0]  ;;  %v8553_v44 = vor.u32 %v10588_v33, %v8552_v32  ;;  %4956 = vmatpush.bf16.msrb.mxu0 %v8297_v39 }
  0x9f   :  { %v8280_v41 = vld [vmem:[#allocation5 + $0xc00] sm:$0xf]  ;;  %v10520_v42 = vld [vmem:[#allocation5 + $0xc0c] sm:$0xf0]  ;;  %v8681_v48 = vor.u32 %v10620_v36, %v8680_v35  ;;  %4969 = vmatpush.bf16.msrb.mxu1 %v8425_v43 }
  0xa0   :  { %v8408_v45 = vld [vmem:[#allocation5 + $0xd00] sm:$0xf]  ;;  %v10552_v46 = vld [vmem:[#allocation5 + $0xd0c] sm:$0xf0]  ;;  %v8281_v55 = vor.u32 %v10520_v42, %v8280_v41  ;;  %4982 = vmatpush.bf16.msrb.mxu2 %v8553_v44 }
  0xa1   :  { %v8536_v47 = vld [vmem:[#allocation5 + $0xe00] sm:$0xf]  ;;  %v10584_v49 = vld [vmem:[#allocation5 + $0xe0c] sm:$0xf0]  ;;  %v8409_v59 = vor.u32 %v10552_v46, %v8408_v45  ;;  %4995 = vmatpush.bf16.msrb.mxu3 %v8681_v48 }
  0xa2   :  { %v8664_v50 = vld [vmem:[#allocation5 + $0xf00] sm:$0xf]  ;;  %v10616_v51 = vld [vmem:[#allocation5 + $0xf0c] sm:$0xf0]  ;;  %v8537_v60 = vor.u32 %v10584_v49, %v8536_v47  ;;  %4957 = vmatpush.bf16.msrb.mxu0 %v8281_v55 }
  0xa3   :  { %v8904_v52 = vld [vmem:[#allocation5 + $0x10e0] sm:$0xf]  ;;  %v10676_v53 = vld [vmem:[#allocation5 + $0x10ec] sm:$0xf0]  ;;  %v8665_v0 = vor.u32 %v10616_v51, %v8664_v50  ;;  %4970 = vmatpush.bf16.msrb.mxu1 %v8409_v59 }
  0xa4   :  { %v9032_v54 = vld [vmem:[#allocation5 + $0x11e0] sm:$0xf]  ;;  %v10708_v56 = vld [vmem:[#allocation5 + $0x11ec] sm:$0xf0]  ;;  %v8905_v1 = vor.u32 %v10676_v53, %v8904_v52  ;;  %4983 = vmatpush.bf16.msrb.mxu2 %v8537_v60 }
  0xa5   :  { %v9160_v57 = vld [vmem:[#allocation5 + $0x12e0] sm:$0xf]  ;;  %v10740_v58 = vld [vmem:[#allocation5 + $0x12ec] sm:$0xf0]  ;;  %v9033_v5 = vor.u32 %v10708_v56, %v9032_v54  ;;  %4996 = vmatpush.bf16.msrb.mxu3 %v8665_v0 }
  0xa6   :  { %v9288_v61 = vld [vmem:[#allocation5 + $0x13e0] sm:$0xf]  ;;  %v10772_v62 = vld [vmem:[#allocation5 + $0x13ec] sm:$0xf0]  ;;  %v9161_v6 = vor.u32 %v10740_v58, %v9160_v57  ;;  %5002 = vmatpush.bf16.msra.mxu0 %v8905_v1  ;;  %4971 = vmatmul.bf16.vlgmr.msrb.gmra.mxu1 %v11321_v20 }
  0xa7   :  { %v140_v63 = vld [vmem:[#allocation2 + $0x60] sm:$0xff]  ;;  %v142_v2 = vld [vmem:[#allocation2 + $0x70] sm:$0xff]  ;;  %v9289_v12 = vor.u32 %v10772_v62, %v9288_v61  ;;  %5015 = vmatpush.bf16.msra.mxu1 %v9033_v5 }
  0xa8   :  { %v8888_v7 = vld [vmem:[#allocation5 + $0x10c0] sm:$0xf]  ;;  %v10672_v10 = vld [vmem:[#allocation5 + $0x10cc] sm:$0xf0]  ;;  %v11317_v13 = vpack.c.bf16 %v140_v63, %v140_v63  ;;  %v11319_v19 = vpack.c.bf16 %v142_v2, %v142_v2  ;;  %5028 = vmatpush.bf16.msra.mxu2 %v9161_v6  ;;  %4997 = vmatmul.bf16.vlgmr.msrb.gmra.mxu3 %v11323_v26 }
  0xa9   :  { %v9016_v11 = vld [vmem:[#allocation5 + $0x11c0] sm:$0xf]  ;;  %v10704_v14 = vld [vmem:[#allocation5 + $0x11cc] sm:$0xf0]  ;;  %v8889_v28 = vor.u32 %v10672_v10, %v8888_v7  ;;  %5041 = vmatpush.bf16.msra.mxu3 %v9289_v12 }
  0xaa   :  { %v9144_v16 = vld [vmem:[#allocation5 + $0x12c0] sm:$0xf]  ;;  %v10736_v17 = vld [vmem:[#allocation5 + $0x12cc] sm:$0xf0]  ;;  %v9017_v29 = vor.u32 %v10704_v14, %v9016_v11  ;;  %4958 = vmatmul.bf16.vlgmr.msrb.gmra.mxu0 %v11317_v13  ;;  %4984 = vmatmul.bf16.vlgmr.msrb.gmra.mxu2 %v11319_v19 }
  0xab   :  { %v9272_v21 = vld [vmem:[#allocation5 + $0x13c0] sm:$0xf]  ;;  %v10768_v24 = vld [vmem:[#allocation5 + $0x13cc] sm:$0xf0]  ;;  %v9145_v30 = vor.u32 %v10736_v17, %v9144_v16  ;;  %5003 = vmatpush.bf16.msra.mxu0 %v8889_v28 }
  0xac   :  { %v8872_v31 = vld [vmem:[#allocation5 + $0x10a0] sm:$0xf]  ;;  %v10668_v32 = vld [vmem:[#allocation5 + $0x10ac] sm:$0xf0]  ;;  %v9273_v35 = vor.u32 %v10768_v24, %v9272_v21  ;;  %5016 = vmatpush.bf16.msra.mxu1 %v9017_v29 }
  0xad   :  { %v9000_v33 = vld [vmem:[#allocation5 + $0x11a0] sm:$0xf]  ;;  %v10700_v36 = vld [vmem:[#allocation5 + $0x11ac] sm:$0xf0]  ;;  %v8873_v44 = vor.u32 %v10668_v32, %v8872_v31  ;;  %5029 = vmatpush.bf16.msra.mxu2 %v9145_v30 }
  0xae   :  { %v9128_v39 = vld [vmem:[#allocation5 + $0x12a0] sm:$0xf]  ;;  %v10732_v41 = vld [vmem:[#allocation5 + $0x12ac] sm:$0xf0]  ;;  %v9001_v45 = vor.u32 %v10700_v36, %v9000_v33  ;;  %5042 = vmatpush.bf16.msra.mxu3 %v9273_v35 }
  0xaf   :  { %v9256_v42 = vld [vmem:[#allocation5 + $0x13a0] sm:$0xf]  ;;  %v10764_v43 = vld [vmem:[#allocation5 + $0x13ac] sm:$0xf0]  ;;  %v9129_v46 = vor.u32 %v10732_v41, %v9128_v39  ;;  %5004 = vmatpush.bf16.msra.mxu0 %v8873_v44 }
  0xb0   :  { %v8856_v47 = vld [vmem:[#allocation5 + $0x1080] sm:$0xf]  ;;  %v10664_v48 = vld [vmem:[#allocation5 + $0x108c] sm:$0xf0]  ;;  %v9257_v50 = vor.u32 %v10764_v43, %v9256_v42  ;;  %5017 = vmatpush.bf16.msra.mxu1 %v9001_v45 }
  0xb1   :  { %v8984_v49 = vld [vmem:[#allocation5 + $0x1180] sm:$0xf]  ;;  %v10696_v51 = vld [vmem:[#allocation5 + $0x118c] sm:$0xf0]  ;;  %v8857_v56 = vor.u32 %v10664_v48, %v8856_v47  ;;  %5030 = vmatpush.bf16.msra.mxu2 %v9129_v46 }
  0xb2   :  { %v9112_v52 = vld [vmem:[#allocation5 + $0x1280] sm:$0xf]  ;;  %v10728_v53 = vld [vmem:[#allocation5 + $0x128c] sm:$0xf0]  ;;  %v8985_v57 = vor.u32 %v10696_v51, %v8984_v49  ;;  %5043 = vmatpush.bf16.msra.mxu3 %v9257_v50 }
  0xb3   :  { %v9240_v54 = vld [vmem:[#allocation5 + $0x1380] sm:$0xf]  ;;  %v10760_v55 = vld [vmem:[#allocation5 + $0x138c] sm:$0xf0]  ;;  %v9113_v58 = vor.u32 %v10728_v53, %v9112_v52  ;;  %5005 = vmatpush.bf16.msra.mxu0 %v8857_v56 }
  0xb4   :  { %v8840_v59 = vld [vmem:[#allocation5 + $0x1060] sm:$0xf]  ;;  %v10660_v60 = vld [vmem:[#allocation5 + $0x106c] sm:$0xf0]  ;;  %v9241_v62 = vor.u32 %v10760_v55, %v9240_v54  ;;  %5018 = vmatpush.bf16.msra.mxu1 %v8985_v57 }
  0xb5   :  { %v8968_v61 = vld [vmem:[#allocation5 + $0x1160] sm:$0xf]  ;;  %v10692_v63 = vld [vmem:[#allocation5 + $0x116c] sm:$0xf0]  ;;  %v8841_v4 = vor.u32 %v10660_v60, %v8840_v59  ;;  %5031 = vmatpush.bf16.msra.mxu2 %v9113_v58 }
  0xb6   :  { %v9096_v0 = vld [vmem:[#allocation5 + $0x1260] sm:$0xf]  ;;  %v10724_v1 = vld [vmem:[#allocation5 + $0x126c] sm:$0xf0]  ;;  %v8969_v5 = vor.u32 %v10692_v63, %v8968_v61  ;;  %5044 = vmatpush.bf16.msra.mxu3 %v9241_v62 }
  0xb7   :  { %v9224_v2 = vld [vmem:[#allocation5 + $0x1360] sm:$0xf]  ;;  %v10756_v3 = vld [vmem:[#allocation5 + $0x136c] sm:$0xf0]  ;;  %v9097_v6 = vor.u32 %v10724_v1, %v9096_v0  ;;  %5006 = vmatpush.bf16.msra.mxu0 %v8841_v4 }
  0xb8   :  { %v8824_v7 = vld [vmem:[#allocation5 + $0x1040] sm:$0xf]  ;;  %v10656_v10 = vld [vmem:[#allocation5 + $0x104c] sm:$0xf0]  ;;  %v9225_v12 = vor.u32 %v10756_v3, %v9224_v2  ;;  %5019 = vmatpush.bf16.msra.mxu1 %v8969_v5 }
  0xb9   :  { %v8952_v11 = vld [vmem:[#allocation5 + $0x1140] sm:$0xf]  ;;  %v10688_v14 = vld [vmem:[#allocation5 + $0x114c] sm:$0xf0]  ;;  %v8825_v28 = vor.u32 %v10656_v10, %v8824_v7  ;;  %5032 = vmatpush.bf16.msra.mxu2 %v9097_v6  ;;  %v145_v7 = vld [vmem:[#allocation2 + $0x88] sm:$0xff] }
  0xba   :  { %v9080_v16 = vld [vmem:[#allocation5 + $0x1240] sm:$0xf]  ;;  %v10720_v17 = vld [vmem:[#allocation5 + $0x124c] sm:$0xf0]  ;;  %v8953_v29 = vor.u32 %v10688_v14, %v8952_v11  ;;  %5045 = vmatpush.bf16.msra.mxu3 %v9225_v12  ;;  %v147_v10 = vld [vmem:[#allocation2 + $0x98] sm:$0xff] }
  0xbb   :  { %v9208_v21 = vld [vmem:[#allocation5 + $0x1340] sm:$0xf]  ;;  %v10752_v24 = vld [vmem:[#allocation5 + $0x134c] sm:$0xf0]  ;;  %v9081_v30 = vor.u32 %v10720_v17, %v9080_v16  ;;  %5007 = vmatpush.bf16.msra.mxu0 %v8825_v28 }
  0xbc   :  { %v8808_v31 = vld [vmem:[#allocation5 + $0x1020] sm:$0xf]  ;;  %v10652_v32 = vld [vmem:[#allocation5 + $0x102c] sm:$0xf0]  ;;  %v9209_v35 = vor.u32 %v10752_v24, %v9208_v21  ;;  %5020 = vmatpush.bf16.msra.mxu1 %v8953_v29 }
  0xbd   :  { %v8936_v33 = vld [vmem:[#allocation5 + $0x1120] sm:$0xf]  ;;  %v10684_v36 = vld [vmem:[#allocation5 + $0x112c] sm:$0xf0]  ;;  %v8809_v44 = vor.u32 %v10652_v32, %v8808_v31  ;;  %5033 = vmatpush.bf16.msra.mxu2 %v9081_v30  ;;  %v11333_v32 = vpack.c.bf16 %v145_v7, %v145_v7 }
  0xbe   :  { %v9064_v39 = vld [vmem:[#allocation5 + $0x1220] sm:$0xf]  ;;  %v10716_v41 = vld [vmem:[#allocation5 + $0x122c] sm:$0xf0]  ;;  %v8937_v47 = vor.u32 %v10684_v36, %v8936_v33  ;;  %5046 = vmatpush.bf16.msra.mxu3 %v9209_v35  ;;  %v11335_v36 = vpack.c.bf16 %v147_v10, %v147_v10 }
  0xbf   :  { %v9192_v42 = vld [vmem:[#allocation5 + $0x1320] sm:$0xf]  ;;  %v10748_v43 = vld [vmem:[#allocation5 + $0x132c] sm:$0xf0]  ;;  %v9065_v48 = vor.u32 %v10716_v41, %v9064_v39  ;;  %5008 = vmatpush.bf16.msra.mxu0 %v8809_v44 }
  0xc0   :  { %v8792_v45 = vld [vmem:[#allocation5 + $0x1000] sm:$0xf]  ;;  %v10648_v46 = vld [vmem:[#allocation5 + $0x100c] sm:$0xf0]  ;;  %v9193_v52 = vor.u32 %v10748_v43, %v9192_v42  ;;  %5021 = vmatpush.bf16.msra.mxu1 %v8937_v47 }
  0xc1   :  { %v8920_v49 = vld [vmem:[#allocation5 + $0x1100] sm:$0xf]  ;;  %v10680_v50 = vld [vmem:[#allocation5 + $0x110c] sm:$0xf0]  ;;  %v8793_v59 = vor.u32 %v10648_v46, %v8792_v45  ;;  %5034 = vmatpush.bf16.msra.mxu2 %v9065_v48 }
  0xc2   :  { %v9048_v51 = vld [vmem:[#allocation5 + $0x1200] sm:$0xf]  ;;  %v10712_v53 = vld [vmem:[#allocation5 + $0x120c] sm:$0xf0]  ;;  %v8921_v63 = vor.u32 %v10680_v50, %v8920_v49  ;;  %5047 = vmatpush.bf16.msra.mxu3 %v9193_v52 }
  0xc3   :  { %v9176_v54 = vld [vmem:[#allocation5 + $0x1300] sm:$0xf]  ;;  %v10744_v55 = vld [vmem:[#allocation5 + $0x130c] sm:$0xf0]  ;;  %v9049_v0 = vor.u32 %v10712_v53, %v9048_v51  ;;  %5009 = vmatpush.bf16.msra.mxu0 %v8793_v59 }
  0xc4   :  { %v9416_v56 = vld [vmem:[#allocation5 + $0x14e0] sm:$0xf]  ;;  %v10804_v57 = vld [vmem:[#allocation5 + $0x14ec] sm:$0xf0]  ;;  %v9177_v4 = vor.u32 %v10744_v55, %v9176_v54  ;;  %5022 = vmatpush.bf16.msra.mxu1 %v8921_v63 }
  0xc5   :  { %v9544_v58 = vld [vmem:[#allocation5 + $0x15e0] sm:$0xf]  ;;  %v10836_v60 = vld [vmem:[#allocation5 + $0x15ec] sm:$0xf0]  ;;  %v9417_v5 = vor.u32 %v10804_v57, %v9416_v56  ;;  %5035 = vmatpush.bf16.msra.mxu2 %v9049_v0 }
  0xc6   :  { %v9672_v61 = vld [vmem:[#allocation5 + $0x16e0] sm:$0xf]  ;;  %v10868_v62 = vld [vmem:[#allocation5 + $0x16ec] sm:$0xf0]  ;;  %v9545_v11 = vor.u32 %v10836_v60, %v9544_v58  ;;  %5048 = vmatpush.bf16.msra.mxu3 %v9177_v4 }
  0xc7   :  { %v9800_v1 = vld [vmem:[#allocation5 + $0x17e0] sm:$0xf]  ;;  %v10900_v2 = vld [vmem:[#allocation5 + $0x17ec] sm:$0xf0]  ;;  %v9673_v12 = vor.u32 %v10868_v62, %v9672_v61  ;;  %5054 = vmatpush.bf16.msrb.mxu0 %v9417_v5  ;;  %5023 = vmatmul.bf16.vlgmr.msra.gmra.mxu1 %v11333_v32 }
  0xc8   :  { %v144_v3 = vld [vmem:[#allocation2 + $0x80] sm:$0xff]  ;;  %v146_v6 = vld [vmem:[#allocation2 + $0x90] sm:$0xff]  ;;  %v9801_v21 = vor.u32 %v10900_v2, %v9800_v1  ;;  %5067 = vmatpush.bf16.msrb.mxu1 %v9545_v11 }
  0xc9   :  { %v9400_v14 = vld [vmem:[#allocation5 + $0x14c0] sm:$0xf]  ;;  %v10800_v16 = vld [vmem:[#allocation5 + $0x14cc] sm:$0xf0]  ;;  %v11329_v24 = vpack.c.bf16 %v144_v3, %v144_v3  ;;  %v11331_v31 = vpack.c.bf16 %v146_v6, %v146_v6  ;;  %5080 = vmatpush.bf16.msrb.mxu2 %v9673_v12  ;;  %5049 = vmatmul.bf16.vlgmr.msra.gmra.mxu3 %v11335_v36 }
  0xca   :  { %v9528_v17 = vld [vmem:[#allocation5 + $0x15c0] sm:$0xf]  ;;  %v10832_v28 = vld [vmem:[#allocation5 + $0x15cc] sm:$0xf0]  ;;  %v9401_v39 = vor.u32 %v10800_v16, %v9400_v14  ;;  %5093 = vmatpush.bf16.msrb.mxu3 %v9801_v21 }
  0xcb   :  { %v9656_v29 = vld [vmem:[#allocation5 + $0x16c0] sm:$0xf]  ;;  %v10864_v30 = vld [vmem:[#allocation5 + $0x16cc] sm:$0xf0]  ;;  %v9529_v41 = vor.u32 %v10832_v28, %v9528_v17  ;;  %5010 = vmatmul.bf16.vlgmr.msra.gmra.mxu0 %v11329_v24  ;;  %5036 = vmatmul.bf16.vlgmr.msra.gmra.mxu2 %v11331_v31 }
  0xcc   :  { %v9784_v33 = vld [vmem:[#allocation5 + $0x17c0] sm:$0xf]  ;;  %v10896_v35 = vld [vmem:[#allocation5 + $0x17cc] sm:$0xf0]  ;;  %v9657_v42 = vor.u32 %v10864_v30, %v9656_v29  ;;  %5055 = vmatpush.bf16.msrb.mxu0 %v9401_v39 }
  0xcd   :  { %v9384_v43 = vld [vmem:[#allocation5 + $0x14a0] sm:$0xf]  ;;  %v10796_v44 = vld [vmem:[#allocation5 + $0x14ac] sm:$0xf0]  ;;  %v9785_v46 = vor.u32 %v10896_v35, %v9784_v33  ;;  %5068 = vmatpush.bf16.msrb.mxu1 %v9529_v41  ;;  %v4803_v28 = vpop.f32.mrf.mxu0 }
  0xce   :  { %v9512_v45 = vld [vmem:[#allocation5 + $0x15a0] sm:$0xf]  ;;  %v10828_v47 = vld [vmem:[#allocation5 + $0x15ac] sm:$0xf0]  ;;  %v9385_v52 = vor.u32 %v10796_v44, %v9384_v43  ;;  %5081 = vmatpush.bf16.msrb.mxu2 %v9657_v42 }
  0xcf   :  { %v9640_v48 = vld [vmem:[#allocation5 + $0x16a0] sm:$0xf]  ;;  %v10860_v49 = vld [vmem:[#allocation5 + $0x16ac] sm:$0xf0]  ;;  %v9513_v54 = vor.u32 %v10828_v47, %v9512_v45  ;;  %5094 = vmatpush.bf16.msrb.mxu3 %v9785_v46 }
  0xd0   :  { %v9768_v50 = vld [vmem:[#allocation5 + $0x17a0] sm:$0xf]  ;;  %v10892_v51 = vld [vmem:[#allocation5 + $0x17ac] sm:$0xf0]  ;;  %v9641_v55 = vor.u32 %v10860_v49, %v9640_v48  ;;  %5056 = vmatpush.bf16.msrb.mxu0 %v9385_v52  ;;  %v4816_v49 = vpop.f32.mrf.mxu1 }
  0xd1   :  { %v9368_v53 = vld [vmem:[#allocation5 + $0x1480] sm:$0xf]  ;;  %v10792_v56 = vld [vmem:[#allocation5 + $0x148c] sm:$0xf0]  ;;  %v9769_v59 = vor.u32 %v10892_v51, %v9768_v50  ;;  %5069 = vmatpush.bf16.msrb.mxu1 %v9513_v54 }
  0xd2   :  { %v9496_v57 = vld [vmem:[#allocation5 + $0x1580] sm:$0xf]  ;;  %v10824_v58 = vld [vmem:[#allocation5 + $0x158c] sm:$0xf0]  ;;  %v9369_v1 = vor.u32 %v10792_v56, %v9368_v53  ;;  %5082 = vmatpush.bf16.msrb.mxu2 %v9641_v55 }
  0xd3   :  { %v9624_v60 = vld [vmem:[#allocation5 + $0x1680] sm:$0xf]  ;;  %v10856_v61 = vld [vmem:[#allocation5 + $0x168c] sm:$0xf0]  ;;  %v9497_v3 = vor.u32 %v10824_v58, %v9496_v57  ;;  %5095 = vmatpush.bf16.msrb.mxu3 %v9769_v59 }
  0xd4   :  { %v944_v62 = vld [vmem:[#allocation7] sm:$0xf]  ;;  %v10888_v0 = vld [vmem:[#allocation5 + $0x178c] sm:$0xf0]  ;;  %v9625_v4 = vor.u32 %v10856_v61, %v9624_v60  ;;  %5057 = vmatpush.bf16.msrb.mxu0 %v9369_v1  ;;  %v4829_v60 = vpop.f32.mrf.mxu2 }
  0xd5   :  { %v9752_v63 = vld [vmem:[#allocation5 + $0x1780] sm:$0xf]  ;;  %v10788_v5 = vld [vmem:[#allocation5 + $0x146c] sm:$0xf0]  ;;  %v946_v7 = vperm.slane %v944_v62, 0  ;;  %5070 = vmatpush.bf16.msrb.mxu1 %v9497_v3 }
  0xd6   :  { %v9352_v2 = vld [vmem:[#allocation5 + $0x1460] sm:$0xf]  ;;  %v9753_v10 = vor.u32 %v10888_v0, %v9752_v63  ;;  %v10820_v11 = vld [vmem:[#allocation5 + $0x156c] sm:$0xf0]  ;;  %5083 = vmatpush.bf16.msrb.mxu2 %v9625_v4  ;;  %v4842_v0 = vpop.f32.mrf.mxu3  ;;  %v4805_v4 = vpop.f32.mrf.mxu0 }
  0xd7   :  { %v9480_v6 = vld [vmem:[#allocation5 + $0x1560] sm:$0xf]  ;;  %v10852_v14 = vld [vmem:[#allocation5 + $0x166c] sm:$0xf0]  ;;  %v9353_v21 = vor.u32 %v10788_v5, %v9352_v2  ;;  %v4804_v41 = vadd.f32 %v4803_v28, %v946_v7  ;;  %v10162_v28 = vld [vmem:[#allocation5 + $0xe4] sm:$0xf] }
  0xd8   :  { %v9608_v12 = vld [vmem:[#allocation5 + $0x1660] sm:$0xf]  ;;  %v10884_v17 = vld [vmem:[#allocation5 + $0x176c] sm:$0xf0]  ;;  %v9481_v29 = vor.u32 %v10820_v11, %v9480_v6  ;;  %5096 = vmatpush.bf16.msrb.mxu3 %v9753_v10  ;;  %v7226_v4 = vld [vmem:[#allocation5 + $0x3d0] sm:$0xf0] }
  0xd9   :  { %v9736_v16 = vld [vmem:[#allocation5 + $0x1760] sm:$0xf]  ;;  %v9609_v30 = vor.u32 %v10852_v14, %v9608_v12  ;;  %v10784_v35 = vld [vmem:[#allocation5 + $0x144c] sm:$0xf0]  ;;  %5058 = vmatpush.bf16.msrb.mxu0 %v9353_v21  ;;  %v4817_v55 = vadd.f32 %v4816_v49, %v4804_v41  ;;  %v7114_v41 = vld [vmem:[#allocation5 + $0x2f0] sm:$0xf0] }
  0xda   :  { %v9336_v33 = vld [vmem:[#allocation5 + $0x1440] sm:$0xf]  ;;  %v9737_v42 = vor.u32 %v10884_v17, %v9736_v16  ;;  %v10816_v43 = vld [vmem:[#allocation5 + $0x154c] sm:$0xf0]  ;;  %5071 = vmatpush.bf16.msrb.mxu1 %v9481_v29  ;;  %v6858_v29 = vld [vmem:[#allocation5 + $0xf0] sm:$0xf0] }
  0xdb   :  { %v9464_v39 = vld [vmem:[#allocation5 + $0x1540] sm:$0xf]  ;;  %v10848_v45 = vld [vmem:[#allocation5 + $0x164c] sm:$0xf0]  ;;  %v9337_v48 = vor.u32 %v10784_v35, %v9336_v33  ;;  %5084 = vmatpush.bf16.msrb.mxu2 %v9609_v30  ;;  %v4830_v63 = vadd.f32 %v4829_v60, %v4817_v55  ;;  %v10194_v30 = vld [vmem:[#allocation5 + $0x1e4] sm:$0xf]  ;;  %v6861_v49 = vor.u32 %v10162_v28, %v6858_v29 }
  0xdc   :  { %v9592_v44 = vld [vmem:[#allocation5 + $0x1640] sm:$0xf]  ;;  %v10880_v47 = vld [vmem:[#allocation5 + $0x174c] sm:$0xf0]  ;;  %v9465_v50 = vor.u32 %v10816_v43, %v9464_v39  ;;  %5097 = vmatpush.bf16.msrb.mxu3 %v9737_v42  ;;  %v6986_v35 = vld [vmem:[#allocation5 + $0x1f0] sm:$0xf0]  ;;  %v4818_v42 = vpop.f32.mrf.mxu1 }
  0xdd   :  { %v9720_v46 = vld [vmem:[#allocation5 + $0x1740] sm:$0xf]  ;;  %v9593_v51 = vor.u32 %v10848_v45, %v9592_v44  ;;  %v10780_v53 = vld [vmem:[#allocation5 + $0x142c] sm:$0xf0]  ;;  %5059 = vmatpush.bf16.msrb.mxu0 %v9337_v48  ;;  %v11341_v12 = vadd.f32 %v4842_v0, %v4830_v63  ;;  %v10226_v39 = vld [vmem:[#allocation5 + $0x2e4] sm:$0xf] }
  0xde   :  { %v9320_v52 = vld [vmem:[#allocation5 + $0x1420] sm:$0xf]  ;;  %v9721_v56 = vor.u32 %v10880_v47, %v9720_v46  ;;  %v10812_v57 = vld [vmem:[#allocation5 + $0x152c] sm:$0xf0]  ;;  %5072 = vmatpush.bf16.msrb.mxu1 %v9465_v50  ;;  %v10258_v45 = vld [vmem:[#allocation5 + $0x3e4] sm:$0xf]  ;;  %v7117_v55 = vor.u32 %v10226_v39, %v7114_v41 }
  0xdf   :  { %v9448_v54 = vld [vmem:[#allocation5 + $0x1520] sm:$0xf]  ;;  %v10844_v59 = vld [vmem:[#allocation5 + $0x162c] sm:$0xf0]  ;;  %v9321_v1 = vor.u32 %v10780_v53, %v9320_v52  ;;  %5085 = vmatpush.bf16.msrb.mxu2 %v9593_v51  ;;  %v7242_v46 = vld [vmem:[#allocation5 + $0x3f0] sm:$0xf0]  ;;  %v4831_v53 = vpop.f32.mrf.mxu2 }
  0xe0   :  { %v9576_v58 = vld [vmem:[#allocation5 + $0x1620] sm:$0xf]  ;;  %v10876_v62 = vld [vmem:[#allocation5 + $0x172c] sm:$0xf0]  ;;  %v9449_v5 = vor.u32 %v10812_v57, %v9448_v54  ;;  %5098 = vmatpush.bf16.msrb.mxu3 %v9721_v56  ;;  %v149_v51 = vld [vmem:[#allocation2 + $0xa8] sm:$0xff]  ;;  %v6989_v54 = vor.u32 %v10194_v30, %v6986_v35  ;;  %v7245_v60 = vor.u32 %v10258_v45, %v7242_v46 }
  0xe1   :  { %v9704_v61 = vld [vmem:[#allocation5 + $0x1720] sm:$0xf]  ;;  %v10776_v3 = vld [vmem:[#allocation5 + $0x140c] sm:$0xf0]  ;;  %v9577_v6 = vor.u32 %v10844_v59, %v9576_v58  ;;  %5060 = vmatpush.bf16.msrb.mxu0 %v9321_v1  ;;  %v151_v52 = vld [vmem:[#allocation2 + $0xb8] sm:$0xff]  ;;  %v4844_v59 = vpop.f32.mrf.mxu3 }
  0xe2   :  { %v9304_v2 = vld [vmem:[#allocation5 + $0x1400] sm:$0xf]  ;;  %v10808_v10 = vld [vmem:[#allocation5 + $0x150c] sm:$0xf0]  ;;  %v9705_v14 = vor.u32 %v10876_v62, %v9704_v61  ;;  %5073 = vmatpush.bf16.msrb.mxu1 %v9449_v5  ;;  %v10158_v56 = vld [vmem:[#allocation5 + $0xc4] sm:$0xf]  ;;  %v11349_v5 = vpack.c.bf16 %v151_v52, %v151_v52 }
  0xe3   :  { %v9432_v7 = vld [vmem:[#allocation5 + $0x1500] sm:$0xf]  ;;  %v10840_v16 = vld [vmem:[#allocation5 + $0x160c] sm:$0xf0]  ;;  %v9305_v33 = vor.u32 %v10776_v3, %v9304_v2  ;;  %5086 = vmatpush.bf16.msrb.mxu2 %v9577_v6  ;;  %v6842_v57 = vld [vmem:[#allocation5 + $0xd0] sm:$0xf0]  ;;  %v11347_v2 = vpack.c.bf16 %v149_v51, %v149_v51 }
  0xe4   :  { %v9560_v11 = vld [vmem:[#allocation5 + $0x1600] sm:$0xf]  ;;  %v10872_v21 = vld [vmem:[#allocation5 + $0x170c] sm:$0xf0]  ;;  %v9433_v43 = vor.u32 %v10808_v10, %v9432_v7  ;;  %5099 = vmatpush.bf16.msrb.mxu3 %v9705_v14  ;;  %v10190_v58 = vld [vmem:[#allocation5 + $0x1c4] sm:$0xf]  ;;  %v6845_v6 = vor.u32 %v10158_v56, %v6842_v57  ;;  %v4868_v59 = vpop.f32.mrf.mxu1 }
  0xe5   :  { %v9688_v17 = vld [vmem:[#allocation5 + $0x1700] sm:$0xf]  ;;  %v9561_v44 = vor.u32 %v10840_v16, %v9560_v11  ;;  %v150_v50 = vld [vmem:[#allocation2 + $0xb0] sm:$0xff]  ;;  %5061 = vmatpush.bf16.msrb.mxu0 %v9305_v33  ;;  %v10222_v63 = vld [vmem:[#allocation5 + $0x2c4] sm:$0xf] }
  0xe6   :  { %v148_v47 = vld [vmem:[#allocation2 + $0xa0] sm:$0xff]  ;;  %v9689_v48 = vor.u32 %v10872_v21, %v9688_v17  ;;  %v6970_v62 = vld [vmem:[#allocation5 + $0x1d0] sm:$0xf0]  ;;  %5074 = vmatpush.bf16.msrb.mxu1 %v9433_v43  ;;  %v11345_v1 = vpack.c.bf16 %v150_v50, %v150_v50  ;;  %v4855_v52 = vpop.f32.mrf.mxu0 }
  0xe7   :  { %v11343_v61 = vpack.c.bf16 %v148_v47, %v148_v47  ;;  %v7098_v0 = vld [vmem:[#allocation5 + $0x2d0] sm:$0xf0]  ;;  %5087 = vmatpush.bf16.msrb.mxu2 %v9561_v44  ;;  %v10254_v3 = vld [vmem:[#allocation5 + $0x3c4] sm:$0xf]  ;;  %v6973_v7 = vor.u32 %v10190_v58, %v6970_v62  ;;  %v4856_v58 = vadd.f32 %v4855_v52, %v11341_v12 }
  0xe8   :  { %5100 = vmatpush.bf16.msrb.mxu3 %v9689_v48  ;;  %v7101_v10 = vor.u32 %v10222_v63, %v7098_v0  ;;  %v10154_v11 = vld [vmem:[#allocation5 + $0xa4] sm:$0xf]  ;;  %v6826_v14 = vld [vmem:[#allocation5 + $0xb0] sm:$0xf0]  ;;  %v7229_v17 = vor.u32 %v10254_v3, %v7226_v4 }
  0xe9   :  { %5106 = vmatpush.bf16.msra.mxu0 %v6861_v49  ;;  %v10186_v16 = vld [vmem:[#allocation5 + $0x1a4] sm:$0xf]  ;;  %v6954_v21 = vld [vmem:[#allocation5 + $0x1b0] sm:$0xf0]  ;;  %5075 = vmatmul.bf16.vlgmr.msrb.gmra.mxu1 %v11347_v2  ;;  %v6829_v35 = vor.u32 %v10154_v11, %v6826_v14 }
  0xea   :  { %5119 = vmatpush.bf16.msra.mxu1 %v6989_v54  ;;  %5062 = vmatmul.bf16.vlgmr.msrb.gmra.mxu0 %v11343_v61  ;;  %v10218_v28 = vld [vmem:[#allocation5 + $0x2a4] sm:$0xf]  ;;  %v7082_v29 = vld [vmem:[#allocation5 + $0x2b0] sm:$0xf0]  ;;  %v6957_v39 = vor.u32 %v10186_v16, %v6954_v21 }
  0xeb   :  { %5132 = vmatpush.bf16.msra.mxu2 %v7117_v55  ;;  %v10250_v30 = vld [vmem:[#allocation5 + $0x3a4] sm:$0xf]  ;;  %v7210_v33 = vld [vmem:[#allocation5 + $0x3b0] sm:$0xf0]  ;;  %5101 = vmatmul.bf16.vlgmr.msrb.gmra.mxu3 %v11349_v5  ;;  %v7085_v41 = vor.u32 %v10218_v28, %v7082_v29  ;;  %v4881_v21 = vpop.f32.mrf.mxu2 }
  0xec   :  { %5145 = vmatpush.bf16.msra.mxu3 %v7245_v60  ;;  %5088 = vmatmul.bf16.vlgmr.msrb.gmra.mxu2 %v11345_v1  ;;  %v10150_v42 = vld [vmem:[#allocation5 + $0x84] sm:$0xf]  ;;  %v6810_v43 = vld [vmem:[#allocation5 + $0x90] sm:$0xf0]  ;;  %v7213_v45 = vor.u32 %v10250_v30, %v7210_v33 }
  0xed   :  { %5107 = vmatpush.bf16.msra.mxu0 %v6845_v6  ;;  %v10182_v44 = vld [vmem:[#allocation5 + $0x184] sm:$0xf]  ;;  %v6938_v46 = vld [vmem:[#allocation5 + $0x190] sm:$0xf0]  ;;  %v6813_v51 = vor.u32 %v10150_v42, %v6810_v43  ;;  %v4869_v6 = vadd.f32 %v4868_v59, %v4856_v58 }
  0xee   :  { %5120 = vmatpush.bf16.msra.mxu1 %v6973_v7  ;;  %v10214_v47 = vld [vmem:[#allocation5 + $0x284] sm:$0xf]  ;;  %v7066_v48 = vld [vmem:[#allocation5 + $0x290] sm:$0xf0]  ;;  %v6941_v53 = vor.u32 %v10182_v44, %v6938_v46  ;;  %v4857_v44 = vpop.f32.mrf.mxu0 }
  0xef   :  { %5133 = vmatpush.bf16.msra.mxu2 %v7101_v10  ;;  %v10246_v49 = vld [vmem:[#allocation5 + $0x384] sm:$0xf]  ;;  %v7194_v50 = vld [vmem:[#allocation5 + $0x390] sm:$0xf0]  ;;  %v7069_v54 = vor.u32 %v10214_v47, %v7066_v48  ;;  %v4882_v33 = vadd.f32 %v4881_v21, %v4869_v6 }
  0xf0   :  { %5146 = vmatpush.bf16.msra.mxu3 %v7229_v17  ;;  %v10146_v55 = vld [vmem:[#allocation5 + $0x64] sm:$0xf]  ;;  %v6794_v56 = vld [vmem:[#allocation5 + $0x70] sm:$0xf0]  ;;  %v7197_v60 = vor.u32 %v10246_v49, %v7194_v50  ;;  %v4870_v50 = vpop.f32.mrf.mxu1 }
  0xf1   :  { %5108 = vmatpush.bf16.msra.mxu0 %v6829_v35  ;;  %v10178_v57 = vld [vmem:[#allocation5 + $0x164] sm:$0xf]  ;;  %v6922_v62 = vld [vmem:[#allocation5 + $0x170] sm:$0xf0]  ;;  %v6797_v7 = vor.u32 %v10146_v55, %v6794_v56  ;;  %v4894_v35 = vpop.f32.mrf.mxu3 }
  0xf2   :  { %5121 = vmatpush.bf16.msra.mxu1 %v6957_v39  ;;  %v10210_v63 = vld [vmem:[#allocation5 + $0x264] sm:$0xf]  ;;  %v7050_v0 = vld [vmem:[#allocation5 + $0x270] sm:$0xf0]  ;;  %v6925_v10 = vor.u32 %v10178_v57, %v6922_v62  ;;  %v11356_v43 = vadd.f32 %v4894_v35, %v4882_v33 }
  0xf3   :  { %5134 = vmatpush.bf16.msra.mxu2 %v7085_v41  ;;  %v10242_v3 = vld [vmem:[#allocation5 + $0x364] sm:$0xf]  ;;  %v7178_v4 = vld [vmem:[#allocation5 + $0x370] sm:$0xf0]  ;;  %v7053_v11 = vor.u32 %v10210_v63, %v7050_v0 }
  0xf4   :  { %5147 = vmatpush.bf16.msra.mxu3 %v7213_v45  ;;  %v10142_v14 = vld [vmem:[#allocation5 + $0x44] sm:$0xf]  ;;  %v6778_v16 = vld [vmem:[#allocation5 + $0x50] sm:$0xf0]  ;;  %v7181_v12 = vor.u32 %v10242_v3, %v7178_v4  ;;  %v4883_v4 = vpop.f32.mrf.mxu2 }
  0xf5   :  { %5109 = vmatpush.bf16.msra.mxu0 %v6813_v51  ;;  %v10174_v17 = vld [vmem:[#allocation5 + $0x144] sm:$0xf]  ;;  %v6906_v28 = vld [vmem:[#allocation5 + $0x150] sm:$0xf0]  ;;  %v6781_v42 = vor.u32 %v10142_v14, %v6778_v16 }
  0xf6   :  { %5122 = vmatpush.bf16.msra.mxu1 %v6941_v53  ;;  %v10206_v29 = vld [vmem:[#allocation5 + $0x244] sm:$0xf]  ;;  %v7034_v30 = vld [vmem:[#allocation5 + $0x250] sm:$0xf0]  ;;  %v6909_v45 = vor.u32 %v10174_v17, %v6906_v28 }
  0xf7   :  { %5135 = vmatpush.bf16.msra.mxu2 %v7069_v54  ;;  %v10238_v39 = vld [vmem:[#allocation5 + $0x344] sm:$0xf]  ;;  %v7162_v41 = vld [vmem:[#allocation5 + $0x350] sm:$0xf0]  ;;  %v7037_v46 = vor.u32 %v10206_v29, %v7034_v30 }
  0xf8   :  { %5148 = vmatpush.bf16.msra.mxu3 %v7197_v60  ;;  %v10138_v47 = vld [vmem:[#allocation5 + $0x24] sm:$0xf]  ;;  %v6762_v48 = vld [vmem:[#allocation5 + $0x30] sm:$0xf0]  ;;  %v7165_v51 = vor.u32 %v10238_v39, %v7162_v41 }
  0xf9   :  { %5110 = vmatpush.bf16.msra.mxu0 %v6797_v7  ;;  %v10170_v49 = vld [vmem:[#allocation5 + $0x124] sm:$0xf]  ;;  %v6890_v52 = vld [vmem:[#allocation5 + $0x130] sm:$0xf0]  ;;  %v6765_v57 = vor.u32 %v10138_v47, %v6762_v48  ;;  %v4896_v14 = vpop.f32.mrf.mxu3 }
  0xfa   :  { %5123 = vmatpush.bf16.msra.mxu1 %v6925_v10  ;;  %v10202_v53 = vld [vmem:[#allocation5 + $0x224] sm:$0xf]  ;;  %v7018_v54 = vld [vmem:[#allocation5 + $0x230] sm:$0xf0]  ;;  %v6893_v60 = vor.u32 %v10170_v49, %v6890_v52 }
  0xfb   :  { %5136 = vmatpush.bf16.msra.mxu2 %v7053_v11  ;;  %v10234_v55 = vld [vmem:[#allocation5 + $0x324] sm:$0xf]  ;;  %v7146_v56 = vld [vmem:[#allocation5 + $0x330] sm:$0xf0]  ;;  %v7021_v62 = vor.u32 %v10202_v53, %v7018_v54 }
  0xfc   :  { %5149 = vmatpush.bf16.msra.mxu3 %v7181_v12  ;;  %v10134_v58 = vld [vmem:[#allocation5 + $0x4] sm:$0xf]  ;;  %v6746_v59 = vld [vmem:[#allocation5 + $0x10] sm:$0xf0]  ;;  %v7149_v6 = vor.u32 %v10234_v55, %v7146_v56 }
  0xfd   :  { %5111 = vmatpush.bf16.msra.mxu0 %v6781_v42  ;;  %v10166_v63 = vld [vmem:[#allocation5 + $0x104] sm:$0xf]  ;;  %v6874_v0 = vld [vmem:[#allocation5 + $0x110] sm:$0xf0]  ;;  %v6749_v12 = vor.u32 %v10134_v58, %v6746_v59 }
  0xfe   :  { %5124 = vmatpush.bf16.msra.mxu1 %v6909_v45  ;;  %v10198_v3 = vld [vmem:[#allocation5 + $0x204] sm:$0xf]  ;;  %v7002_v7 = vld [vmem:[#allocation5 + $0x210] sm:$0xf0]  ;;  %v6877_v33 = vor.u32 %v10166_v63, %v6874_v0 }
  0xff   :  { %5137 = vmatpush.bf16.msra.mxu2 %v7037_v46  ;;  %v10230_v10 = vld [vmem:[#allocation5 + $0x304] sm:$0xf]  ;;  %v7130_v11 = vld [vmem:[#allocation5 + $0x310] sm:$0xf0]  ;;  %v7005_v35 = vor.u32 %v10198_v3, %v7002_v7 }
 0x100   :  { %5150 = vmatpush.bf16.msra.mxu3 %v7165_v51  ;;  %v10290_v16 = vld [vmem:[#allocation5 + $0x4e4] sm:$0xf]  ;;  %v7370_v17 = vld [vmem:[#allocation5 + $0x4f0] sm:$0xf0]  ;;  %v7133_v42 = vor.u32 %v10230_v10, %v7130_v11 }
 0x101   :  { %v10322_v21 = vld [vmem:[#allocation5 + $0x5e4] sm:$0xf]  ;;  %5112 = vmatpush.bf16.msra.mxu0 %v6765_v57  ;;  %v7498_v28 = vld [vmem:[#allocation5 + $0x5f0] sm:$0xf0]  ;;  %v7373_v44 = vor.u32 %v10290_v16, %v7370_v17 }
 0x102   :  { %v10354_v29 = vld [vmem:[#allocation5 + $0x6e4] sm:$0xf]  ;;  %v7626_v30 = vld [vmem:[#allocation5 + $0x6f0] sm:$0xf0]  ;;  %5125 = vmatpush.bf16.msra.mxu1 %v6893_v60  ;;  %v7501_v45 = vor.u32 %v10322_v21, %v7498_v28 }
 0x103   :  { %5138 = vmatpush.bf16.msra.mxu2 %v7021_v62  ;;  %v10386_v39 = vld [vmem:[#allocation5 + $0x7e4] sm:$0xf]  ;;  %v7754_v41 = vld [vmem:[#allocation5 + $0x7f0] sm:$0xf0]  ;;  %v7629_v46 = vor.u32 %v10354_v29, %v7626_v30 }
 0x104   :  { %5151 = vmatpush.bf16.msra.mxu3 %v7149_v6  ;;  %v10286_v47 = vld [vmem:[#allocation5 + $0x4c4] sm:$0xf]  ;;  %v7354_v48 = vld [vmem:[#allocation5 + $0x4d0] sm:$0xf0]  ;;  %v7757_v50 = vor.u32 %v10386_v39, %v7754_v41 }
 0x105   :  { %v10318_v49 = vld [vmem:[#allocation5 + $0x5c4] sm:$0xf]  ;;  %5113 = vmatpush.bf16.msra.mxu0 %v6749_v12  ;;  %v7482_v51 = vld [vmem:[#allocation5 + $0x5d0] sm:$0xf0]  ;;  %v7357_v56 = vor.u32 %v10286_v47, %v7354_v48 }
 0x106   :  { %v10350_v52 = vld [vmem:[#allocation5 + $0x6c4] sm:$0xf]  ;;  %v7610_v53 = vld [vmem:[#allocation5 + $0x6d0] sm:$0xf0]  ;;  %5126 = vmatpush.bf16.msra.mxu1 %v6877_v33  ;;  %v7485_v57 = vor.u32 %v10318_v49, %v7482_v51  ;;  %v4907_v33 = vpop.f32.mrf.mxu0 }
 0x107   :  { %5139 = vmatpush.bf16.msra.mxu2 %v7005_v35  ;;  %v10382_v54 = vld [vmem:[#allocation5 + $0x7c4] sm:$0xf]  ;;  %v7738_v55 = vld [vmem:[#allocation5 + $0x7d0] sm:$0xf0]  ;;  %v7613_v58 = vor.u32 %v10350_v52, %v7610_v53  ;;  %v4908_v41 = vadd.f32 %v4907_v33, %v11356_v43 }
 0x108   :  { %5152 = vmatpush.bf16.msra.mxu3 %v7133_v42  ;;  %v10282_v59 = vld [vmem:[#allocation5 + $0x4a4] sm:$0xf]  ;;  %v7338_v60 = vld [vmem:[#allocation5 + $0x4b0] sm:$0xf0]  ;;  %v7741_v63 = vor.u32 %v10382_v54, %v7738_v55  ;;  %5114 = vmatmul.bf16.vlgmr.msra.gmra.mxu0 %v11283_v9 }
 0x109   :  { %5158 = vmatpush.bf16.msrb.mxu0 %v7373_v44  ;;  %v10314_v62 = vld [vmem:[#allocation5 + $0x5a4] sm:$0xf]  ;;  %v7466_v0 = vld [vmem:[#allocation5 + $0x5b0] sm:$0xf0]  ;;  %v7341_v10 = vor.u32 %v10282_v59, %v7338_v60  ;;  %5127 = vmatmul.bf16.vlgmr.msra.gmra.mxu1 %v11290_v25  ;;  %v4920_v44 = vpop.f32.mrf.mxu1 }
 0x10a   :  { %5171 = vmatpush.bf16.msrb.mxu1 %v7501_v45  ;;  %v10346_v3 = vld [vmem:[#allocation5 + $0x6a4] sm:$0xf]  ;;  %v7594_v4 = vld [vmem:[#allocation5 + $0x6b0] sm:$0xf0]  ;;  %5140 = vmatmul.bf16.vlgmr.msra.gmra.mxu2 %v11281_v8  ;;  %v7469_v11 = vor.u32 %v10314_v62, %v7466_v0  ;;  %v4921_v51 = vadd.f32 %v4920_v44, %v4908_v41 }
 0x10b   :  { %5184 = vmatpush.bf16.msrb.mxu2 %v7629_v46  ;;  %v10378_v6 = vld [vmem:[#allocation5 + $0x7a4] sm:$0xf]  ;;  %v7722_v7 = vld [vmem:[#allocation5 + $0x7b0] sm:$0xf0]  ;;  %5153 = vmatmul.bf16.vlgmr.msra.gmra.mxu3 %v11285_v15  ;;  %v7597_v14 = vor.u32 %v10346_v3, %v7594_v4 }
 0x10c   :  { %5197 = vmatpush.bf16.msrb.mxu3 %v7757_v50  ;;  %v10278_v16 = vld [vmem:[#allocation5 + $0x484] sm:$0xf]  ;;  %v7322_v17 = vld [vmem:[#allocation5 + $0x490] sm:$0xf0]  ;;  %v7725_v12 = vor.u32 %v10378_v6, %v7722_v7  ;;  %v4933_v0 = vpop.f32.mrf.mxu2 }
 0x10d   :  { %5159 = vmatpush.bf16.msrb.mxu0 %v7357_v56  ;;  %v10310_v21 = vld [vmem:[#allocation5 + $0x584] sm:$0xf]  ;;  %v7450_v28 = vld [vmem:[#allocation5 + $0x590] sm:$0xf0]  ;;  %v7325_v42 = vor.u32 %v10278_v16, %v7322_v17  ;;  %v4934_v7 = vadd.f32 %v4933_v0, %v4921_v51 }
 0x10e   :  { %5172 = vmatpush.bf16.msrb.mxu1 %v7485_v57  ;;  %v10342_v29 = vld [vmem:[#allocation5 + $0x684] sm:$0xf]  ;;  %v7578_v30 = vld [vmem:[#allocation5 + $0x690] sm:$0xf0]  ;;  %v7453_v45 = vor.u32 %v10310_v21, %v7450_v28  ;;  %v4909_v16 = vpop.f32.mrf.mxu0 }
 0x10f   :  { %5185 = vmatpush.bf16.msrb.mxu2 %v7613_v58  ;;  %v10374_v35 = vld [vmem:[#allocation5 + $0x784] sm:$0xf]  ;;  %v7706_v39 = vld [vmem:[#allocation5 + $0x790] sm:$0xf0]  ;;  %v7581_v46 = vor.u32 %v10342_v29, %v7578_v30 }
 0x110   :  { %5198 = vmatpush.bf16.msrb.mxu3 %v7741_v63  ;;  %v10274_v47 = vld [vmem:[#allocation5 + $0x464] sm:$0xf]  ;;  %v7306_v48 = vld [vmem:[#allocation5 + $0x470] sm:$0xf0]  ;;  %v7709_v50 = vor.u32 %v10374_v35, %v7706_v39 }
 0x111   :  { %5160 = vmatpush.bf16.msrb.mxu0 %v7341_v10  ;;  %v10306_v49 = vld [vmem:[#allocation5 + $0x564] sm:$0xf]  ;;  %v7434_v52 = vld [vmem:[#allocation5 + $0x570] sm:$0xf0]  ;;  %v7309_v57 = vor.u32 %v10274_v47, %v7306_v48  ;;  %v4946_v10 = vpop.f32.mrf.mxu3  ;;  %v4922_v21 = vpop.f32.mrf.mxu1 }
 0x112   :  { %5173 = vmatpush.bf16.msrb.mxu1 %v7469_v11  ;;  %v10338_v53 = vld [vmem:[#allocation5 + $0x664] sm:$0xf]  ;;  %v7562_v54 = vld [vmem:[#allocation5 + $0x670] sm:$0xf0]  ;;  %v7437_v43 = vor.u32 %v10306_v49, %v7434_v52 }
 0x113   :  { %5186 = vmatpush.bf16.msrb.mxu2 %v7597_v14  ;;  %v10370_v55 = vld [vmem:[#allocation5 + $0x764] sm:$0xf]  ;;  %v7690_v56 = vld [vmem:[#allocation5 + $0x770] sm:$0xf0]  ;;  %v7565_v58 = vor.u32 %v10338_v53, %v7562_v54 }
 0x114   :  { %5199 = vmatpush.bf16.msrb.mxu3 %v7725_v12  ;;  %v10270_v59 = vld [vmem:[#allocation5 + $0x444] sm:$0xf]  ;;  %v7290_v60 = vld [vmem:[#allocation5 + $0x450] sm:$0xf0]  ;;  %v7693_v63 = vor.u32 %v10370_v55, %v7690_v56  ;;  %v11363_v12 = vadd.f32 %v4946_v10, %v4934_v7 }
 0x115   :  { %5161 = vmatpush.bf16.msrb.mxu0 %v7325_v42  ;;  %v10302_v62 = vld [vmem:[#allocation5 + $0x544] sm:$0xf]  ;;  %v7418_v3 = vld [vmem:[#allocation5 + $0x550] sm:$0xf0]  ;;  %v7293_v17 = vor.u32 %v10270_v59, %v7290_v60 }
 0x116   :  { %5174 = vmatpush.bf16.msrb.mxu1 %v7453_v45  ;;  %v10334_v4 = vld [vmem:[#allocation5 + $0x644] sm:$0xf]  ;;  %v7546_v6 = vld [vmem:[#allocation5 + $0x650] sm:$0xf0]  ;;  %v7421_v28 = vor.u32 %v10302_v62, %v7418_v3 }
 0x117   :  { %5187 = vmatpush.bf16.msrb.mxu2 %v7581_v46  ;;  %v10366_v11 = vld [vmem:[#allocation5 + $0x744] sm:$0xf]  ;;  %v7674_v14 = vld [vmem:[#allocation5 + $0x750] sm:$0xf0]  ;;  %v7549_v29 = vor.u32 %v10334_v4, %v7546_v6 }
 0x118   :  { %5200 = vmatpush.bf16.msrb.mxu3 %v7709_v50  ;;  %v10266_v30 = vld [vmem:[#allocation5 + $0x424] sm:$0xf]  ;;  %v7274_v33 = vld [vmem:[#allocation5 + $0x430] sm:$0xf0]  ;;  %v7677_v39 = vor.u32 %v10366_v11, %v7674_v14 }
 0x119   :  { %5162 = vmatpush.bf16.msrb.mxu0 %v7309_v57  ;;  %v10298_v35 = vld [vmem:[#allocation5 + $0x524] sm:$0xf]  ;;  %v7402_v41 = vld [vmem:[#allocation5 + $0x530] sm:$0xf0]  ;;  %v7277_v47 = vor.u32 %v10266_v30, %v7274_v33 }
 0x11a   :  { %5175 = vmatpush.bf16.msrb.mxu1 %v7437_v43  ;;  %v10330_v42 = vld [vmem:[#allocation5 + $0x624] sm:$0xf]  ;;  %v7530_v44 = vld [vmem:[#allocation5 + $0x630] sm:$0xf0]  ;;  %v7405_v50 = vor.u32 %v10298_v35, %v7402_v41 }
 0x11b   :  { %5188 = vmatpush.bf16.msrb.mxu2 %v7565_v58  ;;  %v10362_v45 = vld [vmem:[#allocation5 + $0x724] sm:$0xf]  ;;  %v7658_v46 = vld [vmem:[#allocation5 + $0x730] sm:$0xf0]  ;;  %v7533_v51 = vor.u32 %v10330_v42, %v7530_v44  ;;  %v4935_v58 = vpop.f32.mrf.mxu2 }
 0x11c   :  { %5201 = vmatpush.bf16.msrb.mxu3 %v7693_v63  ;;  %v10262_v48 = vld [vmem:[#allocation5 + $0x404] sm:$0xf]  ;;  %v7258_v49 = vld [vmem:[#allocation5 + $0x410] sm:$0xf0]  ;;  %v7661_v55 = vor.u32 %v10362_v45, %v7658_v46  ;;  %v4948_v63 = vpop.f32.mrf.mxu3 }
 0x11d   :  { %5163 = vmatpush.bf16.msrb.mxu0 %v7293_v17  ;;  %v10294_v52 = vld [vmem:[#allocation5 + $0x504] sm:$0xf]  ;;  %v7386_v53 = vld [vmem:[#allocation5 + $0x510] sm:$0xf0]  ;;  %v7261_v0 = vor.u32 %v10262_v48, %v7258_v49 }
 0x11e   :  { %5176 = vmatpush.bf16.msrb.mxu1 %v7421_v28  ;;  %v10326_v54 = vld [vmem:[#allocation5 + $0x604] sm:$0xf]  ;;  %v7514_v56 = vld [vmem:[#allocation5 + $0x610] sm:$0xf0]  ;;  %v7389_v7 = vor.u32 %v10294_v52, %v7386_v53 }
 0x11f   :  { %5189 = vmatpush.bf16.msrb.mxu2 %v7549_v29  ;;  %v10358_v57 = vld [vmem:[#allocation5 + $0x704] sm:$0xf]  ;;  %v7642_v43 = vld [vmem:[#allocation5 + $0x710] sm:$0xf0]  ;;  %v7517_v10 = vor.u32 %v10326_v54, %v7514_v56 }
 0x120   :  { %5202 = vmatpush.bf16.msrb.mxu3 %v7677_v39  ;;  %v10418_v59 = vld [vmem:[#allocation5 + $0x8e4] sm:$0xf]  ;;  %v7882_v60 = vld [vmem:[#allocation5 + $0x8f0] sm:$0xf0]  ;;  %v7645_v16 = vor.u32 %v10358_v57, %v7642_v43 }
 0x121   :  { %v10450_v62 = vld [vmem:[#allocation5 + $0x9e4] sm:$0xf]  ;;  %5164 = vmatpush.bf16.msrb.mxu0 %v7277_v47  ;;  %v8010_v3 = vld [vmem:[#allocation5 + $0x9f0] sm:$0xf0]  ;;  %v7885_v17 = vor.u32 %v10418_v59, %v7882_v60 }
 0x122   :  { %v10482_v4 = vld [vmem:[#allocation5 + $0xae4] sm:$0xf]  ;;  %v8138_v6 = vld [vmem:[#allocation5 + $0xaf0] sm:$0xf0]  ;;  %5177 = vmatpush.bf16.msrb.mxu1 %v7405_v50  ;;  %v8013_v21 = vor.u32 %v10450_v62, %v8010_v3 }
 0x123   :  { %5190 = vmatpush.bf16.msrb.mxu2 %v7533_v51  ;;  %v10514_v11 = vld [vmem:[#allocation5 + $0xbe4] sm:$0xf]  ;;  %v8266_v14 = vld [vmem:[#allocation5 + $0xbf0] sm:$0xf0]  ;;  %v8141_v28 = vor.u32 %v10482_v4, %v8138_v6 }
 0x124   :  { %5203 = vmatpush.bf16.msrb.mxu3 %v7661_v55  ;;  %v10414_v29 = vld [vmem:[#allocation5 + $0x8c4] sm:$0xf]  ;;  %v7866_v30 = vld [vmem:[#allocation5 + $0x8d0] sm:$0xf0]  ;;  %v8269_v35 = vor.u32 %v10514_v11, %v8266_v14 }
 0x125   :  { %v10446_v33 = vld [vmem:[#allocation5 + $0x9c4] sm:$0xf]  ;;  %5165 = vmatpush.bf16.msrb.mxu0 %v7261_v0  ;;  %v7994_v39 = vld [vmem:[#allocation5 + $0x9d0] sm:$0xf0]  ;;  %v7869_v46 = vor.u32 %v10414_v29, %v7866_v30 }
 0x126   :  { %v10478_v41 = vld [vmem:[#allocation5 + $0xac4] sm:$0xf]  ;;  %v8122_v42 = vld [vmem:[#allocation5 + $0xad0] sm:$0xf0]  ;;  %5178 = vmatpush.bf16.msrb.mxu1 %v7389_v7  ;;  %v7997_v47 = vor.u32 %v10446_v33, %v7994_v39 }
 0x127   :  { %5191 = vmatpush.bf16.msrb.mxu2 %v7517_v10  ;;  %v10510_v44 = vld [vmem:[#allocation5 + $0xbc4] sm:$0xf]  ;;  %v8250_v45 = vld [vmem:[#allocation5 + $0xbd0] sm:$0xf0]  ;;  %v8125_v48 = vor.u32 %v10478_v41, %v8122_v42  ;;  %v4959_v7 = vpop.f32.mrf.mxu0 }
 0x128   :  { %5204 = vmatpush.bf16.msrb.mxu3 %v7645_v16  ;;  %v10410_v49 = vld [vmem:[#allocation5 + $0x8a4] sm:$0xf]  ;;  %v7850_v50 = vld [vmem:[#allocation5 + $0x8b0] sm:$0xf0]  ;;  %v8253_v52 = vor.u32 %v10510_v44, %v8250_v45  ;;  %5166 = vmatmul.bf16.vlgmr.msrb.gmra.mxu0 %v11295_v37  ;;  %v4960_v14 = vadd.f32 %v4959_v7, %v11363_v12 }
 0x129   :  { %5210 = vmatpush.bf16.msra.mxu0 %v7885_v17  ;;  %v10442_v51 = vld [vmem:[#allocation5 + $0x9a4] sm:$0xf]  ;;  %v7978_v53 = vld [vmem:[#allocation5 + $0x9b0] sm:$0xf0]  ;;  %v7853_v43 = vor.u32 %v10410_v49, %v7850_v50  ;;  %5179 = vmatmul.bf16.vlgmr.msrb.gmra.mxu1 %v11299_v40  ;;  %v4972_v17 = vpop.f32.mrf.mxu1 }
 0x12a   :  { %5223 = vmatpush.bf16.msra.mxu1 %v8013_v21  ;;  %5192 = vmatmul.bf16.vlgmr.msrb.gmra.mxu2 %v11293_v34  ;;  %v10474_v54 = vld [vmem:[#allocation5 + $0xaa4] sm:$0xf]  ;;  %v8106_v55 = vld [vmem:[#allocation5 + $0xab0] sm:$0xf0]  ;;  %v7981_v58 = vor.u32 %v10442_v51, %v7978_v53  ;;  %v4973_v39 = vadd.f32 %v4972_v17, %v4960_v14 }
 0x12b   :  { %5236 = vmatpush.bf16.msra.mxu2 %v8141_v28  ;;  %v10506_v56 = vld [vmem:[#allocation5 + $0xba4] sm:$0xf]  ;;  %v8234_v57 = vld [vmem:[#allocation5 + $0xbb0] sm:$0xf0]  ;;  %5205 = vmatmul.bf16.vlgmr.msrb.gmra.mxu3 %v11297_v38  ;;  %v8109_v59 = vor.u32 %v10474_v54, %v8106_v55 }
 0x12c   :  { %5249 = vmatpush.bf16.msra.mxu3 %v8269_v35  ;;  %v10406_v60 = vld [vmem:[#allocation5 + $0x884] sm:$0xf]  ;;  %v7834_v62 = vld [vmem:[#allocation5 + $0x890] sm:$0xf0]  ;;  %v8237_v0 = vor.u32 %v10506_v56, %v8234_v57 }
 0x12d   :  { %5211 = vmatpush.bf16.msra.mxu0 %v7869_v46  ;;  %v10438_v63 = vld [vmem:[#allocation5 + $0x984] sm:$0xf]  ;;  %v7962_v3 = vld [vmem:[#allocation5 + $0x990] sm:$0xf0]  ;;  %v7837_v16 = vor.u32 %v10406_v60, %v7834_v62  ;;  %v4985_v53 = vpop.f32.mrf.mxu2 }
 0x12e   :  { %5224 = vmatpush.bf16.msra.mxu1 %v7997_v47  ;;  %v10470_v4 = vld [vmem:[#allocation5 + $0xa84] sm:$0xf]  ;;  %v8090_v6 = vld [vmem:[#allocation5 + $0xa90] sm:$0xf0]  ;;  %v7965_v21 = vor.u32 %v10438_v63, %v7962_v3  ;;  %v4986_v57 = vadd.f32 %v4985_v53, %v4973_v39 }
 0x12f   :  { %5237 = vmatpush.bf16.msra.mxu2 %v8125_v48  ;;  %v10502_v10 = vld [vmem:[#allocation5 + $0xb84] sm:$0xf]  ;;  %v8218_v11 = vld [vmem:[#allocation5 + $0xb90] sm:$0xf0]  ;;  %v8093_v28 = vor.u32 %v10470_v4, %v8090_v6  ;;  %v4961_v60 = vpop.f32.mrf.mxu0 }
 0x130   :  { %5250 = vmatpush.bf16.msra.mxu3 %v8253_v52  ;;  %v10402_v29 = vld [vmem:[#allocation5 + $0x864] sm:$0xf]  ;;  %v7818_v30 = vld [vmem:[#allocation5 + $0x870] sm:$0xf0]  ;;  %v8221_v35 = vor.u32 %v10502_v10, %v8218_v11 }
 0x131   :  { %5212 = vmatpush.bf16.msra.mxu0 %v7853_v43  ;;  %v10434_v33 = vld [vmem:[#allocation5 + $0x964] sm:$0xf]  ;;  %v7946_v41 = vld [vmem:[#allocation5 + $0x970] sm:$0xf0]  ;;  %v7821_v47 = vor.u32 %v10402_v29, %v7818_v30  ;;  %v4998_v43 = vpop.f32.mrf.mxu3  ;;  %v4974_v63 = vpop.f32.mrf.mxu1 }
 0x132   :  { %5225 = vmatpush.bf16.msra.mxu1 %v7981_v58  ;;  %v10466_v42 = vld [vmem:[#allocation5 + $0xa64] sm:$0xf]  ;;  %v8074_v44 = vld [vmem:[#allocation5 + $0xa70] sm:$0xf0]  ;;  %v7949_v12 = vor.u32 %v10434_v33, %v7946_v41 }
 0x133   :  { %5238 = vmatpush.bf16.msra.mxu2 %v8109_v59  ;;  %v10498_v45 = vld [vmem:[#allocation5 + $0xb64] sm:$0xf]  ;;  %v8202_v46 = vld [vmem:[#allocation5 + $0xb70] sm:$0xf0]  ;;  %v8077_v48 = vor.u32 %v10466_v42, %v8074_v44 }
 0x134   :  { %5251 = vmatpush.bf16.msra.mxu3 %v8237_v0  ;;  %v10398_v49 = vld [vmem:[#allocation5 + $0x844] sm:$0xf]  ;;  %v7802_v50 = vld [vmem:[#allocation5 + $0x850] sm:$0xf0]  ;;  %v8205_v52 = vor.u32 %v10498_v45, %v8202_v46  ;;  %v11370_v0 = vadd.f32 %v4998_v43, %v4986_v57 }
 0x135   :  { %5213 = vmatpush.bf16.msra.mxu0 %v7837_v16  ;;  %v10430_v51 = vld [vmem:[#allocation5 + $0x944] sm:$0xf]  ;;  %v7930_v54 = vld [vmem:[#allocation5 + $0x950] sm:$0xf0]  ;;  %v7805_v62 = vor.u32 %v10398_v49, %v7802_v50 }
 0x136   :  { %5226 = vmatpush.bf16.msra.mxu1 %v7965_v21  ;;  %v10462_v55 = vld [vmem:[#allocation5 + $0xa44] sm:$0xf]  ;;  %v8058_v56 = vld [vmem:[#allocation5 + $0xa50] sm:$0xf0]  ;;  %v7933_v3 = vor.u32 %v10430_v51, %v7930_v54 }
 0x137   :  { %5239 = vmatpush.bf16.msra.mxu2 %v8093_v28  ;;  %v10494_v58 = vld [vmem:[#allocation5 + $0xb44] sm:$0xf]  ;;  %v8186_v59 = vld [vmem:[#allocation5 + $0xb50] sm:$0xf0]  ;;  %v8061_v4 = vor.u32 %v10462_v55, %v8058_v56 }
 0x138   :  { %5252 = vmatpush.bf16.msra.mxu3 %v8221_v35  ;;  %v10394_v6 = vld [vmem:[#allocation5 + $0x824] sm:$0xf]  ;;  %v7786_v7 = vld [vmem:[#allocation5 + $0x830] sm:$0xf0]  ;;  %v8189_v11 = vor.u32 %v10494_v58, %v8186_v59 }
 0x139   :  { %5214 = vmatpush.bf16.msra.mxu0 %v7821_v47  ;;  %v10426_v10 = vld [vmem:[#allocation5 + $0x924] sm:$0xf]  ;;  %v7914_v14 = vld [vmem:[#allocation5 + $0x930] sm:$0xf0]  ;;  %v7789_v29 = vor.u32 %v10394_v6, %v7786_v7 }
 0x13a   :  { %5227 = vmatpush.bf16.msra.mxu1 %v7949_v12  ;;  %v10458_v16 = vld [vmem:[#allocation5 + $0xa24] sm:$0xf]  ;;  %v8042_v17 = vld [vmem:[#allocation5 + $0xa30] sm:$0xf0]  ;;  %v7917_v35 = vor.u32 %v10426_v10, %v7914_v14 }
 0x13b   :  { %5240 = vmatpush.bf16.msra.mxu2 %v8077_v48  ;;  %v10490_v21 = vld [vmem:[#allocation5 + $0xb24] sm:$0xf]  ;;  %v8170_v28 = vld [vmem:[#allocation5 + $0xb30] sm:$0xf0]  ;;  %v8045_v39 = vor.u32 %v10458_v16, %v8042_v17  ;;  %v4987_v48 = vpop.f32.mrf.mxu2 }
 0x13c   :  { %5253 = vmatpush.bf16.msra.mxu3 %v8205_v52  ;;  %v10390_v30 = vld [vmem:[#allocation5 + $0x804] sm:$0xf]  ;;  %v7770_v33 = vld [vmem:[#allocation5 + $0x810] sm:$0xf0]  ;;  %v8173_v45 = vor.u32 %v10490_v21, %v8170_v28  ;;  %v5000_v52 = vpop.f32.mrf.mxu3 }
 0x13d   :  { %5215 = vmatpush.bf16.msra.mxu0 %v7805_v62  ;;  %v10422_v41 = vld [vmem:[#allocation5 + $0x904] sm:$0xf]  ;;  %v7898_v42 = vld [vmem:[#allocation5 + $0x910] sm:$0xf0]  ;;  %v7773_v53 = vor.u32 %v10390_v30, %v7770_v33 }
 0x13e   :  { %5228 = vmatpush.bf16.msra.mxu1 %v7933_v3  ;;  %v10454_v44 = vld [vmem:[#allocation5 + $0xa04] sm:$0xf]  ;;  %v8026_v46 = vld [vmem:[#allocation5 + $0xa10] sm:$0xf0]  ;;  %v7901_v57 = vor.u32 %v10422_v41, %v7898_v42 }
 0x13f   :  { %5241 = vmatpush.bf16.msra.mxu2 %v8061_v4  ;;  %v10486_v47 = vld [vmem:[#allocation5 + $0xb04] sm:$0xf]  ;;  %v8154_v12 = vld [vmem:[#allocation5 + $0xb10] sm:$0xf0]  ;;  %v8029_v43 = vor.u32 %v10454_v44, %v8026_v46 }
 0x140   :  { %5254 = vmatpush.bf16.msra.mxu3 %v8189_v11  ;;  %v10546_v49 = vld [vmem:[#allocation5 + $0xce4] sm:$0xf]  ;;  %v8394_v50 = vld [vmem:[#allocation5 + $0xcf0] sm:$0xf0]  ;;  %v8157_v60 = vor.u32 %v10486_v47, %v8154_v12 }
 0x141   :  { %v10578_v51 = vld [vmem:[#allocation5 + $0xde4] sm:$0xf]  ;;  %5216 = vmatpush.bf16.msra.mxu0 %v7789_v29  ;;  %v8522_v54 = vld [vmem:[#allocation5 + $0xdf0] sm:$0xf0]  ;;  %v8397_v62 = vor.u32 %v10546_v49, %v8394_v50 }
 0x142   :  { %v10610_v55 = vld [vmem:[#allocation5 + $0xee4] sm:$0xf]  ;;  %v8650_v56 = vld [vmem:[#allocation5 + $0xef0] sm:$0xf0]  ;;  %5229 = vmatpush.bf16.msra.mxu1 %v7917_v35  ;;  %v8525_v63 = vor.u32 %v10578_v51, %v8522_v54 }
 0x143   :  { %5242 = vmatpush.bf16.msra.mxu2 %v8045_v39  ;;  %v10642_v58 = vld [vmem:[#allocation5 + $0xfe4] sm:$0xf]  ;;  %v8778_v59 = vld [vmem:[#allocation5 + $0xff0] sm:$0xf0]  ;;  %v8653_v3 = vor.u32 %v10610_v55, %v8650_v56 }
 0x144   :  { %5255 = vmatpush.bf16.msra.mxu3 %v8173_v45  ;;  %v10542_v4 = vld [vmem:[#allocation5 + $0xcc4] sm:$0xf]  ;;  %v8378_v6 = vld [vmem:[#allocation5 + $0xcd0] sm:$0xf0]  ;;  %v8781_v10 = vor.u32 %v10642_v58, %v8778_v59 }
 0x145   :  { %v10574_v7 = vld [vmem:[#allocation5 + $0xdc4] sm:$0xf]  ;;  %5217 = vmatpush.bf16.msra.mxu0 %v7773_v53  ;;  %v8506_v11 = vld [vmem:[#allocation5 + $0xdd0] sm:$0xf0]  ;;  %v8381_v28 = vor.u32 %v10542_v4, %v8378_v6 }
 0x146   :  { %v10606_v14 = vld [vmem:[#allocation5 + $0xec4] sm:$0xf]  ;;  %v8634_v16 = vld [vmem:[#allocation5 + $0xed0] sm:$0xf0]  ;;  %5230 = vmatpush.bf16.msra.mxu1 %v7901_v57  ;;  %v8509_v29 = vor.u32 %v10574_v7, %v8506_v11 }
 0x147   :  { %5243 = vmatpush.bf16.msra.mxu2 %v8029_v43  ;;  %v10638_v17 = vld [vmem:[#allocation5 + $0xfc4] sm:$0xf]  ;;  %v8762_v21 = vld [vmem:[#allocation5 + $0xfd0] sm:$0xf0]  ;;  %v8637_v30 = vor.u32 %v10606_v14, %v8634_v16 }
 0x148   :  { %5256 = vmatpush.bf16.msra.mxu3 %v8157_v60  ;;  %v10538_v33 = vld [vmem:[#allocation5 + $0xca4] sm:$0xf]  ;;  %v8362_v35 = vld [vmem:[#allocation5 + $0xcb0] sm:$0xf0]  ;;  %5218 = vmatmul.bf16.vlgmr.msra.gmra.mxu0 %v11305_v18  ;;  %v8765_v41 = vor.u32 %v10638_v17, %v8762_v21  ;;  %v5011_v57 = vpop.f32.mrf.mxu0 }
 0x149   :  { %5262 = vmatpush.bf16.msrb.mxu0 %v8397_v62  ;;  %v10570_v39 = vld [vmem:[#allocation5 + $0xda4] sm:$0xf]  ;;  %v8490_v42 = vld [vmem:[#allocation5 + $0xdb0] sm:$0xf0]  ;;  %5231 = vmatmul.bf16.vlgmr.msra.gmra.mxu1 %v11309_v23  ;;  %v8365_v12 = vor.u32 %v10538_v33, %v8362_v35  ;;  %v5012_v59 = vadd.f32 %v5011_v57, %v11370_v0  ;;  %v5024_v62 = vpop.f32.mrf.mxu1 }
 0x14a   :  { %5275 = vmatpush.bf16.msrb.mxu1 %v8525_v63  ;;  %v10602_v44 = vld [vmem:[#allocation5 + $0xea4] sm:$0xf]  ;;  %v8618_v45 = vld [vmem:[#allocation5 + $0xeb0] sm:$0xf0]  ;;  %5244 = vmatmul.bf16.vlgmr.msra.gmra.mxu2 %v11307_v22  ;;  %v8493_v48 = vor.u32 %v10570_v39, %v8490_v42 }
 0x14b   :  { %5288 = vmatpush.bf16.msrb.mxu2 %v8653_v3  ;;  %v10634_v46 = vld [vmem:[#allocation5 + $0xfa4] sm:$0xf]  ;;  %v8746_v47 = vld [vmem:[#allocation5 + $0xfb0] sm:$0xf0]  ;;  %5257 = vmatmul.bf16.vlgmr.msra.gmra.mxu3 %v11311_v27  ;;  %v8621_v49 = vor.u32 %v10602_v44, %v8618_v45  ;;  %v5025_v11 = vadd.f32 %v5024_v62, %v5012_v59 }
 0x14c   :  { %5301 = vmatpush.bf16.msrb.mxu3 %v8781_v10  ;;  %v10534_v50 = vld [vmem:[#allocation5 + $0xc84] sm:$0xf]  ;;  %v8346_v51 = vld [vmem:[#allocation5 + $0xc90] sm:$0xf0]  ;;  %v8749_v53 = vor.u32 %v10634_v46, %v8746_v47 }
 0x14d   :  { %5263 = vmatpush.bf16.msrb.mxu0 %v8381_v28  ;;  %v10566_v52 = vld [vmem:[#allocation5 + $0xd84] sm:$0xf]  ;;  %v8474_v54 = vld [vmem:[#allocation5 + $0xd90] sm:$0xf0]  ;;  %v8349_v60 = vor.u32 %v10534_v50, %v8346_v51 }
 0x14e   :  { %5276 = vmatpush.bf16.msrb.mxu1 %v8509_v29  ;;  %v10598_v55 = vld [vmem:[#allocation5 + $0xe84] sm:$0xf]  ;;  %v8602_v56 = vld [vmem:[#allocation5 + $0xe90] sm:$0xf0]  ;;  %v8477_v63 = vor.u32 %v10566_v52, %v8474_v54  ;;  %v5037_v42 = vpop.f32.mrf.mxu2 }
 0x14f   :  { %5289 = vmatpush.bf16.msrb.mxu2 %v8637_v30  ;;  %v10630_v43 = vld [vmem:[#allocation5 + $0xf84] sm:$0xf]  ;;  %v8730_v58 = vld [vmem:[#allocation5 + $0xf90] sm:$0xf0]  ;;  %v8605_v3 = vor.u32 %v10598_v55, %v8602_v56  ;;  %v5038_v47 = vadd.f32 %v5037_v42, %v5025_v11 }
 0x150   :  { %5302 = vmatpush.bf16.msrb.mxu3 %v8765_v41  ;;  %v10530_v4 = vld [vmem:[#allocation5 + $0xc64] sm:$0xf]  ;;  %v8330_v6 = vld [vmem:[#allocation5 + $0xc70] sm:$0xf0]  ;;  %v8733_v10 = vor.u32 %v10630_v43, %v8730_v58  ;;  %v5013_v50 = vpop.f32.mrf.mxu0 }
 0x151   :  { %5264 = vmatpush.bf16.msrb.mxu0 %v8365_v12  ;;  %v10562_v7 = vld [vmem:[#allocation5 + $0xd64] sm:$0xf]  ;;  %v8458_v14 = vld [vmem:[#allocation5 + $0xd70] sm:$0xf0]  ;;  %v8333_v29 = vor.u32 %v10530_v4, %v8330_v6  ;;  %v5050_v12 = vpop.f32.mrf.mxu3  ;;  %v5026_v52 = vpop.f32.mrf.mxu1 }
 0x152   :  { %5277 = vmatpush.bf16.msrb.mxu1 %v8493_v48  ;;  %v10594_v16 = vld [vmem:[#allocation5 + $0xe64] sm:$0xf]  ;;  %v8586_v17 = vld [vmem:[#allocation5 + $0xe70] sm:$0xf0]  ;;  %v8461_v0 = vor.u32 %v10562_v7, %v8458_v14 }
 0x153   :  { %5290 = vmatpush.bf16.msrb.mxu2 %v8621_v49  ;;  %v10626_v21 = vld [vmem:[#allocation5 + $0xf64] sm:$0xf]  ;;  %v8714_v28 = vld [vmem:[#allocation5 + $0xf70] sm:$0xf0]  ;;  %v8589_v30 = vor.u32 %v10594_v16, %v8586_v17 }
 0x154   :  { %5303 = vmatpush.bf16.msrb.mxu3 %v8749_v53  ;;  %v10526_v33 = vld [vmem:[#allocation5 + $0xc44] sm:$0xf]  ;;  %v8314_v35 = vld [vmem:[#allocation5 + $0xc50] sm:$0xf0]  ;;  %v8717_v41 = vor.u32 %v10626_v21, %v8714_v28  ;;  %v11377_v53 = vadd.f32 %v5050_v12, %v5038_v47 }
 0x155   :  { %5265 = vmatpush.bf16.msrb.mxu0 %v8349_v60  ;;  %v10558_v39 = vld [vmem:[#allocation5 + $0xd44] sm:$0xf]  ;;  %v8442_v44 = vld [vmem:[#allocation5 + $0xd50] sm:$0xf0]  ;;  %v8317_v51 = vor.u32 %v10526_v33, %v8314_v35 }
 0x156   :  { %5278 = vmatpush.bf16.msrb.mxu1 %v8477_v63  ;;  %v10590_v45 = vld [vmem:[#allocation5 + $0xe44] sm:$0xf]  ;;  %v8570_v46 = vld [vmem:[#allocation5 + $0xe50] sm:$0xf0]  ;;  %v8445_v54 = vor.u32 %v10558_v39, %v8442_v44 }
 0x157   :  { %5291 = vmatpush.bf16.msrb.mxu2 %v8605_v3  ;;  %v10622_v48 = vld [vmem:[#allocation5 + $0xf44] sm:$0xf]  ;;  %v8698_v49 = vld [vmem:[#allocation5 + $0xf50] sm:$0xf0]  ;;  %v8573_v55 = vor.u32 %v10590_v45, %v8570_v46 }
 0x158   :  { %5304 = vmatpush.bf16.msrb.mxu3 %v8733_v10  ;;  %v10522_v56 = vld [vmem:[#allocation5 + $0xc24] sm:$0xf]  ;;  %v8298_v57 = vld [vmem:[#allocation5 + $0xc30] sm:$0xf0]  ;;  %v8701_v58 = vor.u32 %v10622_v48, %v8698_v49 }
 0x159   :  { %5266 = vmatpush.bf16.msrb.mxu0 %v8333_v29  ;;  %v10554_v43 = vld [vmem:[#allocation5 + $0xd24] sm:$0xf]  ;;  %v8426_v59 = vld [vmem:[#allocation5 + $0xd30] sm:$0xf0]  ;;  %v8301_v4 = vor.u32 %v10522_v56, %v8298_v57 }
 0x15a   :  { %5279 = vmatpush.bf16.msrb.mxu1 %v8461_v0  ;;  %v10586_v60 = vld [vmem:[#allocation5 + $0xe24] sm:$0xf]  ;;  %v8554_v62 = vld [vmem:[#allocation5 + $0xe30] sm:$0xf0]  ;;  %v8429_v10 = vor.u32 %v10554_v43, %v8426_v59 }
 0x15b   :  { %5292 = vmatpush.bf16.msrb.mxu2 %v8589_v30  ;;  %v10618_v63 = vld [vmem:[#allocation5 + $0xf24] sm:$0xf]  ;;  %v8682_v3 = vld [vmem:[#allocation5 + $0xf30] sm:$0xf0]  ;;  %v8557_v11 = vor.u32 %v10586_v60, %v8554_v62  ;;  %v5039_v30 = vpop.f32.mrf.mxu2 }
 0x15c   :  { %5305 = vmatpush.bf16.msrb.mxu3 %v8717_v41  ;;  %v10518_v6 = vld [vmem:[#allocation5 + $0xc04] sm:$0xf]  ;;  %v8282_v7 = vld [vmem:[#allocation5 + $0xc10] sm:$0xf0]  ;;  %v8685_v21 = vor.u32 %v10618_v63, %v8682_v3  ;;  %v5052_v41 = vpop.f32.mrf.mxu3 }
 0x15d   :  { %5267 = vmatpush.bf16.msrb.mxu0 %v8317_v51  ;;  %v10550_v14 = vld [vmem:[#allocation5 + $0xd04] sm:$0xf]  ;;  %v8410_v16 = vld [vmem:[#allocation5 + $0xd10] sm:$0xf0]  ;;  %v8285_v42 = vor.u32 %v10518_v6, %v8282_v7 }
 0x15e   :  { %5280 = vmatpush.bf16.msrb.mxu1 %v8445_v54  ;;  %v10582_v17 = vld [vmem:[#allocation5 + $0xe04] sm:$0xf]  ;;  %v8538_v28 = vld [vmem:[#allocation5 + $0xe10] sm:$0xf0]  ;;  %v8413_v47 = vor.u32 %v10550_v14, %v8410_v16 }
 0x15f   :  { %5293 = vmatpush.bf16.msrb.mxu2 %v8573_v55  ;;  %v10614_v29 = vld [vmem:[#allocation5 + $0xf04] sm:$0xf]  ;;  %v8666_v0 = vld [vmem:[#allocation5 + $0xf10] sm:$0xf0]  ;;  %v8541_v12 = vor.u32 %v10582_v17, %v8538_v28 }
 0x160   :  { %5306 = vmatpush.bf16.msrb.mxu3 %v8701_v58  ;;  %v10674_v33 = vld [vmem:[#allocation5 + $0x10e4] sm:$0xf]  ;;  %v8906_v35 = vld [vmem:[#allocation5 + $0x10f0] sm:$0xf0]  ;;  %v8669_v50 = vor.u32 %v10614_v29, %v8666_v0 }
 0x161   :  { %v10706_v39 = vld [vmem:[#allocation5 + $0x11e4] sm:$0xf]  ;;  %5268 = vmatpush.bf16.msrb.mxu0 %v8301_v4  ;;  %v9034_v44 = vld [vmem:[#allocation5 + $0x11f0] sm:$0xf0]  ;;  %v8909_v51 = vor.u32 %v10674_v33, %v8906_v35 }
 0x162   :  { %v10738_v45 = vld [vmem:[#allocation5 + $0x12e4] sm:$0xf]  ;;  %v9162_v46 = vld [vmem:[#allocation5 + $0x12f0] sm:$0xf0]  ;;  %5281 = vmatpush.bf16.msrb.mxu1 %v8429_v10  ;;  %v9037_v52 = vor.u32 %v10706_v39, %v9034_v44 }
 0x163   :  { %5294 = vmatpush.bf16.msrb.mxu2 %v8557_v11  ;;  %v10770_v48 = vld [vmem:[#allocation5 + $0x13e4] sm:$0xf]  ;;  %v9290_v49 = vld [vmem:[#allocation5 + $0x13f0] sm:$0xf0]  ;;  %v9165_v54 = vor.u32 %v10738_v45, %v9162_v46 }
 0x164   :  { %5307 = vmatpush.bf16.msrb.mxu3 %v8685_v21  ;;  %v10670_v55 = vld [vmem:[#allocation5 + $0x10c4] sm:$0xf]  ;;  %v8890_v56 = vld [vmem:[#allocation5 + $0x10d0] sm:$0xf0]  ;;  %v9293_v43 = vor.u32 %v10770_v48, %v9290_v49 }
 0x165   :  { %v10702_v57 = vld [vmem:[#allocation5 + $0x11c4] sm:$0xf]  ;;  %5269 = vmatpush.bf16.msrb.mxu0 %v8285_v42  ;;  %v9018_v58 = vld [vmem:[#allocation5 + $0x11d0] sm:$0xf0]  ;;  %v8893_v3 = vor.u32 %v10670_v55, %v8890_v56 }
 0x166   :  { %v10734_v59 = vld [vmem:[#allocation5 + $0x12c4] sm:$0xf]  ;;  %v9146_v60 = vld [vmem:[#allocation5 + $0x12d0] sm:$0xf0]  ;;  %5282 = vmatpush.bf16.msrb.mxu1 %v8413_v47  ;;  %v9021_v4 = vor.u32 %v10702_v57, %v9018_v58 }
 0x167   :  { %5295 = vmatpush.bf16.msrb.mxu2 %v8541_v12  ;;  %v10766_v62 = vld [vmem:[#allocation5 + $0x13c4] sm:$0xf]  ;;  %v9274_v63 = vld [vmem:[#allocation5 + $0x13d0] sm:$0xf0]  ;;  %v9149_v6 = vor.u32 %v10734_v59, %v9146_v60  ;;  %v5063_v47 = vpop.f32.mrf.mxu0 }
 0x168   :  { %5308 = vmatpush.bf16.msrb.mxu3 %v8669_v50  ;;  %v10666_v7 = vld [vmem:[#allocation5 + $0x10a4] sm:$0xf]  ;;  %v8874_v10 = vld [vmem:[#allocation5 + $0x10b0] sm:$0xf0]  ;;  %5270 = vmatmul.bf16.vlgmr.msrb.gmra.mxu0 %v11317_v13  ;;  %v9277_v14 = vor.u32 %v10766_v62, %v9274_v63  ;;  %v5064_v49 = vadd.f32 %v5063_v47, %v11377_v53 }
 0x169   :  { %5314 = vmatpush.bf16.msra.mxu0 %v8909_v51  ;;  %v10698_v11 = vld [vmem:[#allocation5 + $0x11a4] sm:$0xf]  ;;  %v9002_v16 = vld [vmem:[#allocation5 + $0x11b0] sm:$0xf0]  ;;  %5283 = vmatmul.bf16.vlgmr.msrb.gmra.mxu1 %v11321_v20  ;;  %v8877_v0 = vor.u32 %v10666_v7, %v8874_v10  ;;  %v5076_v51 = vpop.f32.mrf.mxu1 }
 0x16a   :  { %5327 = vmatpush.bf16.msra.mxu1 %v9037_v52  ;;  %v10730_v17 = vld [vmem:[#allocation5 + $0x12a4] sm:$0xf]  ;;  %v9130_v21 = vld [vmem:[#allocation5 + $0x12b0] sm:$0xf0]  ;;  %5296 = vmatmul.bf16.vlgmr.msrb.gmra.mxu2 %v11319_v19  ;;  %v9005_v30 = vor.u32 %v10698_v11, %v9002_v16  ;;  %v5077_v58 = vadd.f32 %v5076_v51, %v5064_v49 }
 0x16b   :  { %5340 = vmatpush.bf16.msra.mxu2 %v9165_v54  ;;  %v10762_v28 = vld [vmem:[#allocation5 + $0x13a4] sm:$0xf]  ;;  %v9258_v29 = vld [vmem:[#allocation5 + $0x13b0] sm:$0xf0]  ;;  %5309 = vmatmul.bf16.vlgmr.msrb.gmra.mxu3 %v11323_v26  ;;  %v9133_v33 = vor.u32 %v10730_v17, %v9130_v21 }
 0x16c   :  { %5353 = vmatpush.bf16.msra.mxu3 %v9293_v43  ;;  %v10662_v35 = vld [vmem:[#allocation5 + $0x1084] sm:$0xf]  ;;  %v8858_v39 = vld [vmem:[#allocation5 + $0x1090] sm:$0xf0]  ;;  %v9261_v42 = vor.u32 %v10762_v28, %v9258_v29 }
 0x16d   :  { %5315 = vmatpush.bf16.msra.mxu0 %v8893_v3  ;;  %v10694_v41 = vld [vmem:[#allocation5 + $0x1184] sm:$0xf]  ;;  %v8986_v44 = vld [vmem:[#allocation5 + $0x1190] sm:$0xf0]  ;;  %v8861_v50 = vor.u32 %v10662_v35, %v8858_v39 }
 0x16e   :  { %5328 = vmatpush.bf16.msra.mxu1 %v9021_v4  ;;  %v10726_v45 = vld [vmem:[#allocation5 + $0x1284] sm:$0xf]  ;;  %v9114_v46 = vld [vmem:[#allocation5 + $0x1290] sm:$0xf0]  ;;  %v8989_v52 = vor.u32 %v10694_v41, %v8986_v44 }
 0x16f   :  { %5341 = vmatpush.bf16.msra.mxu2 %v9149_v6  ;;  %v10758_v12 = vld [vmem:[#allocation5 + $0x1384] sm:$0xf]  ;;  %v9242_v48 = vld [vmem:[#allocation5 + $0x1390] sm:$0xf0]  ;;  %v9117_v54 = vor.u32 %v10726_v45, %v9114_v46  ;;  %v5089_v16 = vpop.f32.mrf.mxu2  ;;  %v5065_v35 = vpop.f32.mrf.mxu0 }
 0x170   :  { %5354 = vmatpush.bf16.msra.mxu3 %v9277_v14  ;;  %v10658_v55 = vld [vmem:[#allocation5 + $0x1064] sm:$0xf]  ;;  %v8842_v56 = vld [vmem:[#allocation5 + $0x1070] sm:$0xf0]  ;;  %v9245_v43 = vor.u32 %v10758_v12, %v9242_v48  ;;  %v5090_v29 = vadd.f32 %v5089_v16, %v5077_v58 }
 0x171   :  { %5316 = vmatpush.bf16.msra.mxu0 %v8877_v0  ;;  %v10690_v57 = vld [vmem:[#allocation5 + $0x1164] sm:$0xf]  ;;  %v8970_v59 = vld [vmem:[#allocation5 + $0x1170] sm:$0xf0]  ;;  %v8845_v4 = vor.u32 %v10658_v55, %v8842_v56  ;;  %v5102_v0 = vpop.f32.mrf.mxu3  ;;  %v5078_v41 = vpop.f32.mrf.mxu1 }
 0x172   :  { %5329 = vmatpush.bf16.msra.mxu1 %v9005_v30  ;;  %v10722_v60 = vld [vmem:[#allocation5 + $0x1264] sm:$0xf]  ;;  %v9098_v62 = vld [vmem:[#allocation5 + $0x1270] sm:$0xf0]  ;;  %v8973_v53 = vor.u32 %v10690_v57, %v8970_v59 }
 0x173   :  { %5342 = vmatpush.bf16.msra.mxu2 %v9133_v33  ;;  %v10754_v63 = vld [vmem:[#allocation5 + $0x1364] sm:$0xf]  ;;  %v9226_v3 = vld [vmem:[#allocation5 + $0x1370] sm:$0xf0]  ;;  %v9101_v6 = vor.u32 %v10722_v60, %v9098_v62 }
 0x174   :  { %5355 = vmatpush.bf16.msra.mxu3 %v9261_v42  ;;  %v10654_v7 = vld [vmem:[#allocation5 + $0x1044] sm:$0xf]  ;;  %v8826_v10 = vld [vmem:[#allocation5 + $0x1050] sm:$0xf0]  ;;  %v9229_v14 = vor.u32 %v10754_v63, %v9226_v3  ;;  %v11384_v42 = vadd.f32 %v5102_v0, %v5090_v29 }
 0x175   :  { %5317 = vmatpush.bf16.msra.mxu0 %v8861_v50  ;;  %v10686_v11 = vld [vmem:[#allocation5 + $0x1144] sm:$0xf]  ;;  %v8954_v17 = vld [vmem:[#allocation5 + $0x1150] sm:$0xf0]  ;;  %v8829_v39 = vor.u32 %v10654_v7, %v8826_v10 }
 0x176   :  { %5330 = vmatpush.bf16.msra.mxu1 %v8989_v52  ;;  %v10718_v21 = vld [vmem:[#allocation5 + $0x1244] sm:$0xf]  ;;  %v9082_v28 = vld [vmem:[#allocation5 + $0x1250] sm:$0xf0]  ;;  %v8957_v44 = vor.u32 %v10686_v11, %v8954_v17 }
 0x177   :  { %5343 = vmatpush.bf16.msra.mxu2 %v9117_v54  ;;  %v10750_v30 = vld [vmem:[#allocation5 + $0x1344] sm:$0xf]  ;;  %v9210_v33 = vld [vmem:[#allocation5 + $0x1350] sm:$0xf0]  ;;  %v9085_v45 = vor.u32 %v10718_v21, %v9082_v28 }
 0x178   :  { %5356 = vmatpush.bf16.msra.mxu3 %v9245_v43  ;;  %v10650_v46 = vld [vmem:[#allocation5 + $0x1024] sm:$0xf]  ;;  %v8810_v47 = vld [vmem:[#allocation5 + $0x1030] sm:$0xf0]  ;;  %v9213_v48 = vor.u32 %v10750_v30, %v9210_v33 }
 0x179   :  { %5318 = vmatpush.bf16.msra.mxu0 %v8845_v4  ;;  %v10682_v12 = vld [vmem:[#allocation5 + $0x1124] sm:$0xf]  ;;  %v8938_v49 = vld [vmem:[#allocation5 + $0x1130] sm:$0xf0]  ;;  %v8813_v55 = vor.u32 %v10650_v46, %v8810_v47 }
 0x17a   :  { %5331 = vmatpush.bf16.msra.mxu1 %v8973_v53  ;;  %v10714_v50 = vld [vmem:[#allocation5 + $0x1224] sm:$0xf]  ;;  %v9066_v51 = vld [vmem:[#allocation5 + $0x1230] sm:$0xf0]  ;;  %v8941_v43 = vor.u32 %v10682_v12, %v8938_v49 }
 0x17b   :  { %5344 = vmatpush.bf16.msra.mxu2 %v9101_v6  ;;  %v10746_v52 = vld [vmem:[#allocation5 + $0x1324] sm:$0xf]  ;;  %v9194_v54 = vld [vmem:[#allocation5 + $0x1330] sm:$0xf0]  ;;  %v9069_v58 = vor.u32 %v10714_v50, %v9066_v51  ;;  %v5091_v6 = vpop.f32.mrf.mxu2 }
 0x17c   :  { %5357 = vmatpush.bf16.msra.mxu3 %v9229_v14  ;;  %v10646_v56 = vld [vmem:[#allocation5 + $0x1004] sm:$0xf]  ;;  %v8794_v57 = vld [vmem:[#allocation5 + $0x1010] sm:$0xf0]  ;;  %v9197_v63 = vor.u32 %v10746_v52, %v9194_v54  ;;  %v5104_v14 = vpop.f32.mrf.mxu3 }
 0x17d   :  { %5319 = vmatpush.bf16.msra.mxu0 %v8829_v39  ;;  %v10678_v59 = vld [vmem:[#allocation5 + $0x1104] sm:$0xf]  ;;  %v8922_v60 = vld [vmem:[#allocation5 + $0x1110] sm:$0xf0]  ;;  %v8797_v16 = vor.u32 %v10646_v56, %v8794_v57 }
 0x17e   :  { %5332 = vmatpush.bf16.msra.mxu1 %v8957_v44  ;;  %v10710_v62 = vld [vmem:[#allocation5 + $0x1204] sm:$0xf]  ;;  %v9050_v3 = vld [vmem:[#allocation5 + $0x1210] sm:$0xf0]  ;;  %v8925_v29 = vor.u32 %v10678_v59, %v8922_v60 }
 0x17f   :  { %5345 = vmatpush.bf16.msra.mxu2 %v9085_v45  ;;  %v10742_v4 = vld [vmem:[#allocation5 + $0x1304] sm:$0xf]  ;;  %v9178_v53 = vld [vmem:[#allocation5 + $0x1310] sm:$0xf0]  ;;  %v9053_v0 = vor.u32 %v10710_v62, %v9050_v3 }
 0x180   :  { %5358 = vmatpush.bf16.msra.mxu3 %v9213_v48  ;;  %v10802_v7 = vld [vmem:[#allocation5 + $0x14e4] sm:$0xf]  ;;  %v9418_v10 = vld [vmem:[#allocation5 + $0x14f0] sm:$0xf0]  ;;  %v9181_v35 = vor.u32 %v10742_v4, %v9178_v53 }
 0x181   :  { %v10834_v11 = vld [vmem:[#allocation5 + $0x15e4] sm:$0xf]  ;;  %5320 = vmatpush.bf16.msra.mxu0 %v8813_v55  ;;  %v9546_v17 = vld [vmem:[#allocation5 + $0x15f0] sm:$0xf0]  ;;  %v9421_v39 = vor.u32 %v10802_v7, %v9418_v10 }
 0x182   :  { %v10866_v21 = vld [vmem:[#allocation5 + $0x16e4] sm:$0xf]  ;;  %v9674_v28 = vld [vmem:[#allocation5 + $0x16f0] sm:$0xf0]  ;;  %5333 = vmatpush.bf16.msra.mxu1 %v8941_v43  ;;  %v9549_v41 = vor.u32 %v10834_v11, %v9546_v17 }
 0x183   :  { %5346 = vmatpush.bf16.msra.mxu2 %v9069_v58  ;;  %v10898_v30 = vld [vmem:[#allocation5 + $0x17e4] sm:$0xf]  ;;  %v9802_v33 = vld [vmem:[#allocation5 + $0x17f0] sm:$0xf0]  ;;  %v9677_v44 = vor.u32 %v10866_v21, %v9674_v28 }
 0x184   :  { %5359 = vmatpush.bf16.msra.mxu3 %v9197_v63  ;;  %v10798_v45 = vld [vmem:[#allocation5 + $0x14c4] sm:$0xf]  ;;  %v9402_v46 = vld [vmem:[#allocation5 + $0x14d0] sm:$0xf0]  ;;  %v9805_v12 = vor.u32 %v10898_v30, %v9802_v33 }
 0x185   :  { %v10830_v47 = vld [vmem:[#allocation5 + $0x15c4] sm:$0xf]  ;;  %5321 = vmatpush.bf16.msra.mxu0 %v8797_v16  ;;  %v9530_v48 = vld [vmem:[#allocation5 + $0x15d0] sm:$0xf0]  ;;  %v9405_v54 = vor.u32 %v10798_v45, %v9402_v46  ;;  %v11001_v16 = vld [vmem:[#allocation7] sm:$0xf] }
 0x186   :  { %v10862_v49 = vld [vmem:[#allocation5 + $0x16c4] sm:$0xf]  ;;  %v9658_v50 = vld [vmem:[#allocation5 + $0x16d0] sm:$0xf0]  ;;  %5334 = vmatpush.bf16.msra.mxu1 %v8925_v29  ;;  %v9533_v55 = vor.u32 %v10830_v47, %v9530_v48  ;;  %v947_v17 = vperm.slane %v11001_v16, 1  ;;  %v5128_v48 = vpop.f32.mrf.mxu1 }
 0x187   :  { %5347 = vmatpush.bf16.msra.mxu2 %v9053_v0  ;;  %v10894_v51 = vld [vmem:[#allocation5 + $0x17c4] sm:$0xf]  ;;  %v9786_v52 = vld [vmem:[#allocation5 + $0x17d0] sm:$0xf0]  ;;  %v9661_v56 = vor.u32 %v10862_v49, %v9658_v50 }
 0x188   :  { %5360 = vmatpush.bf16.msra.mxu3 %v9181_v35  ;;  %v10794_v57 = vld [vmem:[#allocation5 + $0x14a4] sm:$0xf]  ;;  %v9386_v43 = vld [vmem:[#allocation5 + $0x14b0] sm:$0xf0]  ;;  %5322 = vmatmul.bf16.vlgmr.msra.gmra.mxu0 %v11329_v24  ;;  %v9789_v59 = vor.u32 %v10894_v51, %v9786_v52 }
 0x189   :  { %5366 = vmatpush.bf16.msrb.mxu0 %v9421_v39  ;;  %v10826_v58 = vld [vmem:[#allocation5 + $0x15a4] sm:$0xf]  ;;  %v9514_v60 = vld [vmem:[#allocation5 + $0x15b0] sm:$0xf0]  ;;  %5335 = vmatmul.bf16.vlgmr.msra.gmra.mxu1 %v11333_v32  ;;  %v9389_v53 = vor.u32 %v10794_v57, %v9386_v43  ;;  %v5115_v39 = vpop.f32.mrf.mxu0 }
 0x18a   :  { %5379 = vmatpush.bf16.msrb.mxu1 %v9549_v41  ;;  %v10858_v62 = vld [vmem:[#allocation5 + $0x16a4] sm:$0xf]  ;;  %v9642_v63 = vld [vmem:[#allocation5 + $0x16b0] sm:$0xf0]  ;;  %5348 = vmatmul.bf16.vlgmr.msra.gmra.mxu2 %v11331_v31  ;;  %v9517_v7 = vor.u32 %v10826_v58, %v9514_v60 }
 0x18b   :  { %5392 = vmatpush.bf16.msrb.mxu2 %v9677_v44  ;;  %v10890_v3 = vld [vmem:[#allocation5 + $0x17a4] sm:$0xf]  ;;  %v9770_v4 = vld [vmem:[#allocation5 + $0x17b0] sm:$0xf0]  ;;  %5361 = vmatmul.bf16.vlgmr.msra.gmra.mxu3 %v11335_v36  ;;  %v9645_v10 = vor.u32 %v10858_v62, %v9642_v63 }
 0x18c   :  { %5405 = vmatpush.bf16.msrb.mxu3 %v9805_v12  ;;  %v10790_v6 = vld [vmem:[#allocation5 + $0x1484] sm:$0xf]  ;;  %v9370_v11 = vld [vmem:[#allocation5 + $0x1490] sm:$0xf0]  ;;  %v9773_v21 = vor.u32 %v10890_v3, %v9770_v4  ;;  %v5116_v12 = vadd.f32 %v5115_v39, %v947_v17 }
 0x18d   :  { %5367 = vmatpush.bf16.msrb.mxu0 %v9405_v54  ;;  %v10822_v14 = vld [vmem:[#allocation5 + $0x1584] sm:$0xf]  ;;  %v9498_v28 = vld [vmem:[#allocation5 + $0x1590] sm:$0xf0]  ;;  %v9373_v35 = vor.u32 %v10790_v6, %v9370_v11  ;;  %v5141_v63 = vpop.f32.mrf.mxu2 }
 0x18e   :  { %5380 = vmatpush.bf16.msrb.mxu1 %v9533_v55  ;;  %v10854_v29 = vld [vmem:[#allocation5 + $0x1684] sm:$0xf]  ;;  %v9626_v0 = vld [vmem:[#allocation5 + $0x1690] sm:$0xf0]  ;;  %v9501_v41 = vor.u32 %v10822_v14, %v9498_v28 }
 0x18f   :  { %5393 = vmatpush.bf16.msrb.mxu2 %v9661_v56  ;;  %v10886_v30 = vld [vmem:[#allocation5 + $0x1784] sm:$0xf]  ;;  %v9754_v33 = vld [vmem:[#allocation5 + $0x1790] sm:$0xf0]  ;;  %v9629_v44 = vor.u32 %v10854_v29, %v9626_v0  ;;  %v5129_v56 = vadd.f32 %v5128_v48, %v5116_v12 }
 0x190   :  { %5406 = vmatpush.bf16.msrb.mxu3 %v9789_v59  ;;  %v10786_v45 = vld [vmem:[#allocation5 + $0x1464] sm:$0xf]  ;;  %v9354_v46 = vld [vmem:[#allocation5 + $0x1470] sm:$0xf0]  ;;  %v9757_v49 = vor.u32 %v10886_v30, %v9754_v33 }
 0x191   :  { %5368 = vmatpush.bf16.msrb.mxu0 %v9389_v53  ;;  %v10818_v47 = vld [vmem:[#allocation5 + $0x1564] sm:$0xf]  ;;  %v9482_v50 = vld [vmem:[#allocation5 + $0x1570] sm:$0xf0]  ;;  %v9357_v57 = vor.u32 %v10786_v45, %v9354_v46 }
 0x192   :  { %5381 = vmatpush.bf16.msrb.mxu1 %v9517_v7  ;;  %v10850_v51 = vld [vmem:[#allocation5 + $0x1664] sm:$0xf]  ;;  %v9610_v52 = vld [vmem:[#allocation5 + $0x1670] sm:$0xf0]  ;;  %v9485_v43 = vor.u32 %v10818_v47, %v9482_v50  ;;  %v5142_v7 = vadd.f32 %v5141_v63, %v5129_v56  ;;  %v10165_v63 = vld [vmem:[#allocation5 + $0xf4] sm:$0xf0] }
 0x193   :  { %5394 = vmatpush.bf16.msrb.mxu2 %v9645_v10  ;;  %v10882_v54 = vld [vmem:[#allocation5 + $0x1764] sm:$0xf]  ;;  %v9738_v55 = vld [vmem:[#allocation5 + $0x1770] sm:$0xf0]  ;;  %v9613_v58 = vor.u32 %v10850_v51, %v9610_v52  ;;  %v5154_v10 = vpop.f32.mrf.mxu3 }
 0x194   :  { %5407 = vmatpush.bf16.msrb.mxu3 %v9773_v21  ;;  %v10782_v59 = vld [vmem:[#allocation5 + $0x1444] sm:$0xf]  ;;  %v9338_v60 = vld [vmem:[#allocation5 + $0x1450] sm:$0xf0]  ;;  %v9741_v3 = vor.u32 %v10882_v54, %v9738_v55  ;;  %v11390_v17 = vadd.f32 %v5154_v10, %v5142_v7  ;;  %v5117_v21 = vpop.f32.mrf.mxu0  ;;  %v10229_v7 = vld [vmem:[#allocation5 + $0x2f4] sm:$0xf0] }
 0x195   :  { %5369 = vmatpush.bf16.msrb.mxu0 %v9373_v35  ;;  %v10814_v62 = vld [vmem:[#allocation5 + $0x1544] sm:$0xf]  ;;  %v9466_v4 = vld [vmem:[#allocation5 + $0x1550] sm:$0xf0]  ;;  %v9341_v16 = vor.u32 %v10782_v59, %v9338_v60  ;;  %v5130_v35 = vpop.f32.mrf.mxu1  ;;  %v5143_v56 = vpop.f32.mrf.mxu2 }
 0x196   :  { %5382 = vmatpush.bf16.msrb.mxu1 %v9501_v41  ;;  %v10846_v53 = vld [vmem:[#allocation5 + $0x1644] sm:$0xf]  ;;  %v9594_v6 = vld [vmem:[#allocation5 + $0x1650] sm:$0xf0]  ;;  %v9469_v28 = vor.u32 %v10814_v62, %v9466_v4  ;;  %v6864_v62 = vld [vmem:[#allocation5 + $0xe8] sm:$0xf] }
 0x197   :  { %5395 = vmatpush.bf16.msrb.mxu2 %v9629_v44  ;;  %v10878_v11 = vld [vmem:[#allocation5 + $0x1744] sm:$0xf]  ;;  %v9722_v14 = vld [vmem:[#allocation5 + $0x1750] sm:$0xf0]  ;;  %v9597_v29 = vor.u32 %v10846_v53, %v9594_v6  ;;  %v10197_v53 = vld [vmem:[#allocation5 + $0x1f4] sm:$0xf0] }
 0x198   :  { %5408 = vmatpush.bf16.msrb.mxu3 %v9757_v49  ;;  %v10778_v0 = vld [vmem:[#allocation5 + $0x1424] sm:$0xf]  ;;  %v9322_v30 = vld [vmem:[#allocation5 + $0x1430] sm:$0xf0]  ;;  %v9725_v39 = vor.u32 %v10878_v11, %v9722_v14  ;;  %v7120_v6 = vld [vmem:[#allocation5 + $0x2e8] sm:$0xf] }
 0x199   :  { %5370 = vmatpush.bf16.msrb.mxu0 %v9357_v57  ;;  %v10810_v33 = vld [vmem:[#allocation5 + $0x1524] sm:$0xf]  ;;  %v9450_v41 = vld [vmem:[#allocation5 + $0x1530] sm:$0xf0]  ;;  %v9325_v12 = vor.u32 %v10778_v0, %v9322_v30  ;;  %v7248_v14 = vld [vmem:[#allocation5 + $0x3e8] sm:$0xf]  ;;  %v7121_v0 = vor.u32 %v10229_v7, %v7120_v6 }
 0x19a   :  { %5383 = vmatpush.bf16.msrb.mxu1 %v9485_v43  ;;  %v10842_v44 = vld [vmem:[#allocation5 + $0x1624] sm:$0xf]  ;;  %v9578_v45 = vld [vmem:[#allocation5 + $0x1630] sm:$0xf0]  ;;  %v9453_v50 = vor.u32 %v10810_v33, %v9450_v41  ;;  %v6848_v30 = vld [vmem:[#allocation5 + $0xc8] sm:$0xf] }
 0x19b   :  { %5396 = vmatpush.bf16.msrb.mxu2 %v9613_v58  ;;  %v10874_v46 = vld [vmem:[#allocation5 + $0x1724] sm:$0xf]  ;;  %v9706_v47 = vld [vmem:[#allocation5 + $0x1730] sm:$0xf0]  ;;  %v9581_v51 = vor.u32 %v10842_v44, %v9578_v45  ;;  %v5156_v60 = vpop.f32.mrf.mxu3  ;;  %v10161_v33 = vld [vmem:[#allocation5 + $0xd4] sm:$0xf0] }
 0x19c   :  { %5409 = vmatpush.bf16.msrb.mxu3 %v9741_v3  ;;  %v10774_v48 = vld [vmem:[#allocation5 + $0x1404] sm:$0xf]  ;;  %v9306_v49 = vld [vmem:[#allocation5 + $0x1410] sm:$0xf0]  ;;  %v9709_v57 = vor.u32 %v10874_v46, %v9706_v47  ;;  %v6992_v3 = vld [vmem:[#allocation5 + $0x1e8] sm:$0xf] }
 0x19d   :  { %5371 = vmatpush.bf16.msrb.mxu0 %v9341_v16  ;;  %v10806_v52 = vld [vmem:[#allocation5 + $0x1504] sm:$0xf]  ;;  %v9434_v54 = vld [vmem:[#allocation5 + $0x1510] sm:$0xf0]  ;;  %v9309_v4 = vor.u32 %v10774_v48, %v9306_v49  ;;  %v10261_v16 = vld [vmem:[#allocation5 + $0x3f4] sm:$0xf0] }
 0x19e   :  { %5384 = vmatpush.bf16.msrb.mxu1 %v9469_v28  ;;  %v10838_v55 = vld [vmem:[#allocation5 + $0x1604] sm:$0xf]  ;;  %v9562_v43 = vld [vmem:[#allocation5 + $0x1610] sm:$0xf0]  ;;  %v9437_v10 = vor.u32 %v10806_v52, %v9434_v54  ;;  %v6865_v28 = vor.u32 %v10165_v63, %v6864_v62  ;;  %v6976_v35 = vld [vmem:[#allocation5 + $0x1c8] sm:$0xf] }
 0x19f   :  { %5397 = vmatpush.bf16.msrb.mxu2 %v9597_v29  ;;  %v10870_v58 = vld [vmem:[#allocation5 + $0x1704] sm:$0xf]  ;;  %v9690_v59 = vld [vmem:[#allocation5 + $0x1710] sm:$0xf0]  ;;  %v9565_v11 = vor.u32 %v10838_v55, %v9562_v43  ;;  %v6993_v29 = vor.u32 %v10197_v53, %v6992_v3  ;;  %v10193_v41 = vld [vmem:[#allocation5 + $0x1d4] sm:$0xf0] }
 0x1a0   :  { %5410 = vmatpush.bf16.msrb.mxu3 %v9725_v39  ;;  %v9693_v21 = vor.u32 %v10870_v58, %v9690_v59  ;;  %v7249_v39 = vor.u32 %v10261_v16, %v7248_v14  ;;  %v7104_v44 = vld [vmem:[#allocation5 + $0x2c8] sm:$0xf]  ;;  %v10225_v45 = vld [vmem:[#allocation5 + $0x2d4] sm:$0xf0]  ;;  %v6977_v48 = vor.u32 %v10193_v41, %v6976_v35 }
 0x1a1   :  { %5372 = vmatpush.bf16.msrb.mxu0 %v9325_v12  ;;  %v7232_v46 = vld [vmem:[#allocation5 + $0x3c8] sm:$0xf]  ;;  %v10257_v47 = vld [vmem:[#allocation5 + $0x3d4] sm:$0xf0]  ;;  %v6849_v12 = vor.u32 %v10161_v33, %v6848_v30  ;;  %v7105_v49 = vor.u32 %v10225_v45, %v7104_v44 }
 0x1a2   :  { %5385 = vmatpush.bf16.msrb.mxu1 %v9453_v50  ;;  %v6832_v50 = vld [vmem:[#allocation5 + $0xa8] sm:$0xf]  ;;  %v7233_v54 = vor.u32 %v10257_v47, %v7232_v46  ;;  %v10189_v55 = vld [vmem:[#allocation5 + $0x1b4] sm:$0xf0] }
 0x1a3   :  { %5398 = vmatpush.bf16.msrb.mxu2 %v9581_v51  ;;  %v10157_v51 = vld [vmem:[#allocation5 + $0xb4] sm:$0xf0]  ;;  %v6960_v52 = vld [vmem:[#allocation5 + $0x1a8] sm:$0xf] }
 0x1a4   :  { %5411 = vmatpush.bf16.msrb.mxu3 %v9709_v57  ;;  %v7088_v56 = vld [vmem:[#allocation5 + $0x2a8] sm:$0xf]  ;;  %v10221_v57 = vld [vmem:[#allocation5 + $0x2b4] sm:$0xf0]  ;;  %v6833_v59 = vor.u32 %v10157_v51, %v6832_v50  ;;  %v6961_v60 = vor.u32 %v10189_v55, %v6960_v52 }
 0x1a5   :  { %5373 = vmatpush.bf16.msrb.mxu0 %v9309_v4  ;;  %v7216_v43 = vld [vmem:[#allocation5 + $0x3a8] sm:$0xf]  ;;  %v10253_v58 = vld [vmem:[#allocation5 + $0x3b4] sm:$0xf0]  ;;  %v7089_v62 = vor.u32 %v10221_v57, %v7088_v56 }
 0x1a6   :  { %5386 = vmatpush.bf16.msrb.mxu1 %v9437_v10  ;;  %v6816_v63 = vld [vmem:[#allocation5 + $0x88] sm:$0xf]  ;;  %v10153_v3 = vld [vmem:[#allocation5 + $0x94] sm:$0xf0]  ;;  %v7217_v53 = vor.u32 %v10253_v58, %v7216_v43 }
 0x1a7   :  { %5399 = vmatpush.bf16.msrb.mxu2 %v9565_v11  ;;  %v6944_v4 = vld [vmem:[#allocation5 + $0x188] sm:$0xf]  ;;  %v10185_v6 = vld [vmem:[#allocation5 + $0x194] sm:$0xf0]  ;;  %v6817_v16 = vor.u32 %v10153_v3, %v6816_v63 }
 0x1a8   :  { %5412 = vmatpush.bf16.msrb.mxu3 %v9693_v21  ;;  %5374 = vmatmul.bf16.vlgmr.msrb.gmra.mxu0 %v11343_v61  ;;  %v7072_v7 = vld [vmem:[#allocation5 + $0x288] sm:$0xf]  ;;  %v10217_v10 = vld [vmem:[#allocation5 + $0x294] sm:$0xf0]  ;;  %v5167_v21 = vpop.f32.mrf.mxu0 }
 0x1a9   :  { %5418 = vmatpush.bf16.msra.mxu0 %v6865_v28  ;;  %5387 = vmatmul.bf16.vlgmr.msrb.gmra.mxu1 %v11347_v2  ;;  %v7200_v11 = vld [vmem:[#allocation5 + $0x388] sm:$0xf]  ;;  %v10249_v14 = vld [vmem:[#allocation5 + $0x394] sm:$0xf0]  ;;  %v6945_v28 = vor.u32 %v10185_v6, %v6944_v4  ;;  %v5168_v35 = vadd.f32 %v5167_v21, %v11390_v17 }
 0x1aa   :  { %5431 = vmatpush.bf16.msra.mxu1 %v6993_v29  ;;  %5400 = vmatmul.bf16.vlgmr.msrb.gmra.mxu2 %v11345_v1  ;;  %v7073_v29 = vor.u32 %v10217_v10, %v7072_v7  ;;  %v10149_v30 = vld [vmem:[#allocation5 + $0x74] sm:$0xf0]  ;;  %v6928_v33 = vld [vmem:[#allocation5 + $0x168] sm:$0xf]  ;;  %v7201_v41 = vor.u32 %v10249_v14, %v7200_v11 }
 0x1ab   :  { %5444 = vmatpush.bf16.msra.mxu2 %v7121_v0  ;;  %5413 = vmatmul.bf16.vlgmr.msrb.gmra.mxu3 %v11349_v5  ;;  %v6800_v0 = vld [vmem:[#allocation5 + $0x68] sm:$0xf]  ;;  %v10181_v44 = vld [vmem:[#allocation5 + $0x174] sm:$0xf0] }
 0x1ac   :  { %5457 = vmatpush.bf16.msra.mxu3 %v7249_v39  ;;  %v5180_v39 = vpop.f32.mrf.mxu1  ;;  %v7056_v45 = vld [vmem:[#allocation5 + $0x268] sm:$0xf]  ;;  %v10213_v46 = vld [vmem:[#allocation5 + $0x274] sm:$0xf0]  ;;  %v6929_v50 = vor.u32 %v10181_v44, %v6928_v33 }
 0x1ad   :  { %5419 = vmatpush.bf16.msra.mxu0 %v6849_v12  ;;  %v7184_v47 = vld [vmem:[#allocation5 + $0x368] sm:$0xf]  ;;  %v10245_v12 = vld [vmem:[#allocation5 + $0x374] sm:$0xf0]  ;;  %v7057_v51 = vor.u32 %v10213_v46, %v7056_v45  ;;  %v5193_v56 = vpop.f32.mrf.mxu2 }
 0x1ae   :  { %5432 = vmatpush.bf16.msra.mxu1 %v6977_v48  ;;  %v5181_v48 = vadd.f32 %v5180_v39, %v5168_v35  ;;  %v6784_v52 = vld [vmem:[#allocation5 + $0x48] sm:$0xf]  ;;  %v7185_v17 = vor.u32 %v10245_v12, %v7184_v47  ;;  %v10177_v57 = vld [vmem:[#allocation5 + $0x154] sm:$0xf0] }
 0x1af   :  { %5445 = vmatpush.bf16.msra.mxu2 %v7105_v49  ;;  %v6801_v49 = vor.u32 %v10149_v30, %v6800_v0  ;;  %v6912_v55 = vld [vmem:[#allocation5 + $0x148] sm:$0xf]  ;;  %v10209_v58 = vld [vmem:[#allocation5 + $0x254] sm:$0xf0] }
 0x1b0   :  { %5458 = vmatpush.bf16.msra.mxu3 %v7233_v54  ;;  %v10145_v54 = vld [vmem:[#allocation5 + $0x54] sm:$0xf0]  ;;  %v7040_v43 = vld [vmem:[#allocation5 + $0x248] sm:$0xf]  ;;  %v6913_v6 = vor.u32 %v10177_v57, %v6912_v55 }
 0x1b1   :  { %5420 = vmatpush.bf16.msra.mxu0 %v6833_v59  ;;  %v5194_v59 = vadd.f32 %v5193_v56, %v5181_v48  ;;  %v10241_v63 = vld [vmem:[#allocation5 + $0x354] sm:$0xf0]  ;;  %v6785_v3 = vor.u32 %v10145_v54, %v6784_v52  ;;  %v7041_v7 = vor.u32 %v10209_v58, %v7040_v43  ;;  %v6768_v10 = vld [vmem:[#allocation5 + $0x28] sm:$0xf] }
 0x1b2   :  { %5433 = vmatpush.bf16.msra.mxu1 %v6961_v60  ;;  %v5206_v60 = vpop.f32.mrf.mxu3  ;;  %v10141_v11 = vld [vmem:[#allocation5 + $0x34] sm:$0xf0]  ;;  %v6896_v14 = vld [vmem:[#allocation5 + $0x128] sm:$0xf] }
 0x1b3   :  { %5446 = vmatpush.bf16.msra.mxu2 %v7089_v62  ;;  %v7168_v62 = vld [vmem:[#allocation5 + $0x348] sm:$0xf]  ;;  %v11397_v4 = vadd.f32 %v5206_v60, %v5194_v59  ;;  %v10205_v0 = vld [vmem:[#allocation5 + $0x234] sm:$0xf0]  ;;  %v6769_v35 = vor.u32 %v10141_v11, %v6768_v10 }
 0x1b4   :  { %5459 = vmatpush.bf16.msra.mxu3 %v7217_v53  ;;  %v5169_v53 = vpop.f32.mrf.mxu0  ;;  %v7169_v21 = vor.u32 %v10241_v63, %v7168_v62  ;;  %v7152_v30 = vld [vmem:[#allocation5 + $0x328] sm:$0xf]  ;;  %v10237_v33 = vld [vmem:[#allocation5 + $0x334] sm:$0xf0] }
 0x1b5   :  { %5421 = vmatpush.bf16.msra.mxu0 %v6817_v16  ;;  %v5182_v16 = vpop.f32.mrf.mxu1  ;;  %v6752_v39 = vld [vmem:[#allocation5 + $0x8] sm:$0xf]  ;;  %v10169_v47 = vld [vmem:[#allocation5 + $0x114] sm:$0xf0]  ;;  %v5195_v48 = vpop.f32.mrf.mxu2 }
 0x1b6   :  { %5434 = vmatpush.bf16.msra.mxu1 %v6945_v28  ;;  %v10173_v28 = vld [vmem:[#allocation5 + $0x134] sm:$0xf0]  ;;  %v6880_v46 = vld [vmem:[#allocation5 + $0x108] sm:$0xf] }
 0x1b7   :  { %5447 = vmatpush.bf16.msra.mxu2 %v7073_v29  ;;  %v7024_v29 = vld [vmem:[#allocation5 + $0x228] sm:$0xf]  ;;  %v6897_v44 = vor.u32 %v10173_v28, %v6896_v14  ;;  %v10233_v52 = vld [vmem:[#allocation5 + $0x314] sm:$0xf0]  ;;  %v6881_v60 = vor.u32 %v10169_v47, %v6880_v46 }
 0x1b8   :  { %5460 = vmatpush.bf16.msra.mxu3 %v7201_v41  ;;  %v10137_v41 = vld [vmem:[#allocation5 + $0x14] sm:$0xf0]  ;;  %v7025_v45 = vor.u32 %v10205_v0, %v7024_v29  ;;  %v7008_v12 = vld [vmem:[#allocation5 + $0x208] sm:$0xf] }
 0x1b9   :  { %5422 = vmatpush.bf16.msra.mxu0 %v6801_v49  ;;  %v7153_v49 = vor.u32 %v10237_v33, %v7152_v30  ;;  %v7376_v55 = vld [vmem:[#allocation5 + $0x4e8] sm:$0xf]  ;;  %v10293_v56 = vld [vmem:[#allocation5 + $0x4f4] sm:$0xf0]  ;;  %v6753_v57 = vor.u32 %v10137_v41, %v6752_v39 }
 0x1ba   :  { %5435 = vmatpush.bf16.msra.mxu1 %v6929_v50  ;;  %v10201_v50 = vld [vmem:[#allocation5 + $0x214] sm:$0xf0]  ;;  %v5208_v54 = vpop.f32.mrf.mxu3  ;;  %v7632_v58 = vld [vmem:[#allocation5 + $0x6e8] sm:$0xf] }
 0x1bb   :  { %5448 = vmatpush.bf16.msra.mxu2 %v7057_v51  ;;  %v7136_v51 = vld [vmem:[#allocation5 + $0x308] sm:$0xf]  ;;  %v10325_v43 = vld [vmem:[#allocation5 + $0x5f4] sm:$0xf0]  ;;  %v7009_v62 = vor.u32 %v10201_v50, %v7008_v12 }
 0x1bc   :  { %5461 = vmatpush.bf16.msra.mxu3 %v7185_v17  ;;  %v7504_v17 = vld [vmem:[#allocation5 + $0x5e8] sm:$0xf]  ;;  %v10357_v59 = vld [vmem:[#allocation5 + $0x6f4] sm:$0xf0]  ;;  %v7137_v53 = vor.u32 %v10233_v52, %v7136_v51 }
 0x1bd   :  { %5423 = vmatpush.bf16.msra.mxu0 %v6785_v3  ;;  %v7760_v63 = vld [vmem:[#allocation5 + $0x7e8] sm:$0xf]  ;;  %v10389_v3 = vld [vmem:[#allocation5 + $0x7f4] sm:$0xf0]  ;;  %v7633_v10 = vor.u32 %v10357_v59, %v7632_v58 }
 0x1be   :  { %5436 = vmatpush.bf16.msra.mxu1 %v6913_v6  ;;  %v7377_v6 = vor.u32 %v10293_v56, %v7376_v55  ;;  %v7360_v11 = vld [vmem:[#allocation5 + $0x4c8] sm:$0xf]  ;;  %v10289_v14 = vld [vmem:[#allocation5 + $0x4d4] sm:$0xf0] }
 0x1bf   :  { %5449 = vmatpush.bf16.msra.mxu2 %v7041_v7  ;;  %v7505_v7 = vor.u32 %v10325_v43, %v7504_v17  ;;  %v7488_v16 = vld [vmem:[#allocation5 + $0x5c8] sm:$0xf]  ;;  %v10321_v28 = vld [vmem:[#allocation5 + $0x5d4] sm:$0xf0] }
 0x1c0   :  { %5462 = vmatpush.bf16.msra.mxu3 %v7169_v21  ;;  %v7761_v21 = vor.u32 %v10389_v3, %v7760_v63  ;;  %v7616_v29 = vld [vmem:[#allocation5 + $0x6c8] sm:$0xf]  ;;  %v10353_v0 = vld [vmem:[#allocation5 + $0x6d4] sm:$0xf0]  ;;  %v7489_v39 = vor.u32 %v10321_v28, %v7488_v16 }
 0x1c1   :  { %5424 = vmatpush.bf16.msra.mxu0 %v6769_v35  ;;  %v7744_v30 = vld [vmem:[#allocation5 + $0x7c8] sm:$0xf]  ;;  %v10385_v33 = vld [vmem:[#allocation5 + $0x7d4] sm:$0xf0]  ;;  %v7361_v35 = vor.u32 %v10289_v14, %v7360_v11  ;;  %v7617_v41 = vor.u32 %v10353_v0, %v7616_v29 }
 0x1c2   :  { %5437 = vmatpush.bf16.msra.mxu1 %v6897_v44  ;;  %v7344_v44 = vld [vmem:[#allocation5 + $0x4a8] sm:$0xf]  ;;  %v7745_v47 = vor.u32 %v10385_v33, %v7744_v30  ;;  %v10317_v12 = vld [vmem:[#allocation5 + $0x5b4] sm:$0xf0] }
 0x1c3   :  { %5450 = vmatpush.bf16.msra.mxu2 %v7025_v45  ;;  %v10285_v45 = vld [vmem:[#allocation5 + $0x4b4] sm:$0xf0]  ;;  %v7472_v46 = vld [vmem:[#allocation5 + $0x5a8] sm:$0xf] }
 0x1c4   :  { %5463 = vmatpush.bf16.msra.mxu3 %v7153_v49  ;;  %v7600_v48 = vld [vmem:[#allocation5 + $0x6a8] sm:$0xf]  ;;  %v10349_v49 = vld [vmem:[#allocation5 + $0x6b4] sm:$0xf0]  ;;  %v7345_v52 = vor.u32 %v10285_v45, %v7344_v44  ;;  %v7473_v54 = vor.u32 %v10317_v12, %v7472_v46 }
 0x1c5   :  { %5425 = vmatpush.bf16.msra.mxu0 %v6753_v57  ;;  %v7728_v50 = vld [vmem:[#allocation5 + $0x7a8] sm:$0xf]  ;;  %v10381_v51 = vld [vmem:[#allocation5 + $0x7b4] sm:$0xf0]  ;;  %v7601_v55 = vor.u32 %v10349_v49, %v7600_v48 }
 0x1c6   :  { %5438 = vmatpush.bf16.msra.mxu1 %v6881_v60  ;;  %v7328_v56 = vld [vmem:[#allocation5 + $0x488] sm:$0xf]  ;;  %v10281_v17 = vld [vmem:[#allocation5 + $0x494] sm:$0xf0]  ;;  %v7729_v43 = vor.u32 %v10381_v51, %v7728_v50 }
 0x1c7   :  { %5451 = vmatpush.bf16.msra.mxu2 %v7009_v62  ;;  %v7456_v57 = vld [vmem:[#allocation5 + $0x588] sm:$0xf]  ;;  %v10313_v58 = vld [vmem:[#allocation5 + $0x594] sm:$0xf0]  ;;  %v5219_v62 = vpop.f32.mrf.mxu0 }
 0x1c8   :  { %5464 = vmatpush.bf16.msra.mxu3 %v7137_v53  ;;  %5426 = vmatmul.bf16.vlgmr.msra.gmra.mxu0 %v11283_v9  ;;  %v7584_v59 = vld [vmem:[#allocation5 + $0x688] sm:$0xf]  ;;  %v10345_v60 = vld [vmem:[#allocation5 + $0x694] sm:$0xf0]  ;;  %v5220_v53 = vadd.f32 %v5219_v62, %v11397_v4 }
 0x1c9   :  { %5470 = vmatpush.bf16.msrb.mxu0 %v7377_v6  ;;  %5439 = vmatmul.bf16.vlgmr.msra.gmra.mxu1 %v11290_v25  ;;  %v7712_v63 = vld [vmem:[#allocation5 + $0x788] sm:$0xf]  ;;  %v10377_v3 = vld [vmem:[#allocation5 + $0x794] sm:$0xf0]  ;;  %v7329_v6 = vor.u32 %v10281_v17, %v7328_v56  ;;  %v7585_v11 = vor.u32 %v10345_v60, %v7584_v59 }
 0x1ca   :  { %5483 = vmatpush.bf16.msrb.mxu1 %v7505_v7  ;;  %5452 = vmatmul.bf16.vlgmr.msra.gmra.mxu2 %v11281_v8  ;;  %v5232_v7 = vpop.f32.mrf.mxu1  ;;  %v7312_v14 = vld [vmem:[#allocation5 + $0x468] sm:$0xf]  ;;  %v10277_v16 = vld [vmem:[#allocation5 + $0x474] sm:$0xf0]  ;;  %v7713_v28 = vor.u32 %v10377_v3, %v7712_v63 }
 0x1cb   :  { %5496 = vmatpush.bf16.msrb.mxu2 %v7633_v10  ;;  %5465 = vmatmul.bf16.vlgmr.msra.gmra.mxu3 %v11285_v15  ;;  %v7457_v10 = vor.u32 %v10313_v58, %v7456_v57  ;;  %v5233_v29 = vadd.f32 %v5232_v7, %v5220_v53  ;;  %v10309_v0 = vld [vmem:[#allocation5 + $0x574] sm:$0xf0]  ;;  %v7568_v30 = vld [vmem:[#allocation5 + $0x668] sm:$0xf] }
 0x1cc   :  { %5509 = vmatpush.bf16.msrb.mxu3 %v7761_v21  ;;  %v7440_v21 = vld [vmem:[#allocation5 + $0x568] sm:$0xf]  ;;  %v10341_v33 = vld [vmem:[#allocation5 + $0x674] sm:$0xf0] }
 0x1cd   :  { %5471 = vmatpush.bf16.msrb.mxu0 %v7361_v35  ;;  %v7696_v35 = vld [vmem:[#allocation5 + $0x768] sm:$0xf]  ;;  %v7441_v4 = vor.u32 %v10309_v0, %v7440_v21  ;;  %v7569_v44 = vor.u32 %v10341_v33, %v7568_v30  ;;  %v10273_v46 = vld [vmem:[#allocation5 + $0x454] sm:$0xf0]  ;;  %v5245_v48 = vpop.f32.mrf.mxu2 }
 0x1ce   :  { %5484 = vmatpush.bf16.msrb.mxu1 %v7489_v39  ;;  %v10373_v39 = vld [vmem:[#allocation5 + $0x774] sm:$0xf0]  ;;  %v7296_v45 = vld [vmem:[#allocation5 + $0x448] sm:$0xf] }
 0x1cf   :  { %5497 = vmatpush.bf16.msrb.mxu2 %v7617_v41  ;;  %v7313_v41 = vor.u32 %v10277_v16, %v7312_v14  ;;  %v7697_v12 = vor.u32 %v10373_v39, %v7696_v35  ;;  %v10305_v49 = vld [vmem:[#allocation5 + $0x554] sm:$0xf0]  ;;  %v7552_v50 = vld [vmem:[#allocation5 + $0x648] sm:$0xf]  ;;  %v5221_v17 = vpop.f32.mrf.mxu0  ;;  %v7297_v57 = vor.u32 %v10273_v46, %v7296_v45 }
 0x1d0   :  { %5510 = vmatpush.bf16.msrb.mxu3 %v7745_v47  ;;  %v7424_v47 = vld [vmem:[#allocation5 + $0x548] sm:$0xf]  ;;  %v10337_v51 = vld [vmem:[#allocation5 + $0x654] sm:$0xf0] }
 0x1d1   :  { %5472 = vmatpush.bf16.msrb.mxu0 %v7345_v52  ;;  %v5246_v52 = vadd.f32 %v5245_v48, %v5233_v29  ;;  %v10369_v56 = vld [vmem:[#allocation5 + $0x754] sm:$0xf0]  ;;  %v7425_v59 = vor.u32 %v10305_v49, %v7424_v47  ;;  %v7553_v60 = vor.u32 %v10337_v51, %v7552_v50  ;;  %v7280_v62 = vld [vmem:[#allocation5 + $0x428] sm:$0xf] }
 0x1d2   :  { %5485 = vmatpush.bf16.msrb.mxu1 %v7473_v54  ;;  %v5258_v54 = vpop.f32.mrf.mxu3  ;;  %v10269_v63 = vld [vmem:[#allocation5 + $0x434] sm:$0xf0]  ;;  %v7408_v3 = vld [vmem:[#allocation5 + $0x528] sm:$0xf] }
 0x1d3   :  { %5498 = vmatpush.bf16.msrb.mxu2 %v7601_v55  ;;  %v7680_v55 = vld [vmem:[#allocation5 + $0x748] sm:$0xf]  ;;  %v11404_v58 = vadd.f32 %v5258_v54, %v5246_v52  ;;  %v10365_v14 = vld [vmem:[#allocation5 + $0x734] sm:$0xf0]  ;;  %v7281_v16 = vor.u32 %v10269_v63, %v7280_v62 }
 0x1d4   :  { %5511 = vmatpush.bf16.msrb.mxu3 %v7729_v43  ;;  %v5234_v43 = vpop.f32.mrf.mxu1  ;;  %v7681_v53 = vor.u32 %v10369_v56, %v7680_v55  ;;  %v7536_v7 = vld [vmem:[#allocation5 + $0x628] sm:$0xf]  ;;  %v10297_v33 = vld [vmem:[#allocation5 + $0x514] sm:$0xf0] }
 0x1d5   :  { %5473 = vmatpush.bf16.msrb.mxu0 %v7329_v6  ;;  %v10301_v6 = vld [vmem:[#allocation5 + $0x534] sm:$0xf0]  ;;  %v7264_v21 = vld [vmem:[#allocation5 + $0x408] sm:$0xf]  ;;  %v5247_v45 = vpop.f32.mrf.mxu2 }
 0x1d6   :  { %5486 = vmatpush.bf16.msrb.mxu1 %v7457_v10  ;;  %v10333_v10 = vld [vmem:[#allocation5 + $0x634] sm:$0xf0]  ;;  %v7409_v29 = vor.u32 %v10301_v6, %v7408_v3  ;;  %v7392_v30 = vld [vmem:[#allocation5 + $0x508] sm:$0xf] }
 0x1d7   :  { %5499 = vmatpush.bf16.msrb.mxu2 %v7585_v11  ;;  %v7664_v11 = vld [vmem:[#allocation5 + $0x728] sm:$0xf]  ;;  %v7537_v0 = vor.u32 %v10333_v10, %v7536_v7  ;;  %v10421_v47 = vld [vmem:[#allocation5 + $0x8f4] sm:$0xf0]  ;;  %v7393_v54 = vor.u32 %v10297_v33, %v7392_v30 }
 0x1d8   :  { %5512 = vmatpush.bf16.msrb.mxu3 %v7713_v28  ;;  %v10265_v28 = vld [vmem:[#allocation5 + $0x414] sm:$0xf0]  ;;  %v7520_v35 = vld [vmem:[#allocation5 + $0x608] sm:$0xf]  ;;  %v7665_v39 = vor.u32 %v10365_v14, %v7664_v11 }
 0x1d9   :  { %5474 = vmatpush.bf16.msrb.mxu0 %v7313_v41  ;;  %v10329_v41 = vld [vmem:[#allocation5 + $0x614] sm:$0xf0]  ;;  %v7888_v46 = vld [vmem:[#allocation5 + $0x8e8] sm:$0xf]  ;;  %v7265_v49 = vor.u32 %v10265_v28, %v7264_v21 }
 0x1da   :  { %5487 = vmatpush.bf16.msrb.mxu1 %v7441_v4  ;;  %v7648_v4 = vld [vmem:[#allocation5 + $0x708] sm:$0xf]  ;;  %v5260_v48 = vpop.f32.mrf.mxu3  ;;  %v10453_v50 = vld [vmem:[#allocation5 + $0x9f4] sm:$0xf0]  ;;  %v7521_v55 = vor.u32 %v10329_v41, %v7520_v35  ;;  %v7889_v43 = vor.u32 %v10421_v47, %v7888_v46 }
 0x1db   :  { %5500 = vmatpush.bf16.msrb.mxu2 %v7569_v44  ;;  %v10361_v44 = vld [vmem:[#allocation5 + $0x714] sm:$0xf0]  ;;  %v8144_v51 = vld [vmem:[#allocation5 + $0xae8] sm:$0xf] }
 0x1dc   :  { %5513 = vmatpush.bf16.msrb.mxu3 %v7697_v12  ;;  %v8016_v12 = vld [vmem:[#allocation5 + $0x9e8] sm:$0xf]  ;;  %v10485_v52 = vld [vmem:[#allocation5 + $0xaf4] sm:$0xf0] }
 0x1dd   :  { %5475 = vmatpush.bf16.msrb.mxu0 %v7297_v57  ;;  %v8272_v56 = vld [vmem:[#allocation5 + $0xbe8] sm:$0xf]  ;;  %v10517_v17 = vld [vmem:[#allocation5 + $0xbf4] sm:$0xf0]  ;;  %v7649_v57 = vor.u32 %v10361_v44, %v7648_v4 }
 0x1de   :  { %5488 = vmatpush.bf16.msrb.mxu1 %v7425_v59  ;;  %v8017_v59 = vor.u32 %v10453_v50, %v8016_v12  ;;  %v7872_v62 = vld [vmem:[#allocation5 + $0x8c8] sm:$0xf]  ;;  %v10417_v63 = vld [vmem:[#allocation5 + $0x8d4] sm:$0xf0] }
 0x1df   :  { %5501 = vmatpush.bf16.msrb.mxu2 %v7553_v60  ;;  %v8145_v60 = vor.u32 %v10485_v52, %v8144_v51  ;;  %v8000_v3 = vld [vmem:[#allocation5 + $0x9c8] sm:$0xf]  ;;  %v10449_v6 = vld [vmem:[#allocation5 + $0x9d4] sm:$0xf0] }
 0x1e0   :  { %5514 = vmatpush.bf16.msrb.mxu3 %v7681_v53  ;;  %v8273_v53 = vor.u32 %v10517_v17, %v8272_v56  ;;  %v8128_v7 = vld [vmem:[#allocation5 + $0xac8] sm:$0xf]  ;;  %v10481_v10 = vld [vmem:[#allocation5 + $0xad4] sm:$0xf0]  ;;  %v8001_v21 = vor.u32 %v10449_v6, %v8000_v3 }
 0x1e1   :  { %5476 = vmatpush.bf16.msrb.mxu0 %v7281_v16  ;;  %v8256_v11 = vld [vmem:[#allocation5 + $0xbc8] sm:$0xf]  ;;  %v10513_v14 = vld [vmem:[#allocation5 + $0xbd4] sm:$0xf0]  ;;  %v7873_v16 = vor.u32 %v10417_v63, %v7872_v62  ;;  %v8129_v28 = vor.u32 %v10481_v10, %v8128_v7 }
 0x1e2   :  { %5489 = vmatpush.bf16.msrb.mxu1 %v7409_v29  ;;  %v7856_v29 = vld [vmem:[#allocation5 + $0x8a8] sm:$0xf]  ;;  %v8257_v33 = vor.u32 %v10513_v14, %v8256_v11  ;;  %v10445_v35 = vld [vmem:[#allocation5 + $0x9b4] sm:$0xf0] }
 0x1e3   :  { %5502 = vmatpush.bf16.msrb.mxu2 %v7537_v0  ;;  %v10413_v0 = vld [vmem:[#allocation5 + $0x8b4] sm:$0xf0]  ;;  %v7984_v30 = vld [vmem:[#allocation5 + $0x9a8] sm:$0xf] }
 0x1e4   :  { %5515 = vmatpush.bf16.msrb.mxu3 %v7665_v39  ;;  %v8112_v39 = vld [vmem:[#allocation5 + $0xaa8] sm:$0xf]  ;;  %v10477_v41 = vld [vmem:[#allocation5 + $0xab4] sm:$0xf0]  ;;  %v7857_v45 = vor.u32 %v10413_v0, %v7856_v29  ;;  %v7985_v46 = vor.u32 %v10445_v35, %v7984_v30 }
 0x1e5   :  { %5477 = vmatpush.bf16.msrb.mxu0 %v7265_v49  ;;  %v8240_v4 = vld [vmem:[#allocation5 + $0xba8] sm:$0xf]  ;;  %v10509_v44 = vld [vmem:[#allocation5 + $0xbb4] sm:$0xf0]  ;;  %v8113_v47 = vor.u32 %v10477_v41, %v8112_v39 }
 0x1e6   :  { %5490 = vmatpush.bf16.msrb.mxu1 %v7393_v54  ;;  %v7840_v12 = vld [vmem:[#allocation5 + $0x888] sm:$0xf]  ;;  %v10409_v48 = vld [vmem:[#allocation5 + $0x894] sm:$0xf0]  ;;  %v8241_v50 = vor.u32 %v10509_v44, %v8240_v4 }
 0x1e7   :  { %5503 = vmatpush.bf16.msrb.mxu2 %v7521_v55  ;;  %v7968_v49 = vld [vmem:[#allocation5 + $0x988] sm:$0xf]  ;;  %v10441_v51 = vld [vmem:[#allocation5 + $0x994] sm:$0xf0]  ;;  %v5271_v55 = vpop.f32.mrf.mxu0 }
 0x1e8   :  { %5516 = vmatpush.bf16.msrb.mxu3 %v7649_v57  ;;  %5478 = vmatmul.bf16.vlgmr.msrb.gmra.mxu0 %v11295_v37  ;;  %v8096_v52 = vld [vmem:[#allocation5 + $0xa88] sm:$0xf]  ;;  %v10473_v54 = vld [vmem:[#allocation5 + $0xa94] sm:$0xf0]  ;;  %v5272_v57 = vadd.f32 %v5271_v55, %v11404_v58 }
 0x1e9   :  { %5522 = vmatpush.bf16.msra.mxu0 %v7889_v43  ;;  %5491 = vmatmul.bf16.vlgmr.msrb.gmra.mxu1 %v11299_v40  ;;  %v8224_v56 = vld [vmem:[#allocation5 + $0xb88] sm:$0xf]  ;;  %v10505_v17 = vld [vmem:[#allocation5 + $0xb94] sm:$0xf0]  ;;  %v7841_v43 = vor.u32 %v10409_v48, %v7840_v12  ;;  %v8097_v62 = vor.u32 %v10473_v54, %v8096_v52 }
 0x1ea   :  { %5535 = vmatpush.bf16.msra.mxu1 %v8017_v59  ;;  %5504 = vmatmul.bf16.vlgmr.msrb.gmra.mxu2 %v11293_v34  ;;  %v5284_v59 = vpop.f32.mrf.mxu1  ;;  %v7824_v63 = vld [vmem:[#allocation5 + $0x868] sm:$0xf]  ;;  %v10405_v3 = vld [vmem:[#allocation5 + $0x874] sm:$0xf0]  ;;  %v8225_v6 = vor.u32 %v10505_v17, %v8224_v56 }
 0x1eb   :  { %5548 = vmatpush.bf16.msra.mxu2 %v8145_v60  ;;  %5517 = vmatmul.bf16.vlgmr.msrb.gmra.mxu3 %v11297_v38  ;;  %v7969_v60 = vor.u32 %v10441_v51, %v7968_v49  ;;  %v5285_v7 = vadd.f32 %v5284_v59, %v5272_v57  ;;  %v10437_v10 = vld [vmem:[#allocation5 + $0x974] sm:$0xf0]  ;;  %v8080_v11 = vld [vmem:[#allocation5 + $0xa68] sm:$0xf] }
 0x1ec   :  { %5561 = vmatpush.bf16.msra.mxu3 %v8273_v53  ;;  %v7952_v53 = vld [vmem:[#allocation5 + $0x968] sm:$0xf]  ;;  %v10469_v14 = vld [vmem:[#allocation5 + $0xa74] sm:$0xf0] }
 0x1ed   :  { %5523 = vmatpush.bf16.msra.mxu0 %v7873_v16  ;;  %v8208_v16 = vld [vmem:[#allocation5 + $0xb68] sm:$0xf]  ;;  %v7953_v58 = vor.u32 %v10437_v10, %v7952_v53  ;;  %v8081_v29 = vor.u32 %v10469_v14, %v8080_v11  ;;  %v10401_v30 = vld [vmem:[#allocation5 + $0x854] sm:$0xf0]  ;;  %v5297_v39 = vpop.f32.mrf.mxu2 }
 0x1ee   :  { %5536 = vmatpush.bf16.msra.mxu1 %v8001_v21  ;;  %v10501_v21 = vld [vmem:[#allocation5 + $0xb74] sm:$0xf0]  ;;  %v7808_v0 = vld [vmem:[#allocation5 + $0x848] sm:$0xf] }
 0x1ef   :  { %5549 = vmatpush.bf16.msra.mxu2 %v8129_v28  ;;  %v7825_v28 = vor.u32 %v10405_v3, %v7824_v63  ;;  %v8209_v35 = vor.u32 %v10501_v21, %v8208_v16  ;;  %v10433_v41 = vld [vmem:[#allocation5 + $0x954] sm:$0xf0]  ;;  %v8064_v4 = vld [vmem:[#allocation5 + $0xa48] sm:$0xf]  ;;  %v5273_v48 = vpop.f32.mrf.mxu0  ;;  %v7809_v49 = vor.u32 %v10401_v30, %v7808_v0 }
 0x1f0   :  { %5562 = vmatpush.bf16.msra.mxu3 %v8257_v33  ;;  %v7936_v33 = vld [vmem:[#allocation5 + $0x948] sm:$0xf]  ;;  %v10465_v44 = vld [vmem:[#allocation5 + $0xa54] sm:$0xf0] }
 0x1f1   :  { %5524 = vmatpush.bf16.msra.mxu0 %v7857_v45  ;;  %v5298_v45 = vadd.f32 %v5297_v39, %v5285_v7  ;;  %v10497_v12 = vld [vmem:[#allocation5 + $0xb54] sm:$0xf0]  ;;  %v7937_v52 = vor.u32 %v10433_v41, %v7936_v33  ;;  %v8065_v54 = vor.u32 %v10465_v44, %v8064_v4  ;;  %v7792_v55 = vld [vmem:[#allocation5 + $0x828] sm:$0xf] }
 0x1f2   :  { %5537 = vmatpush.bf16.msra.mxu1 %v7985_v46  ;;  %v5310_v46 = vpop.f32.mrf.mxu3  ;;  %v10397_v56 = vld [vmem:[#allocation5 + $0x834] sm:$0xf0]  ;;  %v7920_v17 = vld [vmem:[#allocation5 + $0x928] sm:$0xf] }
 0x1f3   :  { %5550 = vmatpush.bf16.msra.mxu2 %v8113_v47  ;;  %v8192_v47 = vld [vmem:[#allocation5 + $0xb48] sm:$0xf]  ;;  %v11411_v51 = vadd.f32 %v5310_v46, %v5298_v45  ;;  %v10493_v63 = vld [vmem:[#allocation5 + $0xb34] sm:$0xf0]  ;;  %v7793_v3 = vor.u32 %v10397_v56, %v7792_v55 }
 0x1f4   :  { %5563 = vmatpush.bf16.msra.mxu3 %v8241_v50  ;;  %v5286_v50 = vpop.f32.mrf.mxu1  ;;  %v8193_v57 = vor.u32 %v10497_v12, %v8192_v47  ;;  %v8048_v59 = vld [vmem:[#allocation5 + $0xa28] sm:$0xf]  ;;  %v10425_v14 = vld [vmem:[#allocation5 + $0x914] sm:$0xf0] }
 0x1f5   :  { %5525 = vmatpush.bf16.msra.mxu0 %v7841_v43  ;;  %v10429_v43 = vld [vmem:[#allocation5 + $0x934] sm:$0xf0]  ;;  %v7776_v53 = vld [vmem:[#allocation5 + $0x808] sm:$0xf]  ;;  %v5299_v0 = vpop.f32.mrf.mxu2 }
 0x1f6   :  { %5538 = vmatpush.bf16.msra.mxu1 %v7969_v60  ;;  %v10461_v60 = vld [vmem:[#allocation5 + $0xa34] sm:$0xf0]  ;;  %v7921_v7 = vor.u32 %v10429_v43, %v7920_v17  ;;  %v7904_v11 = vld [vmem:[#allocation5 + $0x908] sm:$0xf] }
 0x1f7   :  { %5551 = vmatpush.bf16.msra.mxu2 %v8097_v62  ;;  %v8176_v62 = vld [vmem:[#allocation5 + $0xb28] sm:$0xf]  ;;  %v8049_v10 = vor.u32 %v10461_v60, %v8048_v59  ;;  %v10549_v33 = vld [vmem:[#allocation5 + $0xcf4] sm:$0xf0]  ;;  %v7905_v46 = vor.u32 %v10425_v14, %v7904_v11 }
 0x1f8   :  { %5564 = vmatpush.bf16.msra.mxu3 %v8225_v6  ;;  %v10393_v6 = vld [vmem:[#allocation5 + $0x814] sm:$0xf0]  ;;  %v8032_v16 = vld [vmem:[#allocation5 + $0xa08] sm:$0xf]  ;;  %v8177_v21 = vor.u32 %v10493_v63, %v8176_v62 }
 0x1f9   :  { %5526 = vmatpush.bf16.msra.mxu0 %v7825_v28  ;;  %v10457_v28 = vld [vmem:[#allocation5 + $0xa14] sm:$0xf0]  ;;  %v8400_v30 = vld [vmem:[#allocation5 + $0xce8] sm:$0xf]  ;;  %v7777_v41 = vor.u32 %v10393_v6, %v7776_v53 }
 0x1fa   :  { %5539 = vmatpush.bf16.msra.mxu1 %v7953_v58  ;;  %v8160_v58 = vld [vmem:[#allocation5 + $0xb08] sm:$0xf]  ;;  %v5312_v39 = vpop.f32.mrf.mxu3  ;;  %v10581_v4 = vld [vmem:[#allocation5 + $0xdf4] sm:$0xf0]  ;;  %v8033_v47 = vor.u32 %v10457_v28, %v8032_v16  ;;  %v8401_v50 = vor.u32 %v10549_v33, %v8400_v30 }
 0x1fb   :  { %5552 = vmatpush.bf16.msra.mxu2 %v8081_v29  ;;  %v10489_v29 = vld [vmem:[#allocation5 + $0xb14] sm:$0xf0]  ;;  %v8656_v44 = vld [vmem:[#allocation5 + $0xee8] sm:$0xf] }
 0x1fc   :  { %5565 = vmatpush.bf16.msra.mxu3 %v8209_v35  ;;  %v8528_v35 = vld [vmem:[#allocation5 + $0xde8] sm:$0xf]  ;;  %v10613_v45 = vld [vmem:[#allocation5 + $0xef4] sm:$0xf0] }
 0x1fd   :  { %5527 = vmatpush.bf16.msra.mxu0 %v7809_v49  ;;  %v8784_v12 = vld [vmem:[#allocation5 + $0xfe8] sm:$0xf]  ;;  %v10645_v48 = vld [vmem:[#allocation5 + $0xff4] sm:$0xf0]  ;;  %v8161_v49 = vor.u32 %v10489_v29, %v8160_v58 }
 0x1fe   :  { %5540 = vmatpush.bf16.msra.mxu1 %v7937_v52  ;;  %v8529_v52 = vor.u32 %v10581_v4, %v8528_v35  ;;  %v8384_v55 = vld [vmem:[#allocation5 + $0xcc8] sm:$0xf]  ;;  %v10545_v56 = vld [vmem:[#allocation5 + $0xcd4] sm:$0xf0] }
 0x1ff   :  { %5553 = vmatpush.bf16.msra.mxu2 %v8065_v54  ;;  %v8657_v54 = vor.u32 %v10613_v45, %v8656_v44  ;;  %v8512_v17 = vld [vmem:[#allocation5 + $0xdc8] sm:$0xf]  ;;  %v10577_v43 = vld [vmem:[#allocation5 + $0xdd4] sm:$0xf0] }
 0x200   :  { %5566 = vmatpush.bf16.msra.mxu3 %v8193_v57  ;;  %v8785_v57 = vor.u32 %v10645_v48, %v8784_v12  ;;  %v8640_v59 = vld [vmem:[#allocation5 + $0xec8] sm:$0xf]  ;;  %v10609_v60 = vld [vmem:[#allocation5 + $0xed4] sm:$0xf0]  ;;  %v8513_v53 = vor.u32 %v10577_v43, %v8512_v17 }
 0x201   :  { %5528 = vmatpush.bf16.msra.mxu0 %v7793_v3  ;;  %v8768_v62 = vld [vmem:[#allocation5 + $0xfc8] sm:$0xf]  ;;  %v10641_v63 = vld [vmem:[#allocation5 + $0xfd4] sm:$0xf0]  ;;  %v8385_v3 = vor.u32 %v10545_v56, %v8384_v55  ;;  %v8641_v6 = vor.u32 %v10609_v60, %v8640_v59 }
 0x202   :  { %5541 = vmatpush.bf16.msra.mxu1 %v7921_v7  ;;  %v8368_v7 = vld [vmem:[#allocation5 + $0xca8] sm:$0xf]  ;;  %v8769_v14 = vor.u32 %v10641_v63, %v8768_v62  ;;  %v10573_v16 = vld [vmem:[#allocation5 + $0xdb4] sm:$0xf0] }
 0x203   :  { %5554 = vmatpush.bf16.msra.mxu2 %v8049_v10  ;;  %v10541_v10 = vld [vmem:[#allocation5 + $0xcb4] sm:$0xf0]  ;;  %v8496_v11 = vld [vmem:[#allocation5 + $0xda8] sm:$0xf] }
 0x204   :  { %5567 = vmatpush.bf16.msra.mxu3 %v8177_v21  ;;  %v8624_v21 = vld [vmem:[#allocation5 + $0xea8] sm:$0xf]  ;;  %v10605_v28 = vld [vmem:[#allocation5 + $0xeb4] sm:$0xf0]  ;;  %v8369_v0 = vor.u32 %v10541_v10, %v8368_v7  ;;  %v8497_v30 = vor.u32 %v10573_v16, %v8496_v11 }
 0x205   :  { %5529 = vmatpush.bf16.msra.mxu0 %v7777_v41  ;;  %v8752_v58 = vld [vmem:[#allocation5 + $0xfa8] sm:$0xf]  ;;  %v10637_v29 = vld [vmem:[#allocation5 + $0xfb4] sm:$0xf0]  ;;  %v8625_v33 = vor.u32 %v10605_v28, %v8624_v21 }
 0x206   :  { %5542 = vmatpush.bf16.msra.mxu1 %v7905_v46  ;;  %v8352_v35 = vld [vmem:[#allocation5 + $0xc88] sm:$0xf]  ;;  %v10537_v39 = vld [vmem:[#allocation5 + $0xc94] sm:$0xf0]  ;;  %v8753_v4 = vor.u32 %v10637_v29, %v8752_v58 }
 0x207   :  { %5555 = vmatpush.bf16.msra.mxu2 %v8033_v47  ;;  %v8480_v41 = vld [vmem:[#allocation5 + $0xd88] sm:$0xf]  ;;  %v10569_v44 = vld [vmem:[#allocation5 + $0xd94] sm:$0xf0]  ;;  %v5323_v47 = vpop.f32.mrf.mxu0 }
 0x208   :  { %5568 = vmatpush.bf16.msra.mxu3 %v8161_v49  ;;  %5530 = vmatmul.bf16.vlgmr.msra.gmra.mxu0 %v11305_v18  ;;  %v8608_v45 = vld [vmem:[#allocation5 + $0xe88] sm:$0xf]  ;;  %v10601_v46 = vld [vmem:[#allocation5 + $0xe94] sm:$0xf0]  ;;  %v5324_v49 = vadd.f32 %v5323_v47, %v11411_v51 }
 0x209   :  { %5574 = vmatpush.bf16.msrb.mxu0 %v8401_v50  ;;  %5543 = vmatmul.bf16.vlgmr.msra.gmra.mxu1 %v11309_v23  ;;  %v8736_v12 = vld [vmem:[#allocation5 + $0xf88] sm:$0xf]  ;;  %v10633_v48 = vld [vmem:[#allocation5 + $0xf94] sm:$0xf0]  ;;  %v8353_v50 = vor.u32 %v10537_v39, %v8352_v35  ;;  %v8609_v55 = vor.u32 %v10601_v46, %v8608_v45 }
 0x20a   :  { %5587 = vmatpush.bf16.msrb.mxu1 %v8529_v52  ;;  %5556 = vmatmul.bf16.vlgmr.msra.gmra.mxu2 %v11307_v22  ;;  %v5336_v52 = vpop.f32.mrf.mxu1  ;;  %v8336_v56 = vld [vmem:[#allocation5 + $0xc68] sm:$0xf]  ;;  %v10533_v17 = vld [vmem:[#allocation5 + $0xc74] sm:$0xf0]  ;;  %v8737_v43 = vor.u32 %v10633_v48, %v8736_v12 }
 0x20b   :  { %5600 = vmatpush.bf16.msrb.mxu2 %v8657_v54  ;;  %5569 = vmatmul.bf16.vlgmr.msra.gmra.mxu3 %v11311_v27  ;;  %v8481_v54 = vor.u32 %v10569_v44, %v8480_v41  ;;  %v5337_v59 = vadd.f32 %v5336_v52, %v5324_v49  ;;  %v10565_v60 = vld [vmem:[#allocation5 + $0xd74] sm:$0xf0]  ;;  %v8592_v62 = vld [vmem:[#allocation5 + $0xe68] sm:$0xf] }
 0x20c   :  { %5613 = vmatpush.bf16.msrb.mxu3 %v8785_v57  ;;  %v8464_v57 = vld [vmem:[#allocation5 + $0xd68] sm:$0xf]  ;;  %v10597_v63 = vld [vmem:[#allocation5 + $0xe74] sm:$0xf0] }
 0x20d   :  { %5575 = vmatpush.bf16.msrb.mxu0 %v8385_v3  ;;  %v8720_v3 = vld [vmem:[#allocation5 + $0xf68] sm:$0xf]  ;;  %v8465_v51 = vor.u32 %v10565_v60, %v8464_v57  ;;  %v8593_v7 = vor.u32 %v10597_v63, %v8592_v62  ;;  %v10529_v11 = vld [vmem:[#allocation5 + $0xc54] sm:$0xf0]  ;;  %v5349_v21 = vpop.f32.mrf.mxu2 }
 0x20e   :  { %5588 = vmatpush.bf16.msrb.mxu1 %v8513_v53  ;;  %v10629_v53 = vld [vmem:[#allocation5 + $0xf74] sm:$0xf0]  ;;  %v8320_v10 = vld [vmem:[#allocation5 + $0xc48] sm:$0xf] }
 0x20f   :  { %5601 = vmatpush.bf16.msrb.mxu2 %v8641_v6  ;;  %v8337_v6 = vor.u32 %v10533_v17, %v8336_v56  ;;  %v8721_v16 = vor.u32 %v10629_v53, %v8720_v3  ;;  %v10561_v28 = vld [vmem:[#allocation5 + $0xd54] sm:$0xf0]  ;;  %v8576_v58 = vld [vmem:[#allocation5 + $0xe48] sm:$0xf]  ;;  %v5325_v39 = vpop.f32.mrf.mxu0  ;;  %v8321_v41 = vor.u32 %v10529_v11, %v8320_v10 }
 0x210   :  { %5614 = vmatpush.bf16.msrb.mxu3 %v8769_v14  ;;  %v8448_v14 = vld [vmem:[#allocation5 + $0xd48] sm:$0xf]  ;;  %v10593_v29 = vld [vmem:[#allocation5 + $0xe54] sm:$0xf0] }
 0x211   :  { %5576 = vmatpush.bf16.msrb.mxu0 %v8369_v0  ;;  %v5350_v0 = vadd.f32 %v5349_v21, %v5337_v59  ;;  %v10625_v35 = vld [vmem:[#allocation5 + $0xf54] sm:$0xf0]  ;;  %v8449_v45 = vor.u32 %v10561_v28, %v8448_v14  ;;  %v8577_v46 = vor.u32 %v10593_v29, %v8576_v58  ;;  %v8304_v47 = vld [vmem:[#allocation5 + $0xc28] sm:$0xf] }
 0x212   :  { %5589 = vmatpush.bf16.msrb.mxu1 %v8497_v30  ;;  %v5362_v30 = vpop.f32.mrf.mxu3  ;;  %v10525_v12 = vld [vmem:[#allocation5 + $0xc34] sm:$0xf0]  ;;  %v8432_v48 = vld [vmem:[#allocation5 + $0xd28] sm:$0xf] }
 0x213   :  { %5602 = vmatpush.bf16.msrb.mxu2 %v8625_v33  ;;  %v8704_v33 = vld [vmem:[#allocation5 + $0xf48] sm:$0xf]  ;;  %v11418_v44 = vadd.f32 %v5362_v30, %v5350_v0  ;;  %v10621_v56 = vld [vmem:[#allocation5 + $0xf34] sm:$0xf0]  ;;  %v8305_v17 = vor.u32 %v10525_v12, %v8304_v47 }
 0x214   :  { %5615 = vmatpush.bf16.msrb.mxu3 %v8753_v4  ;;  %v5338_v4 = vpop.f32.mrf.mxu1  ;;  %v8705_v49 = vor.u32 %v10625_v35, %v8704_v33  ;;  %v8560_v52 = vld [vmem:[#allocation5 + $0xe28] sm:$0xf]  ;;  %v10553_v63 = vld [vmem:[#allocation5 + $0xd14] sm:$0xf0] }
 0x215   :  { %5577 = vmatpush.bf16.msrb.mxu0 %v8353_v50  ;;  %v10557_v50 = vld [vmem:[#allocation5 + $0xd34] sm:$0xf0]  ;;  %v8288_v57 = vld [vmem:[#allocation5 + $0xc08] sm:$0xf]  ;;  %v5351_v10 = vpop.f32.mrf.mxu2 }
 0x216   :  { %5590 = vmatpush.bf16.msrb.mxu1 %v8481_v54  ;;  %v10589_v54 = vld [vmem:[#allocation5 + $0xe34] sm:$0xf0]  ;;  %v8433_v59 = vor.u32 %v10557_v50, %v8432_v48  ;;  %v8416_v62 = vld [vmem:[#allocation5 + $0xd08] sm:$0xf] }
 0x217   :  { %5603 = vmatpush.bf16.msrb.mxu2 %v8609_v55  ;;  %v8688_v55 = vld [vmem:[#allocation5 + $0xf28] sm:$0xf]  ;;  %v8561_v60 = vor.u32 %v10589_v54, %v8560_v52  ;;  %v10677_v14 = vld [vmem:[#allocation5 + $0x10f4] sm:$0xf0]  ;;  %v8417_v30 = vor.u32 %v10553_v63, %v8416_v62 }
 0x218   :  { %5616 = vmatpush.bf16.msrb.mxu3 %v8737_v43  ;;  %v10521_v43 = vld [vmem:[#allocation5 + $0xc14] sm:$0xf0]  ;;  %v8544_v3 = vld [vmem:[#allocation5 + $0xe08] sm:$0xf]  ;;  %v8689_v53 = vor.u32 %v10621_v56, %v8688_v55 }
 0x219   :  { %5578 = vmatpush.bf16.msrb.mxu0 %v8337_v6  ;;  %v10585_v6 = vld [vmem:[#allocation5 + $0xe14] sm:$0xf0]  ;;  %v8912_v11 = vld [vmem:[#allocation5 + $0x10e8] sm:$0xf]  ;;  %v8289_v28 = vor.u32 %v10521_v43, %v8288_v57 }
 0x21a   :  { %5591 = vmatpush.bf16.msrb.mxu1 %v8465_v51  ;;  %v8672_v51 = vld [vmem:[#allocation5 + $0xf08] sm:$0xf]  ;;  %v5364_v21 = vpop.f32.mrf.mxu3  ;;  %v10709_v58 = vld [vmem:[#allocation5 + $0x11f4] sm:$0xf0]  ;;  %v8545_v33 = vor.u32 %v10585_v6, %v8544_v3  ;;  %v8913_v4 = vor.u32 %v10677_v14, %v8912_v11 }
 0x21b   :  { %5604 = vmatpush.bf16.msrb.mxu2 %v8593_v7  ;;  %v10617_v7 = vld [vmem:[#allocation5 + $0xf14] sm:$0xf0]  ;;  %v9168_v29 = vld [vmem:[#allocation5 + $0x12e8] sm:$0xf] }
 0x21c   :  { %5617 = vmatpush.bf16.msrb.mxu3 %v8721_v16  ;;  %v9040_v16 = vld [vmem:[#allocation5 + $0x11e8] sm:$0xf]  ;;  %v10741_v0 = vld [vmem:[#allocation5 + $0x12f4] sm:$0xf0] }
 0x21d   :  { %5579 = vmatpush.bf16.msrb.mxu0 %v8321_v41  ;;  %v9296_v35 = vld [vmem:[#allocation5 + $0x13e8] sm:$0xf]  ;;  %v10773_v39 = vld [vmem:[#allocation5 + $0x13f4] sm:$0xf0]  ;;  %v8673_v41 = vor.u32 %v10617_v7, %v8672_v51 }
 0x21e   :  { %5592 = vmatpush.bf16.msrb.mxu1 %v8449_v45  ;;  %v9041_v45 = vor.u32 %v10709_v58, %v9040_v16  ;;  %v8896_v47 = vld [vmem:[#allocation5 + $0x10c8] sm:$0xf]  ;;  %v10673_v12 = vld [vmem:[#allocation5 + $0x10d4] sm:$0xf0] }
 0x21f   :  { %5605 = vmatpush.bf16.msrb.mxu2 %v8577_v46  ;;  %v9169_v46 = vor.u32 %v10741_v0, %v9168_v29  ;;  %v9024_v48 = vld [vmem:[#allocation5 + $0x11c8] sm:$0xf]  ;;  %v10705_v50 = vld [vmem:[#allocation5 + $0x11d4] sm:$0xf0] }
 0x220   :  { %5618 = vmatpush.bf16.msrb.mxu3 %v8705_v49  ;;  %v9297_v49 = vor.u32 %v10773_v39, %v9296_v35  ;;  %v9152_v52 = vld [vmem:[#allocation5 + $0x12c8] sm:$0xf]  ;;  %v10737_v54 = vld [vmem:[#allocation5 + $0x12d4] sm:$0xf0]  ;;  %v9025_v57 = vor.u32 %v10705_v50, %v9024_v48 }
 0x221   :  { %5580 = vmatpush.bf16.msrb.mxu0 %v8305_v17  ;;  %v9280_v55 = vld [vmem:[#allocation5 + $0x13c8] sm:$0xf]  ;;  %v10769_v56 = vld [vmem:[#allocation5 + $0x13d4] sm:$0xf0]  ;;  %v8897_v17 = vor.u32 %v10673_v12, %v8896_v47  ;;  %v9153_v43 = vor.u32 %v10737_v54, %v9152_v52 }
 0x222   :  { %5593 = vmatpush.bf16.msrb.mxu1 %v8433_v59  ;;  %v8880_v59 = vld [vmem:[#allocation5 + $0x10a8] sm:$0xf]  ;;  %v9281_v63 = vor.u32 %v10769_v56, %v9280_v55  ;;  %v10701_v3 = vld [vmem:[#allocation5 + $0x11b4] sm:$0xf0] }
 0x223   :  { %5606 = vmatpush.bf16.msrb.mxu2 %v8561_v60  ;;  %v10669_v60 = vld [vmem:[#allocation5 + $0x10b4] sm:$0xf0]  ;;  %v9008_v62 = vld [vmem:[#allocation5 + $0x11a8] sm:$0xf] }
 0x224   :  { %5619 = vmatpush.bf16.msrb.mxu3 %v8689_v53  ;;  %v9136_v53 = vld [vmem:[#allocation5 + $0x12a8] sm:$0xf]  ;;  %v10733_v6 = vld [vmem:[#allocation5 + $0x12b4] sm:$0xf0]  ;;  %v8881_v10 = vor.u32 %v10669_v60, %v8880_v59  ;;  %v9009_v11 = vor.u32 %v10701_v3, %v9008_v62 }
 0x225   :  { %5581 = vmatpush.bf16.msrb.mxu0 %v8289_v28  ;;  %v9264_v51 = vld [vmem:[#allocation5 + $0x13a8] sm:$0xf]  ;;  %v10765_v7 = vld [vmem:[#allocation5 + $0x13b4] sm:$0xf0]  ;;  %v9137_v14 = vor.u32 %v10733_v6, %v9136_v53 }
 0x226   :  { %5594 = vmatpush.bf16.msrb.mxu1 %v8417_v30  ;;  %v8864_v16 = vld [vmem:[#allocation5 + $0x1088] sm:$0xf]  ;;  %v10665_v21 = vld [vmem:[#allocation5 + $0x1094] sm:$0xf0]  ;;  %v9265_v58 = vor.u32 %v10765_v7, %v9264_v51 }
 0x227   :  { %5607 = vmatpush.bf16.msrb.mxu2 %v8545_v33  ;;  %v8992_v28 = vld [vmem:[#allocation5 + $0x1188] sm:$0xf]  ;;  %v10697_v29 = vld [vmem:[#allocation5 + $0x1194] sm:$0xf0]  ;;  %v5375_v33 = vpop.f32.mrf.mxu0 }
 0x228   :  { %5620 = vmatpush.bf16.msrb.mxu3 %v8673_v41  ;;  %5582 = vmatmul.bf16.vlgmr.msrb.gmra.mxu0 %v11317_v13  ;;  %v9120_v0 = vld [vmem:[#allocation5 + $0x1288] sm:$0xf]  ;;  %v10729_v30 = vld [vmem:[#allocation5 + $0x1294] sm:$0xf0]  ;;  %v5376_v41 = vadd.f32 %v5375_v33, %v11418_v44 }
 0x229   :  { %5626 = vmatpush.bf16.msra.mxu0 %v8913_v4  ;;  %5595 = vmatmul.bf16.vlgmr.msrb.gmra.mxu1 %v11321_v20  ;;  %v9248_v35 = vld [vmem:[#allocation5 + $0x1388] sm:$0xf]  ;;  %v10761_v39 = vld [vmem:[#allocation5 + $0x1394] sm:$0xf0]  ;;  %v8865_v4 = vor.u32 %v10665_v21, %v8864_v16  ;;  %v9121_v47 = vor.u32 %v10729_v30, %v9120_v0 }
 0x22a   :  { %5639 = vmatpush.bf16.msra.mxu1 %v9041_v45  ;;  %5608 = vmatmul.bf16.vlgmr.msrb.gmra.mxu2 %v11319_v19  ;;  %v5388_v45 = vpop.f32.mrf.mxu1  ;;  %v8848_v12 = vld [vmem:[#allocation5 + $0x1068] sm:$0xf]  ;;  %v10661_v48 = vld [vmem:[#allocation5 + $0x1074] sm:$0xf0]  ;;  %v9249_v50 = vor.u32 %v10761_v39, %v9248_v35 }
 0x22b   :  { %5652 = vmatpush.bf16.msra.mxu2 %v9169_v46  ;;  %5621 = vmatmul.bf16.vlgmr.msrb.gmra.mxu3 %v11323_v26  ;;  %v8993_v46 = vor.u32 %v10697_v29, %v8992_v28  ;;  %v5389_v52 = vadd.f32 %v5388_v45, %v5376_v41  ;;  %v10693_v54 = vld [vmem:[#allocation5 + $0x1174] sm:$0xf0]  ;;  %v9104_v55 = vld [vmem:[#allocation5 + $0x1268] sm:$0xf] }
 0x22c   :  { %5665 = vmatpush.bf16.msra.mxu3 %v9297_v49  ;;  %v8976_v49 = vld [vmem:[#allocation5 + $0x1168] sm:$0xf]  ;;  %v10725_v56 = vld [vmem:[#allocation5 + $0x1274] sm:$0xf0] }
 0x22d   :  { %5627 = vmatpush.bf16.msra.mxu0 %v8897_v17  ;;  %v9232_v17 = vld [vmem:[#allocation5 + $0x1368] sm:$0xf]  ;;  %v8977_v44 = vor.u32 %v10693_v54, %v8976_v49  ;;  %v9105_v59 = vor.u32 %v10725_v56, %v9104_v55  ;;  %v10657_v62 = vld [vmem:[#allocation5 + $0x1054] sm:$0xf0]  ;;  %v5401_v53 = vpop.f32.mrf.mxu2 }
 0x22e   :  { %5640 = vmatpush.bf16.msra.mxu1 %v9025_v57  ;;  %v10757_v57 = vld [vmem:[#allocation5 + $0x1374] sm:$0xf0]  ;;  %v8832_v60 = vld [vmem:[#allocation5 + $0x1048] sm:$0xf] }
 0x22f   :  { %5653 = vmatpush.bf16.msra.mxu2 %v9153_v43  ;;  %v8849_v43 = vor.u32 %v10661_v48, %v8848_v12  ;;  %v9233_v3 = vor.u32 %v10757_v57, %v9232_v17  ;;  %v10689_v6 = vld [vmem:[#allocation5 + $0x1154] sm:$0xf0]  ;;  %v9088_v51 = vld [vmem:[#allocation5 + $0x1248] sm:$0xf]  ;;  %v5377_v21 = vpop.f32.mrf.mxu0  ;;  %v8833_v28 = vor.u32 %v10657_v62, %v8832_v60 }
 0x230   :  { %5666 = vmatpush.bf16.msra.mxu3 %v9281_v63  ;;  %v8960_v63 = vld [vmem:[#allocation5 + $0x1148] sm:$0xf]  ;;  %v10721_v7 = vld [vmem:[#allocation5 + $0x1254] sm:$0xf0] }
 0x231   :  { %5628 = vmatpush.bf16.msra.mxu0 %v8881_v10  ;;  %v5402_v10 = vadd.f32 %v5401_v53, %v5389_v52  ;;  %v10753_v16 = vld [vmem:[#allocation5 + $0x1354] sm:$0xf0]  ;;  %v8961_v0 = vor.u32 %v10689_v6, %v8960_v63  ;;  %v9089_v30 = vor.u32 %v10721_v7, %v9088_v51  ;;  %v8816_v33 = vld [vmem:[#allocation5 + $0x1028] sm:$0xf] }
 0x232   :  { %5641 = vmatpush.bf16.msra.mxu1 %v9009_v11  ;;  %v5414_v11 = vpop.f32.mrf.mxu3  ;;  %v10653_v35 = vld [vmem:[#allocation5 + $0x1034] sm:$0xf0]  ;;  %v8944_v39 = vld [vmem:[#allocation5 + $0x1128] sm:$0xf] }
 0x233   :  { %5654 = vmatpush.bf16.msra.mxu2 %v9137_v14  ;;  %v9216_v14 = vld [vmem:[#allocation5 + $0x1348] sm:$0xf]  ;;  %v11425_v29 = vadd.f32 %v5414_v11, %v5402_v10  ;;  %v10749_v12 = vld [vmem:[#allocation5 + $0x1334] sm:$0xf0]  ;;  %v8817_v48 = vor.u32 %v10653_v35, %v8816_v33 }
 0x234   :  { %5667 = vmatpush.bf16.msra.mxu3 %v9265_v58  ;;  %v5390_v58 = vpop.f32.mrf.mxu1  ;;  %v9217_v41 = vor.u32 %v10753_v16, %v9216_v14  ;;  %v9072_v45 = vld [vmem:[#allocation5 + $0x1228] sm:$0xf]  ;;  %v10681_v56 = vld [vmem:[#allocation5 + $0x1114] sm:$0xf0] }
 0x235   :  { %5629 = vmatpush.bf16.msra.mxu0 %v8865_v4  ;;  %v10685_v4 = vld [vmem:[#allocation5 + $0x1134] sm:$0xf0]  ;;  %v8800_v49 = vld [vmem:[#allocation5 + $0x1008] sm:$0xf]  ;;  %v5403_v60 = vpop.f32.mrf.mxu2 }
 0x236   :  { %5642 = vmatpush.bf16.msra.mxu1 %v8993_v46  ;;  %v10717_v46 = vld [vmem:[#allocation5 + $0x1234] sm:$0xf0]  ;;  %v8945_v52 = vor.u32 %v10685_v4, %v8944_v39  ;;  %v8928_v55 = vld [vmem:[#allocation5 + $0x1108] sm:$0xf] }
 0x237   :  { %5655 = vmatpush.bf16.msra.mxu2 %v9121_v47  ;;  %v9200_v47 = vld [vmem:[#allocation5 + $0x1328] sm:$0xf]  ;;  %v9073_v54 = vor.u32 %v10717_v46, %v9072_v45  ;;  %v10805_v63 = vld [vmem:[#allocation5 + $0x14f4] sm:$0xf0]  ;;  %v8929_v11 = vor.u32 %v10681_v56, %v8928_v55 }
 0x238   :  { %5668 = vmatpush.bf16.msra.mxu3 %v9249_v50  ;;  %v10649_v50 = vld [vmem:[#allocation5 + $0x1014] sm:$0xf0]  ;;  %v9056_v17 = vld [vmem:[#allocation5 + $0x1208] sm:$0xf]  ;;  %v9201_v57 = vor.u32 %v10749_v12, %v9200_v47 }
 0x239   :  { %5630 = vmatpush.bf16.msra.mxu0 %v8849_v43  ;;  %v10713_v43 = vld [vmem:[#allocation5 + $0x1214] sm:$0xf0]  ;;  %v9424_v62 = vld [vmem:[#allocation5 + $0x14e8] sm:$0xf]  ;;  %v8801_v6 = vor.u32 %v10649_v50, %v8800_v49 }
 0x23a   :  { %5643 = vmatpush.bf16.msra.mxu1 %v8977_v44  ;;  %v9184_v44 = vld [vmem:[#allocation5 + $0x1308] sm:$0xf]  ;;  %v5416_v53 = vpop.f32.mrf.mxu3  ;;  %v10837_v51 = vld [vmem:[#allocation5 + $0x15f4] sm:$0xf0]  ;;  %v9057_v14 = vor.u32 %v10713_v43, %v9056_v17  ;;  %v9425_v58 = vor.u32 %v10805_v63, %v9424_v62 }
 0x23b   :  { %5656 = vmatpush.bf16.msra.mxu2 %v9105_v59  ;;  %v10745_v59 = vld [vmem:[#allocation5 + $0x1314] sm:$0xf0]  ;;  %v9680_v7 = vld [vmem:[#allocation5 + $0x16e8] sm:$0xf] }
 0x23c   :  { %5669 = vmatpush.bf16.msra.mxu3 %v9233_v3  ;;  %v9552_v3 = vld [vmem:[#allocation5 + $0x15e8] sm:$0xf]  ;;  %v10869_v10 = vld [vmem:[#allocation5 + $0x16f4] sm:$0xf0] }
 0x23d   :  { %5631 = vmatpush.bf16.msra.mxu0 %v8833_v28  ;;  %v9808_v16 = vld [vmem:[#allocation5 + $0x17e8] sm:$0xf]  ;;  %v10901_v21 = vld [vmem:[#allocation5 + $0x17f4] sm:$0xf0]  ;;  %v9185_v28 = vor.u32 %v10745_v59, %v9184_v44 }
 0x23e   :  { %5644 = vmatpush.bf16.msra.mxu1 %v8961_v0  ;;  %v9553_v0 = vor.u32 %v10837_v51, %v9552_v3  ;;  %v9408_v33 = vld [vmem:[#allocation5 + $0x14c8] sm:$0xf]  ;;  %v10801_v35 = vld [vmem:[#allocation5 + $0x14d4] sm:$0xf0]  ;;  %v11002_v51 = vld [vmem:[#allocation7] sm:$0xf] }
 0x23f   :  { %5657 = vmatpush.bf16.msra.mxu2 %v9089_v30  ;;  %v9681_v30 = vor.u32 %v10869_v10, %v9680_v7  ;;  %v9536_v39 = vld [vmem:[#allocation5 + $0x15c8] sm:$0xf]  ;;  %v10833_v4 = vld [vmem:[#allocation5 + $0x15d4] sm:$0xf0]  ;;  %v948_v7 = vperm.slane %v11002_v51, 2 }
 0x240   :  { %5670 = vmatpush.bf16.msra.mxu3 %v9217_v41  ;;  %v9809_v41 = vor.u32 %v10901_v21, %v9808_v16  ;;  %v9664_v45 = vld [vmem:[#allocation5 + $0x16c8] sm:$0xf]  ;;  %v10865_v46 = vld [vmem:[#allocation5 + $0x16d4] sm:$0xf0]  ;;  %v9537_v49 = vor.u32 %v10833_v4, %v9536_v39 }
 0x241   :  { %5632 = vmatpush.bf16.msra.mxu0 %v8817_v48  ;;  %v9792_v47 = vld [vmem:[#allocation5 + $0x17c8] sm:$0xf]  ;;  %v10897_v12 = vld [vmem:[#allocation5 + $0x17d4] sm:$0xf0]  ;;  %v9409_v48 = vor.u32 %v10801_v35, %v9408_v33  ;;  %v9665_v50 = vor.u32 %v10865_v46, %v9664_v45 }
 0x242   :  { %5645 = vmatpush.bf16.msra.mxu1 %v8945_v52  ;;  %v9392_v52 = vld [vmem:[#allocation5 + $0x14a8] sm:$0xf]  ;;  %v9793_v56 = vor.u32 %v10897_v12, %v9792_v47  ;;  %v10829_v17 = vld [vmem:[#allocation5 + $0x15b4] sm:$0xf0] }
 0x243   :  { %5658 = vmatpush.bf16.msra.mxu2 %v9073_v54  ;;  %v10797_v54 = vld [vmem:[#allocation5 + $0x14b4] sm:$0xf0]  ;;  %v9520_v55 = vld [vmem:[#allocation5 + $0x15a8] sm:$0xf] }
 0x244   :  { %5671 = vmatpush.bf16.msra.mxu3 %v9201_v57  ;;  %v9648_v57 = vld [vmem:[#allocation5 + $0x16a8] sm:$0xf]  ;;  %v10861_v43 = vld [vmem:[#allocation5 + $0x16b4] sm:$0xf0]  ;;  %v9393_v60 = vor.u32 %v10797_v54, %v9392_v52  ;;  %v9521_v63 = vor.u32 %v10829_v17, %v9520_v55 }
 0x245   :  { %5633 = vmatpush.bf16.msra.mxu0 %v8801_v6  ;;  %v9776_v44 = vld [vmem:[#allocation5 + $0x17a8] sm:$0xf]  ;;  %v10893_v59 = vld [vmem:[#allocation5 + $0x17b4] sm:$0xf0]  ;;  %v9649_v3 = vor.u32 %v10861_v43, %v9648_v57 }
 0x246   :  { %5646 = vmatpush.bf16.msra.mxu1 %v8929_v11  ;;  %v9376_v62 = vld [vmem:[#allocation5 + $0x1488] sm:$0xf]  ;;  %v10793_v53 = vld [vmem:[#allocation5 + $0x1494] sm:$0xf0]  ;;  %v9777_v10 = vor.u32 %v10893_v59, %v9776_v44  ;;  %v5440_v45 = vpop.f32.mrf.mxu1 }
 0x247   :  { %5659 = vmatpush.bf16.msra.mxu2 %v9057_v14  ;;  %v9504_v6 = vld [vmem:[#allocation5 + $0x1588] sm:$0xf]  ;;  %v10825_v11 = vld [vmem:[#allocation5 + $0x1594] sm:$0xf0] }
 0x248   :  { %5672 = vmatpush.bf16.msra.mxu3 %v9185_v28  ;;  %5634 = vmatmul.bf16.vlgmr.msra.gmra.mxu0 %v11329_v24  ;;  %v9632_v14 = vld [vmem:[#allocation5 + $0x1688] sm:$0xf]  ;;  %v10857_v16 = vld [vmem:[#allocation5 + $0x1694] sm:$0xf0] }
 0x249   :  { %5678 = vmatpush.bf16.msrb.mxu0 %v9425_v58  ;;  %5647 = vmatmul.bf16.vlgmr.msra.gmra.mxu1 %v11333_v32  ;;  %v9760_v21 = vld [vmem:[#allocation5 + $0x1788] sm:$0xf]  ;;  %v10889_v28 = vld [vmem:[#allocation5 + $0x1794] sm:$0xf0]  ;;  %v9377_v58 = vor.u32 %v10793_v53, %v9376_v62  ;;  %v9633_v33 = vor.u32 %v10857_v16, %v9632_v14 }
 0x24a   :  { %5691 = vmatpush.bf16.msrb.mxu1 %v9553_v0  ;;  %5660 = vmatmul.bf16.vlgmr.msra.gmra.mxu2 %v11331_v31  ;;  %v5427_v0 = vpop.f32.mrf.mxu0  ;;  %v9360_v35 = vld [vmem:[#allocation5 + $0x1468] sm:$0xf]  ;;  %v10789_v39 = vld [vmem:[#allocation5 + $0x1474] sm:$0xf0]  ;;  %v9761_v46 = vor.u32 %v10889_v28, %v9760_v21 }
 0x24b   :  { %5704 = vmatpush.bf16.msrb.mxu2 %v9681_v30  ;;  %5673 = vmatmul.bf16.vlgmr.msra.gmra.mxu3 %v11335_v36  ;;  %v9505_v30 = vor.u32 %v10825_v11, %v9504_v6  ;;  %v5428_v4 = vadd.f32 %v5427_v0, %v948_v7  ;;  %v10821_v47 = vld [vmem:[#allocation5 + $0x1574] sm:$0xf0]  ;;  %v9616_v12 = vld [vmem:[#allocation5 + $0x1668] sm:$0xf]  ;;  %v9361_v54 = vor.u32 %v10789_v39, %v9360_v35 }
 0x24c   :  { %5717 = vmatpush.bf16.msrb.mxu3 %v9809_v41  ;;  %v9488_v41 = vld [vmem:[#allocation5 + $0x1568] sm:$0xf]  ;;  %v10785_v57 = vld [vmem:[#allocation5 + $0x1454] sm:$0xf0] }
 0x24d   :  { %5679 = vmatpush.bf16.msrb.mxu0 %v9409_v48  ;;  %v10853_v48 = vld [vmem:[#allocation5 + $0x1674] sm:$0xf0]  ;;  %v5441_v52 = vadd.f32 %v5440_v45, %v5428_v4  ;;  %v9489_v55 = vor.u32 %v10821_v47, %v9488_v41  ;;  %v9344_v17 = vld [vmem:[#allocation5 + $0x1448] sm:$0xf]  ;;  %v5453_v44 = vpop.f32.mrf.mxu2 }
 0x24e   :  { %5692 = vmatpush.bf16.msrb.mxu1 %v9537_v49  ;;  %v9744_v49 = vld [vmem:[#allocation5 + $0x1768] sm:$0xf]  ;;  %v5466_v53 = vpop.f32.mrf.mxu3  ;;  %v10881_v51 = vld [vmem:[#allocation5 + $0x1754] sm:$0xf0]  ;;  %v9345_v7 = vor.u32 %v10785_v57, %v9344_v17  ;;  %v5442_v0 = vpop.f32.mrf.mxu1 }
 0x24f   :  { %5705 = vmatpush.bf16.msrb.mxu2 %v9665_v50  ;;  %v10885_v50 = vld [vmem:[#allocation5 + $0x1774] sm:$0xf0]  ;;  %v9472_v43 = vld [vmem:[#allocation5 + $0x1548] sm:$0xf]  ;;  %v6850_v0 = vld [vmem:[#allocation5 + $0xd8] sm:$0xf0] }
 0x250   :  { %5718 = vmatpush.bf16.msrb.mxu3 %v9793_v56  ;;  %v9617_v56 = vor.u32 %v10853_v48, %v9616_v12  ;;  %v9745_v59 = vor.u32 %v10885_v50, %v9744_v49  ;;  %v9600_v62 = vld [vmem:[#allocation5 + $0x1648] sm:$0xf]  ;;  %v10781_v28 = vld [vmem:[#allocation5 + $0x1434] sm:$0xf0] }
 0x251   :  { %5680 = vmatpush.bf16.msrb.mxu0 %v9393_v60  ;;  %v10817_v60 = vld [vmem:[#allocation5 + $0x1554] sm:$0xf0]  ;;  %v9728_v6 = vld [vmem:[#allocation5 + $0x1748] sm:$0xf] }
 0x252   :  { %5693 = vmatpush.bf16.msrb.mxu1 %v9521_v63  ;;  %v10849_v63 = vld [vmem:[#allocation5 + $0x1654] sm:$0xf0]  ;;  %v5429_v11 = vpop.f32.mrf.mxu0  ;;  %v9473_v14 = vor.u32 %v10817_v60, %v9472_v43  ;;  %v9328_v21 = vld [vmem:[#allocation5 + $0x1428] sm:$0xf]  ;;  %v10195_v60 = vld [vmem:[#allocation5 + $0x1ec] sm:$0xf] }
 0x253   :  { %5706 = vmatpush.bf16.msrb.mxu2 %v9649_v3  ;;  %v5454_v3 = vadd.f32 %v5453_v44, %v5441_v52  ;;  %v9601_v16 = vor.u32 %v10849_v63, %v9600_v62  ;;  %v9584_v35 = vld [vmem:[#allocation5 + $0x1628] sm:$0xf]  ;;  %v10845_v39 = vld [vmem:[#allocation5 + $0x1634] sm:$0xf0]  ;;  %v9329_v45 = vor.u32 %v10781_v28, %v9328_v21  ;;  %v10163_v44 = vld [vmem:[#allocation5 + $0xec] sm:$0xf] }
 0x254   :  { %5719 = vmatpush.bf16.msrb.mxu3 %v9777_v10  ;;  %v9712_v41 = vld [vmem:[#allocation5 + $0x1728] sm:$0xf]  ;;  %v10877_v4 = vld [vmem:[#allocation5 + $0x1734] sm:$0xf0]  ;;  %v9585_v48 = vor.u32 %v10845_v39, %v9584_v35  ;;  %v6994_v63 = vld [vmem:[#allocation5 + $0x1f8] sm:$0xf0] }
 0x255   :  { %5681 = vmatpush.bf16.msrb.mxu0 %v9377_v58  ;;  %v11431_v10 = vadd.f32 %v5466_v53, %v5454_v3  ;;  %v9456_v58 = vld [vmem:[#allocation5 + $0x1528] sm:$0xf]  ;;  %v10777_v47 = vld [vmem:[#allocation5 + $0x1414] sm:$0xf0]  ;;  %v10227_v3 = vld [vmem:[#allocation5 + $0x2ec] sm:$0xf]  ;;  %v6997_v21 = vor.u32 %v10195_v60, %v6994_v63 }
 0x256   :  { %5694 = vmatpush.bf16.msrb.mxu1 %v9505_v30  ;;  %v9729_v30 = vor.u32 %v10881_v51, %v9728_v6  ;;  %v9440_v49 = vld [vmem:[#allocation5 + $0x1508] sm:$0xf]  ;;  %v10809_v50 = vld [vmem:[#allocation5 + $0x1514] sm:$0xf0]  ;;  %v5468_v43 = vpop.f32.mrf.mxu3  ;;  %v7122_v53 = vld [vmem:[#allocation5 + $0x2f8] sm:$0xf0] }
 0x257   :  { %5707 = vmatpush.bf16.msrb.mxu2 %v9633_v33  ;;  %v10813_v33 = vld [vmem:[#allocation5 + $0x1534] sm:$0xf0]  ;;  %v9568_v52 = vld [vmem:[#allocation5 + $0x1608] sm:$0xf]  ;;  %v9441_v6 = vor.u32 %v10809_v50, %v9440_v49  ;;  %v7250_v11 = vld [vmem:[#allocation5 + $0x3f8] sm:$0xf0]  ;;  %v7125_v28 = vor.u32 %v10227_v3, %v7122_v53 }
 0x258   :  { %5720 = vmatpush.bf16.msrb.mxu3 %v9761_v46  ;;  %v9312_v46 = vld [vmem:[#allocation5 + $0x1408] sm:$0xf]  ;;  %v9457_v12 = vor.u32 %v10813_v33, %v9456_v58  ;;  %v10873_v57 = vld [vmem:[#allocation5 + $0x1714] sm:$0xf0]  ;;  %v10159_v58 = vld [vmem:[#allocation5 + $0xcc] sm:$0xf] }
 0x259   :  { %5682 = vmatpush.bf16.msrb.mxu0 %v9361_v54  ;;  %v5455_v54 = vpop.f32.mrf.mxu2  ;;  %v9696_v17 = vld [vmem:[#allocation5 + $0x1708] sm:$0xf]  ;;  %v9313_v62 = vor.u32 %v10777_v47, %v9312_v46  ;;  %v6978_v35 = vld [vmem:[#allocation5 + $0x1d8] sm:$0xf0]  ;;  %v10223_v39 = vld [vmem:[#allocation5 + $0x2cc] sm:$0xf]  ;;  %v6853_v46 = vor.u32 %v10159_v58, %v6850_v0 }
 0x25a   :  { %5695 = vmatpush.bf16.msrb.mxu1 %v9489_v55  ;;  %v9713_v55 = vor.u32 %v10877_v4, %v9712_v41  ;;  %v7106_v41 = vld [vmem:[#allocation5 + $0x2d8] sm:$0xf0]  ;;  %v10255_v4 = vld [vmem:[#allocation5 + $0x3cc] sm:$0xf] }
 0x25b   :  { %5708 = vmatpush.bf16.msrb.mxu2 %v9617_v56  ;;  %v10841_v56 = vld [vmem:[#allocation5 + $0x1614] sm:$0xf0]  ;;  %v6834_v49 = vld [vmem:[#allocation5 + $0xb8] sm:$0xf0]  ;;  %v10187_v50 = vld [vmem:[#allocation5 + $0x1ac] sm:$0xf] }
 0x25c   :  { %5721 = vmatpush.bf16.msrb.mxu3 %v9745_v59  ;;  %v6866_v59 = vld [vmem:[#allocation5 + $0xf8] sm:$0xf0]  ;;  %v9569_v51 = vor.u32 %v10841_v56, %v9568_v52  ;;  %v10151_v60 = vld [vmem:[#allocation5 + $0x8c] sm:$0xf] }
 0x25d   :  { %5683 = vmatpush.bf16.msrb.mxu0 %v9345_v7  ;;  %v10259_v7 = vld [vmem:[#allocation5 + $0x3ec] sm:$0xf]  ;;  %v6962_v54 = vld [vmem:[#allocation5 + $0x1b8] sm:$0xf0] }
 0x25e   :  { %5696 = vmatpush.bf16.msrb.mxu1 %v9473_v14  ;;  %v9697_v14 = vor.u32 %v10873_v57, %v9696_v17  ;;  %v7253_v33 = vor.u32 %v10259_v7, %v7250_v11  ;;  %v7090_v56 = vld [vmem:[#allocation5 + $0x2b8] sm:$0xf0]  ;;  %v10251_v17 = vld [vmem:[#allocation5 + $0x3ac] sm:$0xf] }
 0x25f   :  { %5709 = vmatpush.bf16.msrb.mxu2 %v9601_v16  ;;  %v6869_v16 = vor.u32 %v10163_v44, %v6866_v59  ;;  %v7218_v57 = vld [vmem:[#allocation5 + $0x3b8] sm:$0xf0]  ;;  %v6965_v44 = vor.u32 %v10187_v50, %v6962_v54  ;;  %v10183_v63 = vld [vmem:[#allocation5 + $0x18c] sm:$0xf] }
 0x260   :  { %5722 = vmatpush.bf16.msrb.mxu3 %v9729_v30  ;;  %v10191_v30 = vld [vmem:[#allocation5 + $0x1cc] sm:$0xf]  ;;  %v7221_v3 = vor.u32 %v10251_v17, %v7218_v57  ;;  %v6946_v53 = vld [vmem:[#allocation5 + $0x198] sm:$0xf0] }
 0x261   :  { %5684 = vmatpush.bf16.msrb.mxu0 %v9329_v45  ;;  %v7234_v45 = vld [vmem:[#allocation5 + $0x3d8] sm:$0xf0]  ;;  %v6981_v47 = vor.u32 %v10191_v30, %v6978_v35  ;;  %v10247_v7 = vld [vmem:[#allocation5 + $0x38c] sm:$0xf] }
 0x262   :  { %5697 = vmatpush.bf16.msrb.mxu1 %v9457_v12  ;;  %v7109_v12 = vor.u32 %v10223_v39, %v7106_v41  ;;  %v7237_v52 = vor.u32 %v10255_v4, %v7234_v45  ;;  %v7202_v11 = vld [vmem:[#allocation5 + $0x398] sm:$0xf0]  ;;  %v10147_v58 = vld [vmem:[#allocation5 + $0x6c] sm:$0xf] }
 0x263   :  { %5710 = vmatpush.bf16.msrb.mxu2 %v9585_v48  ;;  %v10155_v48 = vld [vmem:[#allocation5 + $0xac] sm:$0xf]  ;;  %v6802_v0 = vld [vmem:[#allocation5 + $0x78] sm:$0xf0]  ;;  %v7205_v39 = vor.u32 %v10247_v7, %v7202_v11 }
 0x264   :  { %5723 = vmatpush.bf16.msrb.mxu3 %v9713_v55  ;;  %v10219_v55 = vld [vmem:[#allocation5 + $0x2ac] sm:$0xf]  ;;  %v6837_v43 = vor.u32 %v10155_v48, %v6834_v49  ;;  %v6930_v41 = vld [vmem:[#allocation5 + $0x178] sm:$0xf0]  ;;  %v6805_v48 = vor.u32 %v10147_v58, %v6802_v0 }
 0x265   :  { %5685 = vmatpush.bf16.msrb.mxu0 %v9313_v62  ;;  %v7093_v59 = vor.u32 %v10219_v55, %v7090_v56  ;;  %v6818_v62 = vld [vmem:[#allocation5 + $0x98] sm:$0xf0]  ;;  %v10179_v30 = vld [vmem:[#allocation5 + $0x16c] sm:$0xf] }
 0x266   :  { %5698 = vmatpush.bf16.msrb.mxu1 %v9441_v6  ;;  %v10215_v6 = vld [vmem:[#allocation5 + $0x28c] sm:$0xf]  ;;  %v5492_v35 = vpop.f32.mrf.mxu1  ;;  %v7058_v45 = vld [vmem:[#allocation5 + $0x278] sm:$0xf0]  ;;  %v6933_v49 = vor.u32 %v10179_v30, %v6930_v41 }
 0x267   :  { %5711 = vmatpush.bf16.msrb.mxu2 %v9569_v51  ;;  %v7074_v51 = vld [vmem:[#allocation5 + $0x298] sm:$0xf0]  ;;  %v10211_v4 = vld [vmem:[#allocation5 + $0x26c] sm:$0xf] }
 0x268   :  { %5724 = vmatpush.bf16.msrb.mxu3 %v9697_v14  ;;  %5686 = vmatmul.bf16.vlgmr.msrb.gmra.mxu0 %v11343_v61  ;;  %v6821_v14 = vor.u32 %v10151_v60, %v6818_v62  ;;  %v7061_v50 = vor.u32 %v10211_v4, %v7058_v45  ;;  %v6786_v54 = vld [vmem:[#allocation5 + $0x58] sm:$0xf0]  ;;  %v10175_v55 = vld [vmem:[#allocation5 + $0x14c] sm:$0xf] }
 0x269   :  { %5730 = vmatpush.bf16.msra.mxu0 %v6869_v16  ;;  %5699 = vmatmul.bf16.vlgmr.msrb.gmra.mxu1 %v11347_v2  ;;  %v5479_v16 = vpop.f32.mrf.mxu0  ;;  %v6914_v17 = vld [vmem:[#allocation5 + $0x158] sm:$0xf0]  ;;  %v10207_v57 = vld [vmem:[#allocation5 + $0x24c] sm:$0xf] }
 0x26a   :  { %5743 = vmatpush.bf16.msra.mxu1 %v6997_v21  ;;  %5712 = vmatmul.bf16.vlgmr.msrb.gmra.mxu2 %v11345_v1  ;;  %v6949_v21 = vor.u32 %v10183_v63, %v6946_v53  ;;  %v10239_v60 = vld [vmem:[#allocation5 + $0x34c] sm:$0xf]  ;;  %v7170_v62 = vld [vmem:[#allocation5 + $0x358] sm:$0xf0] }
 0x26b   :  { %5756 = vmatpush.bf16.msra.mxu2 %v7125_v28  ;;  %5725 = vmatmul.bf16.vlgmr.msrb.gmra.mxu3 %v11349_v5  ;;  %v7077_v28 = vor.u32 %v10215_v6, %v7074_v51  ;;  %v6917_v6 = vor.u32 %v10175_v55, %v6914_v17  ;;  %v10139_v7 = vld [vmem:[#allocation5 + $0x2c] sm:$0xf]  ;;  %v6770_v11 = vld [vmem:[#allocation5 + $0x38] sm:$0xf0] }
 0x26c   :  { %5769 = vmatpush.bf16.msra.mxu3 %v7253_v33  ;;  %v5480_v33 = vadd.f32 %v5479_v16, %v11431_v10  ;;  %v10203_v58 = vld [vmem:[#allocation5 + $0x22c] sm:$0xf]  ;;  %v7026_v0 = vld [vmem:[#allocation5 + $0x238] sm:$0xf0] }
 0x26d   :  { %5731 = vmatpush.bf16.msra.mxu0 %v6853_v46  ;;  %v10243_v46 = vld [vmem:[#allocation5 + $0x36c] sm:$0xf]  ;;  %v5505_v56 = vpop.f32.mrf.mxu2  ;;  %v6754_v41 = vld [vmem:[#allocation5 + $0x18] sm:$0xf0]  ;;  %v7029_v45 = vor.u32 %v10203_v58, %v7026_v0 }
 0x26e   :  { %5744 = vmatpush.bf16.msra.mxu1 %v6981_v47  ;;  %v7186_v47 = vld [vmem:[#allocation5 + $0x378] sm:$0xf0]  ;;  %v5494_v16 = vpop.f32.mrf.mxu1  ;;  %v10235_v30 = vld [vmem:[#allocation5 + $0x32c] sm:$0xf] }
 0x26f   :  { %5757 = vmatpush.bf16.msra.mxu2 %v7109_v12  ;;  %v5493_v12 = vadd.f32 %v5492_v35, %v5480_v33  ;;  %v7189_v10 = vor.u32 %v10243_v46, %v7186_v47  ;;  %v7154_v33 = vld [vmem:[#allocation5 + $0x338] sm:$0xf0]  ;;  %v6773_v35 = vor.u32 %v10139_v7, %v6770_v11  ;;  %v10167_v46 = vld [vmem:[#allocation5 + $0x10c] sm:$0xf] }
 0x270   :  { %5770 = vmatpush.bf16.msra.mxu3 %v7237_v52  ;;  %v10143_v52 = vld [vmem:[#allocation5 + $0x4c] sm:$0xf]  ;;  %v6882_v47 = vld [vmem:[#allocation5 + $0x118] sm:$0xf0] }
 0x271   :  { %5732 = vmatpush.bf16.msra.mxu0 %v6837_v43  ;;  %v7042_v43 = vld [vmem:[#allocation5 + $0x258] sm:$0xf0]  ;;  %v6789_v63 = vor.u32 %v10143_v52, %v6786_v54  ;;  %v5481_v53 = vpop.f32.mrf.mxu0  ;;  %v10231_v52 = vld [vmem:[#allocation5 + $0x30c] sm:$0xf] }
 0x272   :  { %5745 = vmatpush.bf16.msra.mxu1 %v6965_v44  ;;  %v5506_v44 = vadd.f32 %v5505_v56, %v5493_v12  ;;  %v7045_v51 = vor.u32 %v10207_v57, %v7042_v43  ;;  %v10199_v12 = vld [vmem:[#allocation5 + $0x20c] sm:$0xf]  ;;  %v7138_v54 = vld [vmem:[#allocation5 + $0x318] sm:$0xf0] }
 0x273   :  { %5758 = vmatpush.bf16.msra.mxu2 %v7093_v59  ;;  %v5518_v59 = vpop.f32.mrf.mxu3  ;;  %v10291_v56 = vld [vmem:[#allocation5 + $0x4ec] sm:$0xf]  ;;  %v7506_v43 = vld [vmem:[#allocation5 + $0x5f8] sm:$0xf0] }
 0x274   :  { %5771 = vmatpush.bf16.msra.mxu3 %v7221_v3  ;;  %v11438_v3 = vadd.f32 %v5518_v59, %v5506_v44  ;;  %v10323_v17 = vld [vmem:[#allocation5 + $0x5ec] sm:$0xf]  ;;  %v7634_v59 = vld [vmem:[#allocation5 + $0x6f8] sm:$0xf0] }
 0x275   :  { %5733 = vmatpush.bf16.msra.mxu0 %v6821_v14  ;;  %v10171_v14 = vld [vmem:[#allocation5 + $0x12c] sm:$0xf]  ;;  %v7762_v53 = vld [vmem:[#allocation5 + $0x7f8] sm:$0xf0]  ;;  %v7509_v7 = vor.u32 %v10323_v17, %v7506_v43 }
 0x276   :  { %5746 = vmatpush.bf16.msra.mxu1 %v6949_v21  ;;  %v7173_v21 = vor.u32 %v10239_v60, %v7170_v62  ;;  %v10355_v44 = vld [vmem:[#allocation5 + $0x6ec] sm:$0xf]  ;;  %v6885_v60 = vor.u32 %v10167_v46, %v6882_v47  ;;  %v7362_v16 = vld [vmem:[#allocation5 + $0x4d8] sm:$0xf0] }
 0x277   :  { %5759 = vmatpush.bf16.msra.mxu2 %v7077_v28  ;;  %v6898_v28 = vld [vmem:[#allocation5 + $0x138] sm:$0xf0]  ;;  %v7637_v11 = vor.u32 %v10355_v44, %v7634_v59  ;;  %v10351_v0 = vld [vmem:[#allocation5 + $0x6cc] sm:$0xf] }
 0x278   :  { %5772 = vmatpush.bf16.msra.mxu3 %v7205_v39  ;;  %v10135_v39 = vld [vmem:[#allocation5 + $0xc] sm:$0xf]  ;;  %v6901_v4 = vor.u32 %v10171_v14, %v6898_v28  ;;  %v7490_v58 = vld [vmem:[#allocation5 + $0x5d8] sm:$0xf0] }
 0x279   :  { %5734 = vmatpush.bf16.msra.mxu0 %v6805_v48  ;;  %v5507_v48 = vpop.f32.mrf.mxu2  ;;  %v6757_v57 = vor.u32 %v10135_v39, %v6754_v41  ;;  %v10287_v14 = vld [vmem:[#allocation5 + $0x4cc] sm:$0xf]  ;;  %v7346_v46 = vld [vmem:[#allocation5 + $0x4b8] sm:$0xf0] }
 0x27a   :  { %5747 = vmatpush.bf16.msra.mxu1 %v6933_v49  ;;  %v7157_v49 = vor.u32 %v10235_v30, %v7154_v33  ;;  %v7618_v30 = vld [vmem:[#allocation5 + $0x6d8] sm:$0xf0]  ;;  %v10383_v33 = vld [vmem:[#allocation5 + $0x7cc] sm:$0xf]  ;;  %v7365_v39 = vor.u32 %v10287_v14, %v7362_v16 }
 0x27b   :  { %5760 = vmatpush.bf16.msra.mxu2 %v7061_v50  ;;  %v7010_v50 = vld [vmem:[#allocation5 + $0x218] sm:$0xf0]  ;;  %v5520_v55 = vpop.f32.mrf.mxu3  ;;  %v10315_v47 = vld [vmem:[#allocation5 + $0x5ac] sm:$0xf] }
 0x27c   :  { %5773 = vmatpush.bf16.msra.mxu3 %v7189_v10  ;;  %v7378_v10 = vld [vmem:[#allocation5 + $0x4f8] sm:$0xf0]  ;;  %v7013_v62 = vor.u32 %v10199_v12, %v7010_v50  ;;  %v10279_v17 = vld [vmem:[#allocation5 + $0x48c] sm:$0xf] }
 0x27d   :  { %5735 = vmatpush.bf16.msra.mxu0 %v6789_v63  ;;  %v10387_v63 = vld [vmem:[#allocation5 + $0x7ec] sm:$0xf]  ;;  %v7474_v48 = vld [vmem:[#allocation5 + $0x5b8] sm:$0xf0] }
 0x27e   :  { %5748 = vmatpush.bf16.msra.mxu1 %v6917_v6  ;;  %v7141_v6 = vor.u32 %v10231_v52, %v7138_v54  ;;  %v7765_v28 = vor.u32 %v10387_v63, %v7762_v53  ;;  %v7602_v50 = vld [vmem:[#allocation5 + $0x6b8] sm:$0xf0]  ;;  %v10379_v52 = vld [vmem:[#allocation5 + $0x7ac] sm:$0xf] }
 0x27f   :  { %5761 = vmatpush.bf16.msra.mxu2 %v7045_v51  ;;  %v7381_v51 = vor.u32 %v10291_v56, %v7378_v10  ;;  %v7730_v54 = vld [vmem:[#allocation5 + $0x7b8] sm:$0xf0]  ;;  %v7477_v56 = vor.u32 %v10315_v47, %v7474_v48  ;;  %v10311_v43 = vld [vmem:[#allocation5 + $0x58c] sm:$0xf] }
 0x280   :  { %5774 = vmatpush.bf16.msra.mxu3 %v7173_v21  ;;  %v10319_v21 = vld [vmem:[#allocation5 + $0x5cc] sm:$0xf]  ;;  %v7733_v44 = vor.u32 %v10379_v52, %v7730_v54  ;;  %v7714_v63 = vld [vmem:[#allocation5 + $0x798] sm:$0xf0] }
 0x281   :  { %5736 = vmatpush.bf16.msra.mxu0 %v6773_v35  ;;  %v7746_v35 = vld [vmem:[#allocation5 + $0x7d8] sm:$0xf0]  ;;  %v7493_v41 = vor.u32 %v10319_v21, %v7490_v58  ;;  %v10343_v59 = vld [vmem:[#allocation5 + $0x68c] sm:$0xf] }
 0x282   :  { %5749 = vmatpush.bf16.msra.mxu1 %v6901_v4  ;;  %v7621_v4 = vor.u32 %v10351_v0, %v7618_v30  ;;  %v7749_v12 = vor.u32 %v10383_v33, %v7746_v35  ;;  %v10307_v14 = vld [vmem:[#allocation5 + $0x56c] sm:$0xf]  ;;  %v7570_v0 = vld [vmem:[#allocation5 + $0x678] sm:$0xf0] }
 0x283   :  { %5762 = vmatpush.bf16.msra.mxu2 %v7029_v45  ;;  %v10283_v45 = vld [vmem:[#allocation5 + $0x4ac] sm:$0xf]  ;;  %v7698_v33 = vld [vmem:[#allocation5 + $0x778] sm:$0xf0] }
 0x284   :  { %5775 = vmatpush.bf16.msra.mxu3 %v7157_v49  ;;  %v10347_v49 = vld [vmem:[#allocation5 + $0x6ac] sm:$0xf]  ;;  %v7349_v55 = vor.u32 %v10283_v45, %v7346_v46 }
 0x285   :  { %5737 = vmatpush.bf16.msra.mxu0 %v6757_v57  ;;  %v7605_v10 = vor.u32 %v10347_v49, %v7602_v50  ;;  %v7330_v57 = vld [vmem:[#allocation5 + $0x498] sm:$0xf0]  ;;  %v10339_v58 = vld [vmem:[#allocation5 + $0x66c] sm:$0xf] }
 0x286   :  { %5750 = vmatpush.bf16.msra.mxu1 %v6885_v60  ;;  %v7586_v60 = vld [vmem:[#allocation5 + $0x698] sm:$0xf0]  ;;  %v7333_v53 = vor.u32 %v10279_v17, %v7330_v57  ;;  %v10371_v30 = vld [vmem:[#allocation5 + $0x76c] sm:$0xf] }
 0x287   :  { %5763 = vmatpush.bf16.msra.mxu2 %v7013_v62  ;;  %v5531_v62 = vpop.f32.mrf.mxu0  ;;  %v10303_v45 = vld [vmem:[#allocation5 + $0x54c] sm:$0xf]  ;;  %v7701_v46 = vor.u32 %v10371_v30, %v7698_v33  ;;  %v7554_v49 = vld [vmem:[#allocation5 + $0x658] sm:$0xf0] }
 0x288   :  { %5776 = vmatpush.bf16.msra.mxu3 %v7141_v6  ;;  %5738 = vmatmul.bf16.vlgmr.msra.gmra.mxu0 %v11283_v9  ;;  %v10375_v9 = vld [vmem:[#allocation5 + $0x78c] sm:$0xf]  ;;  %v7650_v33 = vld [vmem:[#allocation5 + $0x718] sm:$0xf0] }
 0x289   :  { %5782 = vmatpush.bf16.msrb.mxu0 %v7381_v51  ;;  %5751 = vmatmul.bf16.vlgmr.msra.gmra.mxu1 %v11290_v25  ;;  %v5544_v25 = vpop.f32.mrf.mxu1  ;;  %v7589_v51 = vor.u32 %v10343_v59, %v7586_v60  ;;  %v7717_v16 = vor.u32 %v10375_v9, %v7714_v63  ;;  %v10335_v48 = vld [vmem:[#allocation5 + $0x64c] sm:$0xf]  ;;  %v7282_v59 = vld [vmem:[#allocation5 + $0x438] sm:$0xf0] }
 0x28a   :  { %5795 = vmatpush.bf16.msrb.mxu1 %v7509_v7  ;;  %5764 = vmatmul.bf16.vlgmr.msra.gmra.mxu2 %v11281_v8  ;;  %v7458_v8 = vld [vmem:[#allocation5 + $0x598] sm:$0xf0]  ;;  %v10275_v7 = vld [vmem:[#allocation5 + $0x46c] sm:$0xf] }
 0x28b   :  { %5808 = vmatpush.bf16.msrb.mxu2 %v7637_v11  ;;  %5777 = vmatmul.bf16.vlgmr.msra.gmra.mxu3 %v11285_v15  ;;  %v5532_v15 = vadd.f32 %v5531_v62, %v11438_v3  ;;  %v7461_v6 = vor.u32 %v10311_v43, %v7458_v8  ;;  %v7314_v11 = vld [vmem:[#allocation5 + $0x478] sm:$0xf0]  ;;  %v10367_v54 = vld [vmem:[#allocation5 + $0x74c] sm:$0xf] }
 0x28c   :  { %5821 = vmatpush.bf16.msrb.mxu3 %v7765_v28  ;;  %v7442_v28 = vld [vmem:[#allocation5 + $0x578] sm:$0xf0]  ;;  %v7317_v35 = vor.u32 %v10275_v7, %v7314_v11  ;;  %v10267_v8 = vld [vmem:[#allocation5 + $0x42c] sm:$0xf] }
 0x28d   :  { %5783 = vmatpush.bf16.msrb.mxu0 %v7365_v39  ;;  %v5545_v21 = vadd.f32 %v5544_v25, %v5532_v15  ;;  %v7445_v3 = vor.u32 %v10307_v14, %v7442_v28  ;;  %v7573_v39 = vor.u32 %v10339_v58, %v7570_v0  ;;  %v5557_v47 = vpop.f32.mrf.mxu2  ;;  %v10299_v60 = vld [vmem:[#allocation5 + $0x52c] sm:$0xf]  ;;  %v7410_v9 = vld [vmem:[#allocation5 + $0x538] sm:$0xf0] }
 0x28e   :  { %5796 = vmatpush.bf16.msrb.mxu1 %v7493_v41  ;;  %v10271_v41 = vld [vmem:[#allocation5 + $0x44c] sm:$0xf]  ;;  %v5570_v52 = vpop.f32.mrf.mxu3  ;;  %v7538_v15 = vld [vmem:[#allocation5 + $0x638] sm:$0xf0]  ;;  %v7413_v11 = vor.u32 %v10299_v60, %v7410_v9 }
 0x28f   :  { %5809 = vmatpush.bf16.msrb.mxu2 %v7621_v4  ;;  %v7298_v4 = vld [vmem:[#allocation5 + $0x458] sm:$0xf0]  ;;  %v5558_v50 = vadd.f32 %v5557_v47, %v5545_v21  ;;  %v10331_v63 = vld [vmem:[#allocation5 + $0x62c] sm:$0xf] }
 0x290   :  { %5822 = vmatpush.bf16.msrb.mxu3 %v7749_v12  ;;  %v7426_v12 = vld [vmem:[#allocation5 + $0x558] sm:$0xf0]  ;;  %v7541_v14 = vor.u32 %v10331_v63, %v7538_v15  ;;  %v10327_v28 = vld [vmem:[#allocation5 + $0x60c] sm:$0xf] }
 0x291   :  { %5784 = vmatpush.bf16.msrb.mxu0 %v7349_v55  ;;  %v7682_v55 = vld [vmem:[#allocation5 + $0x758] sm:$0xf0]  ;;  %v5546_v17 = vpop.f32.mrf.mxu1  ;;  %v11445_v57 = vadd.f32 %v5570_v52, %v5558_v50  ;;  %v7429_v43 = vor.u32 %v10303_v45, %v7426_v12  ;;  %v10359_v30 = vld [vmem:[#allocation5 + $0x70c] sm:$0xf] }
 0x292   :  { %5797 = vmatpush.bf16.msrb.mxu1 %v7477_v56  ;;  %v5533_v56 = vpop.f32.mrf.mxu0  ;;  %v7685_v62 = vor.u32 %v10367_v54, %v7682_v55  ;;  %v7666_v25 = vld [vmem:[#allocation5 + $0x738] sm:$0xf0]  ;;  %v10483_v47 = vld [vmem:[#allocation5 + $0xaec] sm:$0xf]  ;;  %v7653_v54 = vor.u32 %v10359_v30, %v7650_v33 }
 0x293   :  { %5810 = vmatpush.bf16.msrb.mxu2 %v7605_v10  ;;  %v7301_v10 = vor.u32 %v10271_v41, %v7298_v4  ;;  %v7266_v7 = vld [vmem:[#allocation5 + $0x418] sm:$0xf0]  ;;  %v10451_v41 = vld [vmem:[#allocation5 + $0x9ec] sm:$0xf] }
 0x294   :  { %5823 = vmatpush.bf16.msrb.mxu3 %v7733_v44  ;;  %v7557_v44 = vor.u32 %v10335_v48, %v7554_v49  ;;  %v7394_v21 = vld [vmem:[#allocation5 + $0x518] sm:$0xf0]  ;;  %v10515_v50 = vld [vmem:[#allocation5 + $0xbec] sm:$0xf] }
 0x295   :  { %5785 = vmatpush.bf16.msrb.mxu0 %v7333_v53  ;;  %v10363_v53 = vld [vmem:[#allocation5 + $0x72c] sm:$0xf]  ;;  %v7522_v0 = vld [vmem:[#allocation5 + $0x618] sm:$0xf0] }
 0x296   :  { %5798 = vmatpush.bf16.msrb.mxu1 %v7461_v6  ;;  %v7285_v6 = vor.u32 %v10267_v8, %v7282_v59  ;;  %v7669_v58 = vor.u32 %v10363_v53, %v7666_v25  ;;  %v5572_v4 = vpop.f32.mrf.mxu3  ;;  %v8146_v12 = vld [vmem:[#allocation5 + $0xaf8] sm:$0xf0]  ;;  %v7525_v49 = vor.u32 %v10327_v28, %v7522_v0  ;;  %v10415_v17 = vld [vmem:[#allocation5 + $0x8cc] sm:$0xf] }
 0x297   :  { %5811 = vmatpush.bf16.msrb.mxu2 %v7589_v51  ;;  %v10263_v51 = vld [vmem:[#allocation5 + $0x40c] sm:$0xf]  ;;  %v8274_v52 = vld [vmem:[#allocation5 + $0xbf8] sm:$0xf0] }
 0x298   :  { %5824 = vmatpush.bf16.msrb.mxu3 %v7717_v16  ;;  %v10295_v16 = vld [vmem:[#allocation5 + $0x50c] sm:$0xf]  ;;  %v7269_v45 = vor.u32 %v10263_v51, %v7266_v7  ;;  %v8277_v8 = vor.u32 %v10515_v50, %v8274_v52  ;;  %v8002_v59 = vld [vmem:[#allocation5 + $0x9d8] sm:$0xf0] }
 0x299   :  { %5786 = vmatpush.bf16.msrb.mxu0 %v7317_v35  ;;  %v5559_v35 = vpop.f32.mrf.mxu2  ;;  %v7397_v48 = vor.u32 %v10295_v16, %v7394_v21  ;;  %v10479_v60 = vld [vmem:[#allocation5 + $0xacc] sm:$0xf]  ;;  %v8258_v63 = vld [vmem:[#allocation5 + $0xbd8] sm:$0xf0] }
 0x29a   :  { %5799 = vmatpush.bf16.msrb.mxu1 %v7445_v3  ;;  %v10419_v3 = vld [vmem:[#allocation5 + $0x8ec] sm:$0xf]  ;;  %v7858_v51 = vld [vmem:[#allocation5 + $0x8b8] sm:$0xf0] }
 0x29b   :  { %5812 = vmatpush.bf16.msrb.mxu2 %v7573_v39  ;;  %v7890_v39 = vld [vmem:[#allocation5 + $0x8f8] sm:$0xf0]  ;;  %v10511_v9 = vld [vmem:[#allocation5 + $0xbcc] sm:$0xf] }
 0x29c   :  { %5825 = vmatpush.bf16.msrb.mxu3 %v7701_v46  ;;  %v8018_v46 = vld [vmem:[#allocation5 + $0x9f8] sm:$0xf0]  ;;  %v7893_v55 = vor.u32 %v10419_v3, %v7890_v39  ;;  %v10443_v7 = vld [vmem:[#allocation5 + $0x9ac] sm:$0xf] }
 0x29d   :  { %5787 = vmatpush.bf16.msrb.mxu0 %v7301_v10  ;;  %v8021_v56 = vor.u32 %v10451_v41, %v8018_v46  ;;  %v8149_v10 = vor.u32 %v10483_v47, %v8146_v12  ;;  %v10475_v16 = vld [vmem:[#allocation5 + $0xaac] sm:$0xf]  ;;  %v8114_v21 = vld [vmem:[#allocation5 + $0xab8] sm:$0xf0] }
 0x29e   :  { %5800 = vmatpush.bf16.msrb.mxu1 %v7429_v43  ;;  %v7874_v43 = vld [vmem:[#allocation5 + $0x8d8] sm:$0xf0]  ;;  %v10507_v28 = vld [vmem:[#allocation5 + $0xbac] sm:$0xf]  ;;  %v8117_v33 = vor.u32 %v10475_v16, %v8114_v21 }
 0x29f   :  { %5813 = vmatpush.bf16.msrb.mxu2 %v7557_v44  ;;  %v10447_v44 = vld [vmem:[#allocation5 + $0x9cc] sm:$0xf]  ;;  %v7877_v15 = vor.u32 %v10415_v17, %v7874_v43  ;;  %v7842_v3 = vld [vmem:[#allocation5 + $0x898] sm:$0xf0] }
 0x2a0   :  { %5826 = vmatpush.bf16.msrb.mxu3 %v7685_v62  ;;  %v8130_v62 = vld [vmem:[#allocation5 + $0xad8] sm:$0xf0]  ;;  %v8005_v53 = vor.u32 %v10447_v44, %v8002_v59  ;;  %v10407_v35 = vld [vmem:[#allocation5 + $0x88c] sm:$0xf] }
 0x2a1   :  { %5788 = vmatpush.bf16.msrb.mxu0 %v7285_v6  ;;  %v8133_v25 = vor.u32 %v10479_v60, %v8130_v62  ;;  %v10411_v6 = vld [vmem:[#allocation5 + $0x8ac] sm:$0xf]  ;;  %v7970_v41 = vld [vmem:[#allocation5 + $0x998] sm:$0xf0]  ;;  %v7845_v12 = vor.u32 %v10407_v35, %v7842_v3 }
 0x2a2   :  { %5801 = vmatpush.bf16.msrb.mxu1 %v7413_v11  ;;  %v8261_v11 = vor.u32 %v10511_v9, %v8258_v63  ;;  %v7861_v0 = vor.u32 %v10411_v6, %v7858_v51  ;;  %v10471_v4 = vld [vmem:[#allocation5 + $0xa8c] sm:$0xf]  ;;  %v8226_v47 = vld [vmem:[#allocation5 + $0xb98] sm:$0xf0] }
 0x2a3   :  { %5814 = vmatpush.bf16.msrb.mxu2 %v7541_v14  ;;  %v7986_v14 = vld [vmem:[#allocation5 + $0x9b8] sm:$0xf0]  ;;  %v10403_v50 = vld [vmem:[#allocation5 + $0x86c] sm:$0xf] }
 0x2a4   :  { %5827 = vmatpush.bf16.msrb.mxu3 %v7669_v58  ;;  %v8242_v58 = vld [vmem:[#allocation5 + $0xbb8] sm:$0xf0]  ;;  %v7989_v30 = vor.u32 %v10443_v7, %v7986_v14  ;;  %v10467_v17 = vld [vmem:[#allocation5 + $0xa6c] sm:$0xf] }
 0x2a5   :  { %5789 = vmatpush.bf16.msrb.mxu0 %v7269_v45  ;;  %v8245_v39 = vor.u32 %v10507_v28, %v8242_v58  ;;  %v8098_v45 = vld [vmem:[#allocation5 + $0xa98] sm:$0xf0]  ;;  %v5583_v46 = vpop.f32.mrf.mxu0  ;;  %v10499_v44 = vld [vmem:[#allocation5 + $0xb6c] sm:$0xf] }
 0x2a6   :  { %5802 = vmatpush.bf16.msrb.mxu1 %v7397_v48  ;;  %v7826_v52 = vld [vmem:[#allocation5 + $0x878] sm:$0xf0]  ;;  %v10399_v62 = vld [vmem:[#allocation5 + $0x84c] sm:$0xf] }
 0x2a7   :  { %5815 = vmatpush.bf16.msrb.mxu2 %v7525_v49  ;;  %v8101_v49 = vor.u32 %v10471_v4, %v8098_v45  ;;  %v8082_v43 = vld [vmem:[#allocation5 + $0xa78] sm:$0xf0]  ;;  %v7829_v59 = vor.u32 %v10403_v50, %v7826_v52  ;;  %v10431_v63 = vld [vmem:[#allocation5 + $0x94c] sm:$0xf] }
 0x2a8   :  { %5828 = vmatpush.bf16.msrb.mxu3 %v7653_v54  ;;  %5790 = vmatmul.bf16.vlgmr.msrb.gmra.mxu0 %v11295_v37  ;;  %v10503_v37 = vld [vmem:[#allocation5 + $0xb8c] sm:$0xf]  ;;  %v8085_v60 = vor.u32 %v10467_v17, %v8082_v43  ;;  %v7810_v9 = vld [vmem:[#allocation5 + $0x858] sm:$0xf0] }
 0x2a9   :  { %5834 = vmatpush.bf16.msra.mxu0 %v7893_v55  ;;  %5803 = vmatmul.bf16.vlgmr.msrb.gmra.mxu1 %v11299_v40  ;;  %v5596_v40 = vpop.f32.mrf.mxu1  ;;  %v10435_v54 = vld [vmem:[#allocation5 + $0x96c] sm:$0xf]  ;;  %v8229_v55 = vor.u32 %v10503_v37, %v8226_v47  ;;  %v8066_v51 = vld [vmem:[#allocation5 + $0xa58] sm:$0xf0]  ;;  %v7813_v28 = vor.u32 %v10399_v62, %v7810_v9 }
 0x2aa   :  { %5847 = vmatpush.bf16.msra.mxu1 %v8021_v56  ;;  %5816 = vmatmul.bf16.vlgmr.msrb.gmra.mxu2 %v11293_v34  ;;  %v10439_v34 = vld [vmem:[#allocation5 + $0x98c] sm:$0xf]  ;;  %v8194_v16 = vld [vmem:[#allocation5 + $0xb58] sm:$0xf0] }
 0x2ab   :  { %5860 = vmatpush.bf16.msra.mxu2 %v8149_v10  ;;  %5829 = vmatmul.bf16.vlgmr.msrb.gmra.mxu3 %v11297_v38  ;;  %v5584_v38 = vadd.f32 %v5583_v46, %v11445_v57  ;;  %v7973_v48 = vor.u32 %v10439_v34, %v7970_v41  ;;  %v7954_v10 = vld [vmem:[#allocation5 + $0x978] sm:$0xf0]  ;;  %v10463_v6 = vld [vmem:[#allocation5 + $0xa4c] sm:$0xf] }
 0x2ac   :  { %5873 = vmatpush.bf16.msra.mxu3 %v8277_v8  ;;  %v8210_v8 = vld [vmem:[#allocation5 + $0xb78] sm:$0xf0]  ;;  %v7957_v57 = vor.u32 %v10435_v54, %v7954_v10  ;;  %v10495_v14 = vld [vmem:[#allocation5 + $0xb4c] sm:$0xf] }
 0x2ad   :  { %5835 = vmatpush.bf16.msra.mxu0 %v7877_v15  ;;  %v5597_v56 = vadd.f32 %v5596_v40, %v5584_v38  ;;  %v8213_v15 = vor.u32 %v10499_v44, %v8210_v8  ;;  %v5585_v21 = vpop.f32.mrf.mxu0  ;;  %v10395_v35 = vld [vmem:[#allocation5 + $0x82c] sm:$0xf]  ;;  %v7794_v3 = vld [vmem:[#allocation5 + $0x838] sm:$0xf0] }
 0x2ae   :  { %5848 = vmatpush.bf16.msra.mxu1 %v8005_v53  ;;  %v5609_v53 = vpop.f32.mrf.mxu2  ;;  %v10427_v34 = vld [vmem:[#allocation5 + $0x92c] sm:$0xf]  ;;  %v7922_v41 = vld [vmem:[#allocation5 + $0x938] sm:$0xf0]  ;;  %v7797_v47 = vor.u32 %v10395_v35, %v7794_v3 }
 0x2af   :  { %5861 = vmatpush.bf16.msra.mxu2 %v8133_v25  ;;  %v7938_v25 = vld [vmem:[#allocation5 + $0x958] sm:$0xf0]  ;;  %v5610_v7 = vadd.f32 %v5609_v53, %v5597_v56  ;;  %v10459_v4 = vld [vmem:[#allocation5 + $0xa2c] sm:$0xf]  ;;  %v7925_v40 = vor.u32 %v10427_v34, %v7922_v41 }
 0x2b0   :  { %5874 = vmatpush.bf16.msra.mxu3 %v8261_v11  ;;  %v5622_v11 = vpop.f32.mrf.mxu3  ;;  %v8050_v45 = vld [vmem:[#allocation5 + $0xa38] sm:$0xf0]  ;;  %v10491_v46 = vld [vmem:[#allocation5 + $0xb2c] sm:$0xf] }
 0x2b1   :  { %5836 = vmatpush.bf16.msra.mxu0 %v7861_v0  ;;  %v5598_v58 = vpop.f32.mrf.mxu1  ;;  %v11452_v0 = vadd.f32 %v5622_v11, %v5610_v7  ;;  %v8178_v37 = vld [vmem:[#allocation5 + $0xb38] sm:$0xf0]  ;;  %v10391_v38 = vld [vmem:[#allocation5 + $0x80c] sm:$0xf] }
 0x2b2   :  { %5849 = vmatpush.bf16.msra.mxu1 %v7989_v30  ;;  %v7941_v30 = vor.u32 %v10431_v63, %v7938_v25  ;;  %v7906_v50 = vld [vmem:[#allocation5 + $0x918] sm:$0xf0]  ;;  %v10455_v52 = vld [vmem:[#allocation5 + $0xa0c] sm:$0xf]  ;;  %v8181_v54 = vor.u32 %v10491_v46, %v8178_v37 }
 0x2b3   :  { %5862 = vmatpush.bf16.msra.mxu2 %v8117_v33  ;;  %v8069_v33 = vor.u32 %v10463_v6, %v8066_v51  ;;  %v10487_v56 = vld [vmem:[#allocation5 + $0xb0c] sm:$0xf]  ;;  %v8162_v10 = vld [vmem:[#allocation5 + $0xb18] sm:$0xf0] }
 0x2b4   :  { %5875 = vmatpush.bf16.msra.mxu3 %v8245_v39  ;;  %v8197_v39 = vor.u32 %v10495_v14, %v8194_v16  ;;  %v10547_v43 = vld [vmem:[#allocation5 + $0xcec] sm:$0xf]  ;;  %v8402_v44 = vld [vmem:[#allocation5 + $0xcf8] sm:$0xf0]  ;;  %v8165_v6 = vor.u32 %v10487_v56, %v8162_v10 }
 0x2b5   :  { %5837 = vmatpush.bf16.msra.mxu0 %v7845_v12  ;;  %v7778_v12 = vld [vmem:[#allocation5 + $0x818] sm:$0xf0]  ;;  %v10579_v8 = vld [vmem:[#allocation5 + $0xdec] sm:$0xf]  ;;  %v8405_v51 = vor.u32 %v10547_v43, %v8402_v44 }
 0x2b6   :  { %5850 = vmatpush.bf16.msra.mxu1 %v7973_v48  ;;  %v8053_v48 = vor.u32 %v10459_v4, %v8050_v45  ;;  %v5611_v17 = vpop.f32.mrf.mxu2  ;;  %v10611_v62 = vld [vmem:[#allocation5 + $0xeec] sm:$0xf]  ;;  %v8658_v9 = vld [vmem:[#allocation5 + $0xef8] sm:$0xf0] }
 0x2b7   :  { %5863 = vmatpush.bf16.msra.mxu2 %v8101_v49  ;;  %v10423_v49 = vld [vmem:[#allocation5 + $0x90c] sm:$0xf]  ;;  %v8786_v25 = vld [vmem:[#allocation5 + $0xff8] sm:$0xf0]  ;;  %v8661_v11 = vor.u32 %v10611_v62, %v8658_v9 }
 0x2b8   :  { %5876 = vmatpush.bf16.msra.mxu3 %v8229_v55  ;;  %v8034_v55 = vld [vmem:[#allocation5 + $0xa18] sm:$0xf0]  ;;  %v7909_v63 = vor.u32 %v10423_v49, %v7906_v50  ;;  %v10643_v53 = vld [vmem:[#allocation5 + $0xfec] sm:$0xf] }
 0x2b9   :  { %5838 = vmatpush.bf16.msra.mxu0 %v7829_v59  ;;  %v5624_v59 = vpop.f32.mrf.mxu3  ;;  %v10543_v14 = vld [vmem:[#allocation5 + $0xccc] sm:$0xf]  ;;  %v8386_v16 = vld [vmem:[#allocation5 + $0xcd8] sm:$0xf0] }
 0x2ba   :  { %5851 = vmatpush.bf16.msra.mxu1 %v7957_v57  ;;  %v7781_v57 = vor.u32 %v10391_v38, %v7778_v12  ;;  %v10575_v21 = vld [vmem:[#allocation5 + $0xdcc] sm:$0xf]  ;;  %v8514_v58 = vld [vmem:[#allocation5 + $0xdd8] sm:$0xf0]  ;;  %v8389_v34 = vor.u32 %v10543_v14, %v8386_v16 }
 0x2bb   :  { %5864 = vmatpush.bf16.msra.mxu2 %v8085_v60  ;;  %v8530_v60 = vld [vmem:[#allocation5 + $0xdf8] sm:$0xf0]  ;;  %v10639_v35 = vld [vmem:[#allocation5 + $0xfcc] sm:$0xf] }
 0x2bc   :  { %5877 = vmatpush.bf16.msra.mxu3 %v8213_v15  ;;  %v8037_v15 = vor.u32 %v10455_v52, %v8034_v55  ;;  %v8533_v7 = vor.u32 %v10579_v8, %v8530_v60  ;;  %v8770_v3 = vld [vmem:[#allocation5 + $0xfd8] sm:$0xf0]  ;;  %v10539_v4 = vld [vmem:[#allocation5 + $0xcac] sm:$0xf] }
 0x2bd   :  { %5839 = vmatpush.bf16.msra.mxu0 %v7813_v28  ;;  %v8789_v28 = vor.u32 %v10643_v53, %v8786_v25  ;;  %v8370_v45 = vld [vmem:[#allocation5 + $0xcb8] sm:$0xf0]  ;;  %v10571_v46 = vld [vmem:[#allocation5 + $0xdac] sm:$0xf]  ;;  %v8773_v37 = vor.u32 %v10639_v35, %v8770_v3 }
 0x2be   :  { %5852 = vmatpush.bf16.msra.mxu1 %v7941_v30  ;;  %v10607_v30 = vld [vmem:[#allocation5 + $0xecc] sm:$0xf]  ;;  %v8626_v12 = vld [vmem:[#allocation5 + $0xeb8] sm:$0xf0]  ;;  %v8373_v49 = vor.u32 %v10539_v4, %v8370_v45 }
 0x2bf   :  { %5865 = vmatpush.bf16.msra.mxu2 %v8069_v33  ;;  %v8642_v33 = vld [vmem:[#allocation5 + $0xed8] sm:$0xf0]  ;;  %v10603_v38 = vld [vmem:[#allocation5 + $0xeac] sm:$0xf] }
 0x2c0   :  { %5878 = vmatpush.bf16.msra.mxu3 %v8197_v39  ;;  %v8517_v39 = vor.u32 %v10575_v21, %v8514_v58  ;;  %v8645_v41 = vor.u32 %v10607_v30, %v8642_v33  ;;  %v8629_v52 = vor.u32 %v10603_v38, %v8626_v12  ;;  %v10567_v55 = vld [vmem:[#allocation5 + $0xd8c] sm:$0xf]  ;;  %v8482_v10 = vld [vmem:[#allocation5 + $0xd98] sm:$0xf0] }
 0x2c1   :  { %5840 = vmatpush.bf16.msra.mxu0 %v7797_v47  ;;  %v8498_v47 = vld [vmem:[#allocation5 + $0xdb8] sm:$0xf0]  ;;  %v10599_v17 = vld [vmem:[#allocation5 + $0xe8c] sm:$0xf] }
 0x2c2   :  { %5853 = vmatpush.bf16.msra.mxu1 %v7925_v40  ;;  %v10635_v40 = vld [vmem:[#allocation5 + $0xfac] sm:$0xf]  ;;  %v8501_v50 = vor.u32 %v10571_v46, %v8498_v47  ;;  %v8738_v44 = vld [vmem:[#allocation5 + $0xf98] sm:$0xf0] }
 0x2c3   :  { %5866 = vmatpush.bf16.msra.mxu2 %v8053_v48  ;;  %v8754_v48 = vld [vmem:[#allocation5 + $0xfb8] sm:$0xf0]  ;;  %v10531_v62 = vld [vmem:[#allocation5 + $0xc6c] sm:$0xf] }
 0x2c4   :  { %5879 = vmatpush.bf16.msra.mxu3 %v8181_v54  ;;  %v10535_v54 = vld [vmem:[#allocation5 + $0xc8c] sm:$0xf]  ;;  %v8757_v56 = vor.u32 %v10635_v40, %v8754_v48  ;;  %v8338_v9 = vld [vmem:[#allocation5 + $0xc78] sm:$0xf0] }
 0x2c5   :  { %5841 = vmatpush.bf16.msra.mxu0 %v7781_v57  ;;  %v5635_v43 = vpop.f32.mrf.mxu0  ;;  %v8485_v57 = vor.u32 %v10567_v55, %v8482_v10  ;;  %v8466_v25 = vld [vmem:[#allocation5 + $0xd78] sm:$0xf0]  ;;  %v8341_v14 = vor.u32 %v10531_v62, %v8338_v9  ;;  %v10527_v21 = vld [vmem:[#allocation5 + $0xc4c] sm:$0xf] }
 0x2c6   :  { %5854 = vmatpush.bf16.msra.mxu1 %v7909_v63  ;;  %v5648_v59 = vpop.f32.mrf.mxu1  ;;  %v10563_v63 = vld [vmem:[#allocation5 + $0xd6c] sm:$0xf]  ;;  %v8450_v35 = vld [vmem:[#allocation5 + $0xd58] sm:$0xf0] }
 0x2c7   :  { %5867 = vmatpush.bf16.msra.mxu2 %v8037_v15  ;;  %v10559_v58 = vld [vmem:[#allocation5 + $0xd4c] sm:$0xf]  ;;  %v8706_v45 = vld [vmem:[#allocation5 + $0xf58] sm:$0xf0] }
 0x2c8   :  { %5880 = vmatpush.bf16.msra.mxu3 %v8165_v6  ;;  %5842 = vmatmul.bf16.vlgmr.msra.gmra.mxu0 %v11305_v18  ;;  %v8354_v18 = vld [vmem:[#allocation5 + $0xc98] sm:$0xf0]  ;;  %v10595_v6 = vld [vmem:[#allocation5 + $0xe6c] sm:$0xf]  ;;  %v8453_v12 = vor.u32 %v10559_v58, %v8450_v35 }
 0x2c9   :  { %5886 = vmatpush.bf16.msrb.mxu0 %v8405_v51  ;;  %5855 = vmatmul.bf16.vlgmr.msra.gmra.mxu1 %v11309_v23  ;;  %v10631_v23 = vld [vmem:[#allocation5 + $0xf8c] sm:$0xf]  ;;  %v8357_v8 = vor.u32 %v10535_v54, %v8354_v18  ;;  %v8594_v51 = vld [vmem:[#allocation5 + $0xe78] sm:$0xf0] }
 0x2ca   :  { %5899 = vmatpush.bf16.msrb.mxu1 %v8533_v7  ;;  %5868 = vmatmul.bf16.vlgmr.msra.gmra.mxu2 %v11307_v22  ;;  %v8610_v22 = vld [vmem:[#allocation5 + $0xe98] sm:$0xf0]  ;;  %v8741_v15 = vor.u32 %v10631_v23, %v8738_v44  ;;  %v10627_v7 = vld [vmem:[#allocation5 + $0xf6c] sm:$0xf]  ;;  %v8597_v16 = vor.u32 %v10595_v6, %v8594_v51 }
 0x2cb   :  { %5912 = vmatpush.bf16.msrb.mxu2 %v8661_v11  ;;  %5881 = vmatmul.bf16.vlgmr.msra.gmra.mxu3 %v11311_v27  ;;  %v5636_v27 = vadd.f32 %v5635_v43, %v11452_v0  ;;  %v8613_v60 = vor.u32 %v10599_v17, %v8610_v22  ;;  %v8722_v11 = vld [vmem:[#allocation5 + $0xf78] sm:$0xf0]  ;;  %v8469_v0 = vor.u32 %v10563_v63, %v8466_v25  ;;  %v10591_v3 = vld [vmem:[#allocation5 + $0xe4c] sm:$0xf] }
 0x2cc   :  { %5925 = vmatpush.bf16.msrb.mxu3 %v8789_v28  ;;  %v8322_v28 = vld [vmem:[#allocation5 + $0xc58] sm:$0xf0]  ;;  %v8725_v30 = vor.u32 %v10627_v7, %v8722_v11  ;;  %v10623_v4 = vld [vmem:[#allocation5 + $0xf4c] sm:$0xf] }
 0x2cd   :  { %5887 = vmatpush.bf16.msrb.mxu0 %v8389_v34  ;;  %v5649_v53 = vadd.f32 %v5648_v59, %v5636_v27  ;;  %v5661_v33 = vpop.f32.mrf.mxu2  ;;  %v8578_v34 = vld [vmem:[#allocation5 + $0xe58] sm:$0xf0]  ;;  %v5637_v46 = vpop.f32.mrf.mxu0  ;;  %v10523_v48 = vld [vmem:[#allocation5 + $0xc2c] sm:$0xf] }
 0x2ce   :  { %5900 = vmatpush.bf16.msrb.mxu1 %v8517_v39  ;;  %v5650_v47 = vpop.f32.mrf.mxu1  ;;  %v8581_v40 = vor.u32 %v10591_v3, %v8578_v34  ;;  %v8434_v54 = vld [vmem:[#allocation5 + $0xd38] sm:$0xf0]  ;;  %v10587_v18 = vld [vmem:[#allocation5 + $0xe2c] sm:$0xf] }
 0x2cf   :  { %5913 = vmatpush.bf16.msrb.mxu2 %v8645_v41  ;;  %v5662_v39 = vadd.f32 %v5661_v33, %v5649_v53  ;;  %v5674_v41 = vpop.f32.mrf.mxu3  ;;  %v8562_v55 = vld [vmem:[#allocation5 + $0xe38] sm:$0xf0]  ;;  %v10519_v22 = vld [vmem:[#allocation5 + $0xc0c] sm:$0xf] }
 0x2d0   :  { %5926 = vmatpush.bf16.msrb.mxu3 %v8773_v37  ;;  %v8325_v37 = vor.u32 %v10527_v21, %v8322_v28  ;;  %v8690_v10 = vld [vmem:[#allocation5 + $0xf38] sm:$0xf0]  ;;  %v8565_v44 = vor.u32 %v10587_v18, %v8562_v55  ;;  %v10551_v27 = vld [vmem:[#allocation5 + $0xd0c] sm:$0xf] }
 0x2d1   :  { %5888 = vmatpush.bf16.msrb.mxu0 %v8373_v49  ;;  %v11459_v38 = vadd.f32 %v5674_v41, %v5662_v39  ;;  %v8306_v49 = vld [vmem:[#allocation5 + $0xc38] sm:$0xf0]  ;;  %v10583_v59 = vld [vmem:[#allocation5 + $0xe0c] sm:$0xf] }
 0x2d2   :  { %5901 = vmatpush.bf16.msrb.mxu1 %v8501_v50  ;;  %v10555_v50 = vld [vmem:[#allocation5 + $0xd2c] sm:$0xf]  ;;  %v8309_v17 = vor.u32 %v10523_v48, %v8306_v49  ;;  %v8290_v43 = vld [vmem:[#allocation5 + $0xc18] sm:$0xf0] }
 0x2d3   :  { %5914 = vmatpush.bf16.msrb.mxu2 %v8629_v52  ;;  %v8709_v52 = vor.u32 %v10623_v4, %v8706_v45  ;;  %v8437_v23 = vor.u32 %v10555_v50, %v8434_v54  ;;  %v10615_v62 = vld [vmem:[#allocation5 + $0xf0c] sm:$0xf]  ;;  %v8674_v9 = vld [vmem:[#allocation5 + $0xf18] sm:$0xf0]  ;;  %v8293_v51 = vor.u32 %v10519_v22, %v8290_v43 }
 0x2d4   :  { %5927 = vmatpush.bf16.msrb.mxu3 %v8757_v56  ;;  %v10619_v56 = vld [vmem:[#allocation5 + $0xf2c] sm:$0xf]  ;;  %v8914_v53 = vld [vmem:[#allocation5 + $0x10f8] sm:$0xf0]  ;;  %v8677_v58 = vor.u32 %v10615_v62, %v8674_v9 }
 0x2d5   :  { %5889 = vmatpush.bf16.msrb.mxu0 %v8357_v8  ;;  %v8418_v8 = vld [vmem:[#allocation5 + $0xd18] sm:$0xf0]  ;;  %v5663_v63 = vpop.f32.mrf.mxu2  ;;  %v10707_v25 = vld [vmem:[#allocation5 + $0x11ec] sm:$0xf] }
 0x2d6   :  { %5902 = vmatpush.bf16.msrb.mxu1 %v8485_v57  ;;  %v8693_v57 = vor.u32 %v10619_v56, %v8690_v10  ;;  %v9042_v7 = vld [vmem:[#allocation5 + $0x11f8] sm:$0xf0]  ;;  %v10739_v11 = vld [vmem:[#allocation5 + $0x12ec] sm:$0xf] }
 0x2d7   :  { %5915 = vmatpush.bf16.msrb.mxu2 %v8613_v60  ;;  %v8546_v60 = vld [vmem:[#allocation5 + $0xe18] sm:$0xf0]  ;;  %v5676_v6 = vpop.f32.mrf.mxu3  ;;  %v10771_v21 = vld [vmem:[#allocation5 + $0x13ec] sm:$0xf]  ;;  %v9045_v33 = vor.u32 %v10707_v25, %v9042_v7 }
 0x2d8   :  { %5928 = vmatpush.bf16.msrb.mxu3 %v8741_v15  ;;  %v10675_v15 = vld [vmem:[#allocation5 + $0x10ec] sm:$0xf]  ;;  %v9298_v28 = vld [vmem:[#allocation5 + $0x13f8] sm:$0xf0] }
 0x2d9   :  { %5890 = vmatpush.bf16.msrb.mxu0 %v8341_v14  ;;  %v9170_v14 = vld [vmem:[#allocation5 + $0x12f8] sm:$0xf0]  ;;  %v10671_v3 = vld [vmem:[#allocation5 + $0x10cc] sm:$0xf]  ;;  %v9301_v41 = vor.u32 %v10771_v21, %v9298_v28 }
 0x2da   :  { %5903 = vmatpush.bf16.msrb.mxu1 %v8469_v0  ;;  %v8421_v0 = vor.u32 %v10551_v27, %v8418_v8  ;;  %v9173_v35 = vor.u32 %v10739_v11, %v9170_v14  ;;  %v8898_v34 = vld [vmem:[#allocation5 + $0x10d8] sm:$0xf0]  ;;  %v10703_v39 = vld [vmem:[#allocation5 + $0x11cc] sm:$0xf] }
 0x2db   :  { %5916 = vmatpush.bf16.msrb.mxu2 %v8597_v16  ;;  %v8549_v16 = vor.u32 %v10583_v59, %v8546_v60  ;;  %v9026_v4 = vld [vmem:[#allocation5 + $0x11d8] sm:$0xf0]  ;;  %v10735_v45 = vld [vmem:[#allocation5 + $0x12cc] sm:$0xf] }
 0x2dc   :  { %5929 = vmatpush.bf16.msrb.mxu3 %v8725_v30  ;;  %v8917_v30 = vor.u32 %v10675_v15, %v8914_v53  ;;  %v9154_v46 = vld [vmem:[#allocation5 + $0x12d8] sm:$0xf0]  ;;  %v10667_v49 = vld [vmem:[#allocation5 + $0x10ac] sm:$0xf] }
 0x2dd   :  { %5891 = vmatpush.bf16.msrb.mxu0 %v8325_v37  ;;  %v10767_v37 = vld [vmem:[#allocation5 + $0x13cc] sm:$0xf]  ;;  %v9282_v47 = vld [vmem:[#allocation5 + $0x13d8] sm:$0xf0]  ;;  %v9157_v48 = vor.u32 %v10735_v45, %v9154_v46 }
 0x2de   :  { %5904 = vmatpush.bf16.msrb.mxu1 %v8453_v12  ;;  %v8901_v12 = vor.u32 %v10671_v3, %v8898_v34  ;;  %v8882_v50 = vld [vmem:[#allocation5 + $0x10b8] sm:$0xf0]  ;;  %v9285_v54 = vor.u32 %v10767_v37, %v9282_v47  ;;  %v10731_v55 = vld [vmem:[#allocation5 + $0x12ac] sm:$0xf] }
 0x2df   :  { %5917 = vmatpush.bf16.msrb.mxu2 %v8581_v40  ;;  %v9029_v40 = vor.u32 %v10703_v39, %v9026_v4  ;;  %v9010_v18 = vld [vmem:[#allocation5 + $0x11b8] sm:$0xf0]  ;;  %v10763_v10 = vld [vmem:[#allocation5 + $0x13ac] sm:$0xf]  ;;  %v8885_v22 = vor.u32 %v10667_v49, %v8882_v50 }
 0x2e0   :  { %5930 = vmatpush.bf16.msrb.mxu3 %v8709_v52  ;;  %v10699_v52 = vld [vmem:[#allocation5 + $0x11ac] sm:$0xf]  ;;  %v9138_v56 = vld [vmem:[#allocation5 + $0x12b8] sm:$0xf0] }
 0x2e1   :  { %5892 = vmatpush.bf16.msrb.mxu0 %v8309_v17  ;;  %v9266_v17 = vld [vmem:[#allocation5 + $0x13b8] sm:$0xf0]  ;;  %v9013_v43 = vor.u32 %v10699_v52, %v9010_v18  ;;  %v10695_v27 = vld [vmem:[#allocation5 + $0x118c] sm:$0xf] }
 0x2e2   :  { %5905 = vmatpush.bf16.msrb.mxu1 %v8437_v23  ;;  %v9141_v23 = vor.u32 %v10731_v55, %v9138_v56  ;;  %v9269_v8 = vor.u32 %v10763_v10, %v9266_v17  ;;  %v8994_v59 = vld [vmem:[#allocation5 + $0x1198] sm:$0xf0]  ;;  %v10659_v25 = vld [vmem:[#allocation5 + $0x106c] sm:$0xf] }
 0x2e3   :  { %5918 = vmatpush.bf16.msrb.mxu2 %v8565_v44  ;;  %v10663_v44 = vld [vmem:[#allocation5 + $0x108c] sm:$0xf]  ;;  %v9250_v62 = vld [vmem:[#allocation5 + $0x1398] sm:$0xf0]  ;;  %v8997_v15 = vor.u32 %v10695_v27, %v8994_v59 }
 0x2e4   :  { %5931 = vmatpush.bf16.msrb.mxu3 %v8693_v57  ;;  %v10727_v57 = vld [vmem:[#allocation5 + $0x128c] sm:$0xf]  ;;  %v8850_v6 = vld [vmem:[#allocation5 + $0x1078] sm:$0xf0] }
 0x2e5   :  { %5893 = vmatpush.bf16.msrb.mxu0 %v8293_v51  ;;  %v5687_v60 = vpop.f32.mrf.mxu0  ;;  %v10691_v51 = vld [vmem:[#allocation5 + $0x116c] sm:$0xf]  ;;  %v8978_v14 = vld [vmem:[#allocation5 + $0x1178] sm:$0xf0] }
 0x2e6   :  { %5906 = vmatpush.bf16.msrb.mxu1 %v8421_v0  ;;  %v5700_v63 = vpop.f32.mrf.mxu1  ;;  %v10723_v0 = vld [vmem:[#allocation5 + $0x126c] sm:$0xf]  ;;  %v9234_v28 = vld [vmem:[#allocation5 + $0x1378] sm:$0xf0] }
 0x2e7   :  { %5919 = vmatpush.bf16.msrb.mxu2 %v8549_v16  ;;  %v9106_v16 = vld [vmem:[#allocation5 + $0x1278] sm:$0xf0]  ;;  %v10755_v21 = vld [vmem:[#allocation5 + $0x136c] sm:$0xf] }
 0x2e8   :  { %5932 = vmatpush.bf16.msrb.mxu3 %v8677_v58  ;;  %5894 = vmatmul.bf16.vlgmr.msrb.gmra.mxu0 %v11317_v13  ;;  %v8866_v13 = vld [vmem:[#allocation5 + $0x1098] sm:$0xf0]  ;;  %v8853_v58 = vor.u32 %v10659_v25, %v8850_v6  ;;  %v10687_v3 = vld [vmem:[#allocation5 + $0x114c] sm:$0xf]  ;;  %v9237_v34 = vor.u32 %v10755_v21, %v9234_v28 }
 0x2e9   :  { %5938 = vmatpush.bf16.msra.mxu0 %v8917_v30  ;;  %5907 = vmatmul.bf16.vlgmr.msrb.gmra.mxu1 %v11321_v20  ;;  %v10759_v20 = vld [vmem:[#allocation5 + $0x138c] sm:$0xf]  ;;  %v8869_v9 = vor.u32 %v10663_v44, %v8866_v13  ;;  %v9109_v30 = vor.u32 %v10723_v0, %v9106_v16  ;;  %v9090_v45 = vld [vmem:[#allocation5 + $0x1258] sm:$0xf0] }
 0x2ea   :  { %5951 = vmatpush.bf16.msra.mxu1 %v9045_v33  ;;  %5920 = vmatmul.bf16.vlgmr.msrb.gmra.mxu2 %v11319_v19  ;;  %v9122_v19 = vld [vmem:[#allocation5 + $0x1298] sm:$0xf0]  ;;  %v9253_v7 = vor.u32 %v10759_v20, %v9250_v62  ;;  %v10655_v33 = vld [vmem:[#allocation5 + $0x104c] sm:$0xf] }
 0x2eb   :  { %5964 = vmatpush.bf16.msra.mxu2 %v9173_v35  ;;  %5933 = vmatmul.bf16.vlgmr.msrb.gmra.mxu3 %v11323_v26  ;;  %v5688_v26 = vadd.f32 %v5687_v60, %v11459_v38  ;;  %v9125_v53 = vor.u32 %v10727_v57, %v9122_v19  ;;  %v8981_v38 = vor.u32 %v10691_v51, %v8978_v14  ;;  %v8834_v35 = vld [vmem:[#allocation5 + $0x1058] sm:$0xf0]  ;;  %v10719_v4 = vld [vmem:[#allocation5 + $0x124c] sm:$0xf] }
 0x2ec   :  { %5977 = vmatpush.bf16.msra.mxu3 %v9301_v41  ;;  %v8962_v41 = vld [vmem:[#allocation5 + $0x1158] sm:$0xf0]  ;;  %v10751_v47 = vld [vmem:[#allocation5 + $0x134c] sm:$0xf] }
 0x2ed   :  { %5939 = vmatpush.bf16.msra.mxu0 %v8901_v12  ;;  %v5701_v11 = vadd.f32 %v5700_v63, %v5688_v26  ;;  %v5713_v39 = vpop.f32.mrf.mxu2  ;;  %v9218_v12 = vld [vmem:[#allocation5 + $0x1358] sm:$0xf0]  ;;  %v8965_v52 = vor.u32 %v10687_v3, %v8962_v41  ;;  %v10651_v18 = vld [vmem:[#allocation5 + $0x102c] sm:$0xf] }
 0x2ee   :  { %5952 = vmatpush.bf16.msra.mxu1 %v9029_v40  ;;  %v5726_v37 = vpop.f32.mrf.mxu3  ;;  %v5689_v40 = vpop.f32.mrf.mxu0  ;;  %v8818_v55 = vld [vmem:[#allocation5 + $0x1038] sm:$0xf0]  ;;  %v10683_v56 = vld [vmem:[#allocation5 + $0x112c] sm:$0xf]  ;;  %v9221_v10 = vor.u32 %v10751_v47, %v9218_v12 }
 0x2ef   :  { %5965 = vmatpush.bf16.msra.mxu2 %v9157_v48  ;;  %v5714_v46 = vadd.f32 %v5713_v39, %v5701_v11  ;;  %v8837_v48 = vor.u32 %v10655_v33, %v8834_v35  ;;  %v5702_v49 = vpop.f32.mrf.mxu1  ;;  %v8946_v17 = vld [vmem:[#allocation5 + $0x1138] sm:$0xf0]  ;;  %v8821_v13 = vor.u32 %v10651_v18, %v8818_v55  ;;  %v10647_v27 = vld [vmem:[#allocation5 + $0x100c] sm:$0xf] }
 0x2f0   :  { %5978 = vmatpush.bf16.msra.mxu3 %v9285_v54  ;;  %v9093_v54 = vor.u32 %v10719_v4, %v9090_v45  ;;  %v9202_v44 = vld [vmem:[#allocation5 + $0x1338] sm:$0xf0]  ;;  %v8949_v59 = vor.u32 %v10683_v56, %v8946_v17  ;;  %v10679_v19 = vld [vmem:[#allocation5 + $0x110c] sm:$0xf] }
 0x2f1   :  { %5940 = vmatpush.bf16.msra.mxu0 %v8885_v22  ;;  %v11466_v50 = vadd.f32 %v5726_v37, %v5714_v46  ;;  %v10715_v22 = vld [vmem:[#allocation5 + $0x122c] sm:$0xf]  ;;  %v8930_v60 = vld [vmem:[#allocation5 + $0x1118] sm:$0xf0] }
 0x2f2   :  { %5953 = vmatpush.bf16.msra.mxu1 %v9013_v43  ;;  %v9074_v43 = vld [vmem:[#allocation5 + $0x1238] sm:$0xf0]  ;;  %v10711_v20 = vld [vmem:[#allocation5 + $0x120c] sm:$0xf]  ;;  %v8933_v16 = vor.u32 %v10679_v19, %v8930_v60 }
 0x2f3   :  { %5966 = vmatpush.bf16.msra.mxu2 %v9141_v23  ;;  %v10747_v23 = vld [vmem:[#allocation5 + $0x132c] sm:$0xf]  ;;  %v9077_v57 = vor.u32 %v10715_v22, %v9074_v43  ;;  %v9058_v26 = vld [vmem:[#allocation5 + $0x1218] sm:$0xf0] }
 0x2f4   :  { %5979 = vmatpush.bf16.msra.mxu3 %v9269_v8  ;;  %v8802_v8 = vld [vmem:[#allocation5 + $0x1018] sm:$0xf0]  ;;  %v9205_v62 = vor.u32 %v10747_v23, %v9202_v44  ;;  %v10835_v6 = vld [vmem:[#allocation5 + $0x15ec] sm:$0xf]  ;;  %v9061_v21 = vor.u32 %v10711_v20, %v9058_v26 }
 0x2f5   :  { %5941 = vmatpush.bf16.msra.mxu0 %v8869_v9  ;;  %v10743_v9 = vld [vmem:[#allocation5 + $0x130c] sm:$0xf]  ;;  %v9186_v63 = vld [vmem:[#allocation5 + $0x1318] sm:$0xf0] }
 0x2f6   :  { %5954 = vmatpush.bf16.msra.mxu1 %v8997_v15  ;;  %v5715_v15 = vpop.f32.mrf.mxu2  ;;  %v9426_v25 = vld [vmem:[#allocation5 + $0x14f8] sm:$0xf0]  ;;  %v5728_v51 = vpop.f32.mrf.mxu3  ;;  %v10867_v14 = vld [vmem:[#allocation5 + $0x16ec] sm:$0xf] }
 0x2f7   :  { %5967 = vmatpush.bf16.msra.mxu2 %v9125_v53  ;;  %v10803_v53 = vld [vmem:[#allocation5 + $0x14ec] sm:$0xf]  ;;  %v9554_v11 = vld [vmem:[#allocation5 + $0x15f8] sm:$0xf0] }
 0x2f8   :  { %5980 = vmatpush.bf16.msra.mxu3 %v9253_v7  ;;  %v8805_v7 = vor.u32 %v10647_v27, %v8802_v8  ;;  %v9682_v0 = vld [vmem:[#allocation5 + $0x16f8] sm:$0xf0]  ;;  %v10899_v28 = vld [vmem:[#allocation5 + $0x17ec] sm:$0xf]  ;;  %v9557_v33 = vor.u32 %v10835_v6, %v9554_v11  ;;  %v11003_v8 = vld [vmem:[#allocation7] sm:$0xf] }
 0x2f9   :  { %5942 = vmatpush.bf16.msra.mxu0 %v8853_v58  ;;  %v9810_v58 = vld [vmem:[#allocation5 + $0x17f8] sm:$0xf0]  ;;  %v9685_v35 = vor.u32 %v10867_v14, %v9682_v0  ;;  %v10799_v3 = vld [vmem:[#allocation5 + $0x14cc] sm:$0xf] }
 0x2fa   :  { %5955 = vmatpush.bf16.msra.mxu1 %v8981_v38  ;;  %v9189_v38 = vor.u32 %v10743_v9, %v9186_v63  ;;  %v10831_v39 = vld [vmem:[#allocation5 + $0x15cc] sm:$0xf]  ;;  %v9813_v41 = vor.u32 %v10899_v28, %v9810_v58  ;;  %v9538_v4 = vld [vmem:[#allocation5 + $0x15d8] sm:$0xf0] }
 0x2fb   :  { %5968 = vmatpush.bf16.msra.mxu2 %v9109_v30  ;;  %v9429_v30 = vor.u32 %v10803_v53, %v9426_v25  ;;  %v10863_v45 = vld [vmem:[#allocation5 + $0x16cc] sm:$0xf]  ;;  %v9666_v46 = vld [vmem:[#allocation5 + $0x16d8] sm:$0xf0]  ;;  %v9541_v40 = vor.u32 %v10831_v39, %v9538_v4 }
 0x2fc   :  { %5981 = vmatpush.bf16.msra.mxu3 %v9237_v34  ;;  %v9410_v34 = vld [vmem:[#allocation5 + $0x14d8] sm:$0xf0]  ;;  %v10895_v37 = vld [vmem:[#allocation5 + $0x17cc] sm:$0xf] }
 0x2fd   :  { %5943 = vmatpush.bf16.msra.mxu0 %v8837_v48  ;;  %v9794_v47 = vld [vmem:[#allocation5 + $0x17d8] sm:$0xf0]  ;;  %v9413_v12 = vor.u32 %v10799_v3, %v9410_v34  ;;  %v9669_v48 = vor.u32 %v10863_v45, %v9666_v46  ;;  %v10795_v49 = vld [vmem:[#allocation5 + $0x14ac] sm:$0xf] }
 0x2fe   :  { %5956 = vmatpush.bf16.msra.mxu1 %v8965_v52  ;;  %v9394_v52 = vld [vmem:[#allocation5 + $0x14b8] sm:$0xf0]  ;;  %v9797_v18 = vor.u32 %v10895_v37, %v9794_v47  ;;  %v10859_v56 = vld [vmem:[#allocation5 + $0x16ac] sm:$0xf] }
 0x2ff   :  { %5969 = vmatpush.bf16.msra.mxu2 %v9093_v54  ;;  %v10827_v54 = vld [vmem:[#allocation5 + $0x15ac] sm:$0xf]  ;;  %v9522_v55 = vld [vmem:[#allocation5 + $0x15b8] sm:$0xf0]  ;;  %v9397_v43 = vor.u32 %v10795_v49, %v9394_v52 }
 0x300   :  { %5982 = vmatpush.bf16.msra.mxu3 %v9221_v10  ;;  %v9650_v10 = vld [vmem:[#allocation5 + $0x16b8] sm:$0xf0]  ;;  %v10891_v17 = vld [vmem:[#allocation5 + $0x17ac] sm:$0xf]  ;;  %v9525_v44 = vor.u32 %v10827_v54, %v9522_v55 }
 0x301   :  { %5944 = vmatpush.bf16.msra.mxu0 %v8821_v13  ;;  %v9778_v22 = vld [vmem:[#allocation5 + $0x17b8] sm:$0xf0]  ;;  %v10791_v23 = vld [vmem:[#allocation5 + $0x148c] sm:$0xf]  ;;  %v9653_v13 = vor.u32 %v10859_v56, %v9650_v10 }
 0x302   :  { %5957 = vmatpush.bf16.msra.mxu1 %v8949_v59  ;;  %v10823_v27 = vld [vmem:[#allocation5 + $0x158c] sm:$0xf]  ;;  %v949_v59 = vperm.slane %v11003_v8, 3  ;;  %v9762_v20 = vld [vmem:[#allocation5 + $0x1798] sm:$0xf0] }
 0x303   :  { %5970 = vmatpush.bf16.msra.mxu2 %v9077_v57  ;;  %v9781_v57 = vor.u32 %v10891_v17, %v9778_v22  ;;  %v10855_v19 = vld [vmem:[#allocation5 + $0x168c] sm:$0xf]  ;;  %v9362_v15 = vld [vmem:[#allocation5 + $0x1478] sm:$0xf0] }
 0x304   :  { %5983 = vmatpush.bf16.msra.mxu3 %v9205_v62  ;;  %v10887_v60 = vld [vmem:[#allocation5 + $0x178c] sm:$0xf]  ;;  %v9618_v14 = vld [vmem:[#allocation5 + $0x1678] sm:$0xf0] }
 0x305   :  { %5945 = vmatpush.bf16.msra.mxu0 %v8805_v7  ;;  %v5739_v62 = vpop.f32.mrf.mxu0  ;;  %v10787_v63 = vld [vmem:[#allocation5 + $0x146c] sm:$0xf]  ;;  %v9765_v51 = vor.u32 %v10887_v60, %v9762_v20  ;;  %v9490_v7 = vld [vmem:[#allocation5 + $0x1578] sm:$0xf0] }
 0x306   :  { %5958 = vmatpush.bf16.msra.mxu1 %v8933_v16  ;;  %v10819_v53 = vld [vmem:[#allocation5 + $0x156c] sm:$0xf]  ;;  %v5740_v25 = vadd.f32 %v5739_v62, %v949_v59  ;;  %v5752_v6 = vpop.f32.mrf.mxu1  ;;  %v9746_v16 = vld [vmem:[#allocation5 + $0x1778] sm:$0xf0]  ;;  %v9365_v28 = vor.u32 %v10787_v63, %v9362_v15  ;;  %v9936_v15 = vld [vmem:[#allocation8 + $0xf0] sm:$0xf] }
 0x307   :  { %5971 = vmatpush.bf16.msra.mxu2 %v9061_v21  ;;  %v10851_v11 = vld [vmem:[#allocation5 + $0x166c] sm:$0xf]  ;;  %v9493_v58 = vor.u32 %v10819_v53, %v9490_v7  ;;  %v9474_v39 = vld [vmem:[#allocation5 + $0x1558] sm:$0xf0] }
 0x308   :  { %5984 = vmatpush.bf16.msra.mxu3 %v9189_v38  ;;  %5946 = vmatmul.bf16.vlgmr.msra.gmra.mxu0 %v11329_v24  ;;  %v9378_v24 = vld [vmem:[#allocation5 + $0x1498] sm:$0xf0]  ;;  %v10883_v0 = vld [vmem:[#allocation5 + $0x176c] sm:$0xf]  ;;  %v5753_v21 = vadd.f32 %v5752_v6, %v5740_v25  ;;  %v9621_v38 = vor.u32 %v10851_v11, %v9618_v14  ;;  %v10000_v6 = vld [vmem:[#allocation8 + $0x170] sm:$0xf] }
 0x309   :  { %5990 = vmatpush.bf16.msrb.mxu0 %v9429_v30  ;;  %5959 = vmatmul.bf16.vlgmr.msra.gmra.mxu1 %v11333_v32  ;;  %v9634_v32 = vld [vmem:[#allocation5 + $0x1698] sm:$0xf0]  ;;  %v10783_v30 = vld [vmem:[#allocation5 + $0x144c] sm:$0xf]  ;;  %v9749_v34 = vor.u32 %v10883_v0, %v9746_v16 }
 0x30a   :  { %6003 = vmatpush.bf16.msrb.mxu1 %v9557_v33  ;;  %5972 = vmatmul.bf16.vlgmr.msra.gmra.mxu2 %v11331_v31  ;;  %v9506_v31 = vld [vmem:[#allocation5 + $0x1598] sm:$0xf0]  ;;  %v9637_v9 = vor.u32 %v10855_v19, %v9634_v32  ;;  %v10879_v37 = vld [vmem:[#allocation5 + $0x174c] sm:$0xf] }
 0x30b   :  { %6016 = vmatpush.bf16.msrb.mxu2 %v9685_v35  ;;  %5985 = vmatmul.bf16.vlgmr.msra.gmra.mxu3 %v11335_v36  ;;  %v9381_v36 = vor.u32 %v10791_v23, %v9378_v24  ;;  %v9509_v26 = vor.u32 %v10823_v27, %v9506_v31  ;;  %v9346_v33 = vld [vmem:[#allocation5 + $0x1458] sm:$0xf0]  ;;  %v10815_v35 = vld [vmem:[#allocation5 + $0x154c] sm:$0xf] }
 0x30c   :  { %6029 = vmatpush.bf16.msrb.mxu3 %v9813_v41  ;;  %v10847_v41 = vld [vmem:[#allocation5 + $0x164c] sm:$0xf]  ;;  %v9602_v4 = vld [vmem:[#allocation5 + $0x1658] sm:$0xf0]  ;;  %v9477_v49 = vor.u32 %v10815_v35, %v9474_v39 }
 0x30d   :  { %5991 = vmatpush.bf16.msrb.mxu0 %v9413_v12  ;;  %v5765_v3 = vpop.f32.mrf.mxu2  ;;  %v9730_v47 = vld [vmem:[#allocation5 + $0x1758] sm:$0xf0]  ;;  %v9349_v12 = vor.u32 %v10783_v30, %v9346_v33  ;;  %v9605_v52 = vor.u32 %v10847_v41, %v9602_v4  ;;  %v10779_v54 = vld [vmem:[#allocation5 + $0x142c] sm:$0xf]  ;;  %v9992_v33 = vld [vmem:[#allocation8 + $0x160] sm:$0xf] }
 0x30e   :  { %6004 = vmatpush.bf16.msrb.mxu1 %v9541_v40  ;;  %v5766_v45 = vadd.f32 %v5765_v3, %v5753_v21  ;;  %v5778_v46 = vpop.f32.mrf.mxu3  ;;  %v10811_v55 = vld [vmem:[#allocation5 + $0x152c] sm:$0xf]  ;;  %v5754_v56 = vpop.f32.mrf.mxu1  ;;  %v9733_v10 = vor.u32 %v10879_v37, %v9730_v47  ;;  %v9458_v17 = vld [vmem:[#allocation5 + $0x1538] sm:$0xf0]  ;;  %v9856_v41 = vld [vmem:[#allocation8 + $0x50] sm:$0xf] }
 0x30f   :  { %6017 = vmatpush.bf16.msrb.mxu2 %v9669_v48  ;;  %v5741_v48 = vpop.f32.mrf.mxu0  ;;  %v10843_v22 = vld [vmem:[#allocation5 + $0x162c] sm:$0xf]  ;;  %v9314_v27 = vld [vmem:[#allocation5 + $0x1418] sm:$0xf0]  ;;  %v9461_v8 = vor.u32 %v10811_v55, %v9458_v17  ;;  %v9984_v37 = vld [vmem:[#allocation8 + $0x150] sm:$0xf] }
 0x310   :  { %6030 = vmatpush.bf16.msrb.mxu3 %v9797_v18  ;;  %v11472_v40 = vadd.f32 %v5778_v46, %v5766_v45  ;;  %v9330_v18 = vld [vmem:[#allocation5 + $0x1438] sm:$0xf0]  ;;  %v10875_v23 = vld [vmem:[#allocation5 + $0x172c] sm:$0xf]  ;;  %v9920_v45 = vld [vmem:[#allocation8 + $0xd0] sm:$0xf] }
 0x311   :  { %5992 = vmatpush.bf16.msrb.mxu0 %v9397_v43  ;;  %v9586_v43 = vld [vmem:[#allocation5 + $0x1638] sm:$0xf0]  ;;  %v10775_v24 = vld [vmem:[#allocation5 + $0x140c] sm:$0xf] }
 0x312   :  { %6005 = vmatpush.bf16.msrb.mxu1 %v9525_v44  ;;  %v9714_v44 = vld [vmem:[#allocation5 + $0x1738] sm:$0xf0]  ;;  %v9589_v59 = vor.u32 %v10843_v22, %v9586_v43  ;;  %v10839_v19 = vld [vmem:[#allocation5 + $0x160c] sm:$0xf]  ;;  %v9317_v53 = vor.u32 %v10775_v24, %v9314_v27  ;;  %v9904_v43 = vld [vmem:[#allocation8 + $0xb0] sm:$0xf] }
 0x313   :  { %6018 = vmatpush.bf16.msrb.mxu2 %v9653_v13  ;;  %v9333_v13 = vor.u32 %v10779_v54, %v9330_v18  ;;  %v9442_v31 = vld [vmem:[#allocation5 + $0x1518] sm:$0xf0]  ;;  %v9717_v60 = vor.u32 %v10875_v23, %v9714_v44  ;;  %v10931_v30 = vld [vmem:[#allocation8 + $0xe4] sm:$0xf0]  ;;  %v9912_v18 = vld [vmem:[#allocation8 + $0xc0] sm:$0xf] }
 0x314   :  { %6031 = vmatpush.bf16.msrb.mxu3 %v9781_v57  ;;  %v10807_v57 = vld [vmem:[#allocation5 + $0x150c] sm:$0xf]  ;;  %v9570_v20 = vld [vmem:[#allocation5 + $0x1618] sm:$0xf0]  ;;  %v9968_v24 = vld [vmem:[#allocation8 + $0x130] sm:$0xf] }
 0x315   :  { %5993 = vmatpush.bf16.msrb.mxu0 %v9381_v36  ;;  %v5767_v32 = vpop.f32.mrf.mxu2  ;;  %v10871_v36 = vld [vmem:[#allocation5 + $0x170c] sm:$0xf]  ;;  %v9698_v62 = vld [vmem:[#allocation5 + $0x1718] sm:$0xf0]  ;;  %v9445_v7 = vor.u32 %v10807_v57, %v9442_v31  ;;  %v9573_v11 = vor.u32 %v10839_v19, %v9570_v20  ;;  %v9832_v19 = vld [vmem:[#allocation8 + $0x20] sm:$0xf] }
 0x316   :  { %6006 = vmatpush.bf16.msrb.mxu1 %v9509_v26  ;;  %v5780_v26 = vpop.f32.mrf.mxu3  ;;  %v10917_v63 = vld [vmem:[#allocation8 + $0x74] sm:$0xf0]  ;;  %v9701_v14 = vor.u32 %v10871_v36, %v9698_v62  ;;  %v10947_v35 = vld [vmem:[#allocation8 + $0x164] sm:$0xf0]  ;;  %v9960_v62 = vld [vmem:[#allocation8 + $0x120] sm:$0xf] }
 0x317   :  { %6019 = vmatpush.bf16.msrb.mxu2 %v9637_v9  ;;  %v9872_v9 = vld [vmem:[#allocation8 + $0x70] sm:$0xf]  ;;  %v10933_v25 = vld [vmem:[#allocation8 + $0xf4] sm:$0xf0]  ;;  %v9993_v39 = vor.u32 %v10947_v35, %v9992_v33  ;;  %v10911_v54 = vld [vmem:[#allocation8 + $0x44] sm:$0xf0] }
 0x318   :  { %6032 = vmatpush.bf16.msrb.mxu3 %v9765_v51  ;;  %v10949_v51 = vld [vmem:[#allocation8 + $0x174] sm:$0xf0]  ;;  %v9873_v0 = vor.u32 %v10917_v63, %v9872_v9  ;;  %v9937_v16 = vor.u32 %v10933_v25, %v9936_v15  ;;  %v10927_v55 = vld [vmem:[#allocation8 + $0xc4] sm:$0xf0]  ;;  %v9880_v35 = vld [vmem:[#allocation8 + $0x80] sm:$0xf] }
 0x319   :  { %5994 = vmatpush.bf16.msrb.mxu0 %v9365_v28  ;;  %v10001_v21 = vor.u32 %v10949_v51, %v10000_v6  ;;  %v9864_v28 = vld [vmem:[#allocation8 + $0x60] sm:$0xf]  ;;  %v10913_v4 = vld [vmem:[#allocation8 + $0x54] sm:$0xf0]  ;;  %v10943_v56 = vld [vmem:[#allocation8 + $0x144] sm:$0xf0] }
 0x31a   :  { %6007 = vmatpush.bf16.msrb.mxu1 %v9493_v58  ;;  %v10915_v58 = vld [vmem:[#allocation8 + $0x64] sm:$0xf0]  ;;  %v10929_v46 = vld [vmem:[#allocation8 + $0xd4] sm:$0xf0]  ;;  %v9824_v51 = vld [vmem:[#allocation8 + $0x10] sm:$0xf] }
 0x31b   :  { %6020 = vmatpush.bf16.msrb.mxu2 %v9621_v38  ;;  %v9928_v38 = vld [vmem:[#allocation8 + $0xe0] sm:$0xf]  ;;  %v9865_v3 = vor.u32 %v10915_v58, %v9864_v28  ;;  %v10945_v47 = vld [vmem:[#allocation8 + $0x154] sm:$0xf0]  ;;  %v9921_v48 = vor.u32 %v10929_v46, %v9920_v45  ;;  %v10907_v32 = vld [vmem:[#allocation8 + $0x24] sm:$0xf0] }
 0x31c   :  { %6033 = vmatpush.bf16.msrb.mxu3 %v9749_v34  ;;  %v9929_v34 = vor.u32 %v10931_v30, %v9928_v38  ;;  %v10909_v22 = vld [vmem:[#allocation8 + $0x34] sm:$0xf0]  ;;  %v10923_v36 = vld [vmem:[#allocation8 + $0xa4] sm:$0xf0]  ;;  %v9833_v63 = vor.u32 %v10907_v32, %v9832_v19  ;;  %v9816_v58 = vld [vmem:[#allocation8] sm:$0xf] }
 0x31d   :  { %5995 = vmatpush.bf16.msrb.mxu0 %v9349_v12  ;;  %v9857_v12 = vor.u32 %v10913_v4, %v9856_v41  ;;  %v10941_v27 = vld [vmem:[#allocation8 + $0x134] sm:$0xf0]  ;;  %v10939_v26 = vld [vmem:[#allocation8 + $0x124] sm:$0xf0]  ;;  %v10916_v4 = vld [vmem:[#allocation8 + $0x74] sm:$0xf] }
 0x31e   :  { %6008 = vmatpush.bf16.msrb.mxu1 %v9477_v49  ;;  %v9985_v49 = vor.u32 %v10945_v47, %v9984_v37  ;;  %v9969_v31 = vor.u32 %v10941_v27, %v9968_v24  ;;  %v9961_v6 = vor.u32 %v10939_v26, %v9960_v62  ;;  %v10903_v33 = vld [vmem:[#allocation8 + $0x4] sm:$0xf0]  ;;  %v9874_v46 = vld [vmem:[#allocation8 + $0x78] sm:$0xf0]  ;;  %v10932_v37 = vld [vmem:[#allocation8 + $0xf4] sm:$0xf] }
 0x31f   :  { %6021 = vmatpush.bf16.msrb.mxu2 %v9605_v52  ;;  %v9848_v52 = vld [vmem:[#allocation8 + $0x40] sm:$0xf]  ;;  %v10935_v41 = vld [vmem:[#allocation8 + $0x104] sm:$0xf0]  ;;  %v9938_v47 = vld [vmem:[#allocation8 + $0xf8] sm:$0xf0] }
 0x320   :  { %6034 = vmatpush.bf16.msrb.mxu3 %v9733_v10  ;;  %v10912_v24 = vld [vmem:[#allocation8 + $0x54] sm:$0xf]  ;;  %v9986_v19 = vld [vmem:[#allocation8 + $0x158] sm:$0xf0]  ;;  %v9850_v62 = vld [vmem:[#allocation8 + $0x48] sm:$0xf0] }
 0x321   :  { %5996 = vmatpush.bf16.msrb.mxu0 %v9333_v13  ;;  %v10925_v13 = vld [vmem:[#allocation8 + $0xb4] sm:$0xf0]  ;;  %v10926_v26 = vld [vmem:[#allocation8 + $0xc4] sm:$0xf] }
 0x322   :  { %6009 = vmatpush.bf16.msrb.mxu1 %v9461_v8  ;;  %v9905_v57 = vor.u32 %v10925_v13, %v9904_v43  ;;  %v10946_v43 = vld [vmem:[#allocation8 + $0x164] sm:$0xf] }
 0x323   :  { %6022 = vmatpush.bf16.msrb.mxu2 %v9589_v59 }
 0x324   :  { %6035 = vmatpush.bf16.msrb.mxu3 %v9717_v60  ;;  %v9896_v60 = vld [vmem:[#allocation8 + $0xa0] sm:$0xf] }
 0x325   :  { %5997 = vmatpush.bf16.msrb.mxu0 %v9317_v53  ;;  %v5791_v10 = vpop.f32.mrf.mxu0  ;;  %v9897_v25 = vor.u32 %v10923_v36, %v9896_v60 }
 0x326   :  { %6010 = vmatpush.bf16.msrb.mxu1 %v9445_v7  ;;  %v5792_v23 = vadd.f32 %v5791_v10, %v11472_v40  ;;  %v5804_v44 = vpop.f32.mrf.mxu1  ;;  %v10905_v7 = vld [vmem:[#allocation8 + $0x14] sm:$0xf0]  ;;  %v10914_v10 = vld [vmem:[#allocation8 + $0x64] sm:$0xf] }
 0x327   :  { %6023 = vmatpush.bf16.msrb.mxu2 %v9573_v11  ;;  %v9888_v11 = vld [vmem:[#allocation8 + $0x90] sm:$0xf]  ;;  %v9825_v28 = vor.u32 %v10905_v7, %v9824_v51 }
 0x328   :  { %6036 = vmatpush.bf16.msrb.mxu3 %v9701_v14  ;;  %5998 = vmatmul.bf16.vlgmr.msrb.gmra.mxu0 %v11343_v61  ;;  %v9976_v61 = vld [vmem:[#allocation8 + $0x140] sm:$0xf]  ;;  %v5805_v8 = vadd.f32 %v5804_v44, %v5792_v23  ;;  %v9994_v23 = vld [vmem:[#allocation8 + $0x168] sm:$0xf0] }
 0x329   :  { %6440 = vmatpush.bf16.msra.mxu0 %v9873_v0  ;;  %6011 = vmatmul.bf16.vlgmr.msrb.gmra.mxu1 %v11347_v2  ;;  %v9849_v2 = vor.u32 %v10911_v54, %v9848_v52  ;;  %v9977_v17 = vor.u32 %v10943_v56, %v9976_v61  ;;  %v10921_v0 = vld [vmem:[#allocation8 + $0x94] sm:$0xf0]  ;;  %v6042_v52 = vmax.f32 %v11384_v42, 0.0  ;;  %v6043_v54 = vmax.f32 %v11425_v29, 0.0 }
 0x32a   :  { %6453 = vmatpush.bf16.msra.mxu1 %v9937_v16  ;;  %6024 = vmatmul.bf16.vlgmr.msrb.gmra.mxu2 %v11345_v1  ;;  %v9913_v1 = vor.u32 %v10927_v55, %v9912_v18  ;;  %v9952_v16 = vld [vmem:[#allocation8 + $0x110] sm:$0xf]  ;;  %v9889_v38 = vor.u32 %v10921_v0, %v9888_v11  ;;  %v6044_v61 = vmax.f32 %v11466_v50, 0.0  ;;  %v9877_v56 = vor.u32 %v10916_v4, %v9874_v46  ;;  %v10908_v11 = vld [vmem:[#allocation8 + $0x34] sm:$0xf] }
 0x32b   :  { %6466 = vmatpush.bf16.msra.mxu2 %v10001_v21  ;;  %6037 = vmatmul.bf16.vlgmr.msrb.gmra.mxu3 %v11349_v5  ;;  %v9840_v5 = vld [vmem:[#allocation8 + $0x30] sm:$0xf]  ;;  %v10937_v21 = vld [vmem:[#allocation8 + $0x114] sm:$0xf0]  ;;  %v11484_v44 = vpack.c.bf16 %v6042_v52, %v6042_v52  ;;  %v11486_v42 = vpack.c.bf16 %v6043_v54, %v6043_v54  ;;  %v9997_v27 = vor.u32 %v10946_v43, %v9994_v23  ;;  %v9842_v0 = vld [vmem:[#allocation8 + $0x38] sm:$0xf0] }
 0x32c   :  { %v9841_v59 = vor.u32 %v10909_v22, %v9840_v5  ;;  %v9953_v30 = vor.u32 %v10937_v21, %v9952_v16  ;;  %v10930_v5 = vld [vmem:[#allocation8 + $0xe4] sm:$0xf]  ;;  %v9930_v22 = vld [vmem:[#allocation8 + $0xe8] sm:$0xf0]  ;;  %v11488_v29 = vpack.c.bf16 %v6044_v61, %v6044_v61  ;;  %v10924_v16 = vld [vmem:[#allocation8 + $0xb4] sm:$0xf] }
 0x32d   :  { %6441 = vmatpush.bf16.msra.mxu0 %v9865_v3  ;;  %v5817_v20 = vpop.f32.mrf.mxu2  ;;  %v5793_v53 = vpop.f32.mrf.mxu0  ;;  %v10919_v3 = vld [vmem:[#allocation8 + $0x84] sm:$0xf0]  ;;  %v9933_v13 = vor.u32 %v10930_v5, %v9930_v22  ;;  %v9906_v21 = vld [vmem:[#allocation8 + $0xb8] sm:$0xf0]  ;;  %v10938_v4 = vld [vmem:[#allocation8 + $0x124] sm:$0xf] }
 0x32e   :  { %6454 = vmatpush.bf16.msra.mxu1 %v9929_v34  ;;  %v5818_v9 = vadd.f32 %v5817_v20, %v5805_v8  ;;  %v5830_v40 = vpop.f32.mrf.mxu3  ;;  %v5806_v14 = vpop.f32.mrf.mxu1  ;;  %v9881_v18 = vor.u32 %v10919_v3, %v9880_v35  ;;  %v9858_v8 = vld [vmem:[#allocation8 + $0x58] sm:$0xf0]  ;;  %v10910_v20 = vld [vmem:[#allocation8 + $0x44] sm:$0xf]  ;;  %v10920_v61 = vld [vmem:[#allocation8 + $0x94] sm:$0xf] }
 0x32f   :  { %6467 = vmatpush.bf16.msra.mxu2 %v9993_v39  ;;  %v9944_v39 = vld [vmem:[#allocation8 + $0x100] sm:$0xf]  ;;  %v9861_v32 = vor.u32 %v10912_v24, %v9858_v8  ;;  %v10906_v35 = vld [vmem:[#allocation8 + $0x24] sm:$0xf]  ;;  %v9818_v43 = vld [vmem:[#allocation8 + $0x8] sm:$0xf0] }
 0x330   :  { %v11479_v15 = vadd.f32 %v5830_v40, %v5818_v9  ;;  %v9945_v55 = vor.u32 %v10935_v41, %v9944_v39  ;;  %v9914_v9 = vld [vmem:[#allocation8 + $0xc8] sm:$0xf0]  ;;  %v10942_v40 = vld [vmem:[#allocation8 + $0x144] sm:$0xf] }
 0x331   :  { %6442 = vmatpush.bf16.msra.mxu0 %v9857_v12  ;;  %v9817_v12 = vor.u32 %v10903_v33, %v9816_v58  ;;  %v9917_v51 = vor.u32 %v10926_v26, %v9914_v9  ;;  %v10940_v58 = vld [vmem:[#allocation8 + $0x134] sm:$0xf]  ;;  %v9909_v33 = vor.u32 %v10924_v16, %v9906_v21  ;;  %v9898_v39 = vld [vmem:[#allocation8 + $0xa8] sm:$0xf0]  ;;  %v10902_v5 = vld [vmem:[#allocation8 + $0x4] sm:$0xf] }
 0x332   :  { %6455 = vmatpush.bf16.msra.mxu1 %v9921_v48  ;;  %v10948_v48 = vld [vmem:[#allocation8 + $0x174] sm:$0xf]  ;;  %v10918_v23 = vld [vmem:[#allocation8 + $0x84] sm:$0xf]  ;;  %v9946_v24 = vld [vmem:[#allocation8 + $0x108] sm:$0xf0] }
 0x333   :  { %6468 = vmatpush.bf16.msra.mxu2 %v9985_v49  ;;  %v10002_v49 = vld [vmem:[#allocation8 + $0x178] sm:$0xf0]  ;;  %v10963_v26 = vld [vmem:[#allocation8 + $0x1e4] sm:$0xf0]  ;;  %v10024_v16 = vld [vmem:[#allocation8 + $0x1a0] sm:$0xf] }
 0x334   :  { %v10955_v21 = vld [vmem:[#allocation8 + $0x1a4] sm:$0xf0] }
 0x335   :  { %6443 = vmatpush.bf16.msra.mxu0 %v9849_v2  ;;  %v5819_v34 = vpop.f32.mrf.mxu2  ;;  %v9941_v2 = vor.u32 %v10932_v37, %v9938_v47 }
 0x336   :  { %6456 = vmatpush.bf16.msra.mxu1 %v9913_v1  ;;  %v5832_v45 = vpop.f32.mrf.mxu3  ;;  %v10005_v1 = vor.u32 %v10948_v48, %v10002_v49  ;;  %v10922_v34 = vld [vmem:[#allocation8 + $0xa4] sm:$0xf]  ;;  %v10904_v49 = vld [vmem:[#allocation8 + $0x14] sm:$0xf] }
 0x337   :  { %6469 = vmatpush.bf16.msra.mxu2 %v9977_v17  ;;  %v9866_v17 = vld [vmem:[#allocation8 + $0x68] sm:$0xf0]  ;;  %v9901_v48 = vor.u32 %v10922_v34, %v9898_v39  ;;  %v10964_v39 = vld [vmem:[#allocation8 + $0x1f4] sm:$0xf] }
 0x338   :  { %v9869_v50 = vor.u32 %v10914_v10, %v9866_v17  ;;  %v9962_v45 = vld [vmem:[#allocation8 + $0x128] sm:$0xf0]  ;;  %v9954_v10 = vld [vmem:[#allocation8 + $0x118] sm:$0xf0] }
 0x339   :  { %6444 = vmatpush.bf16.msra.mxu0 %v9841_v59  ;;  %v10928_v59 = vld [vmem:[#allocation8 + $0xd4] sm:$0xf] }
 0x33a   :  { %6457 = vmatpush.bf16.msra.mxu1 %v9905_v57  ;;  %v9922_v57 = vld [vmem:[#allocation8 + $0xd8] sm:$0xf0] }
 0x33b   :  { %6470 = vmatpush.bf16.msra.mxu2 %v9969_v31  ;;  %v10944_v31 = vld [vmem:[#allocation8 + $0x154] sm:$0xf]  ;;  %v9925_v60 = vor.u32 %v10928_v59, %v9922_v57  ;;  %v9821_v59 = vor.u32 %v10902_v5, %v9818_v43  ;;  %v10034_v43 = vld [vmem:[#allocation8 + $0x1b8] sm:$0xf0] }
 0x33c   :  { %v9989_v36 = vor.u32 %v10944_v31, %v9986_v19  ;;  %v10064_v19 = vld [vmem:[#allocation8 + $0x1f0] sm:$0xf] }
 0x33d   :  { %6445 = vmatpush.bf16.msra.mxu0 %v9833_v63  ;;  %v9978_v63 = vld [vmem:[#allocation8 + $0x148] sm:$0xf0] }
 0x33e   :  { %6458 = vmatpush.bf16.msra.mxu1 %v9897_v25  ;;  %v9981_v14 = vor.u32 %v10942_v40, %v9978_v63  ;;  %v10048_v40 = vld [vmem:[#allocation8 + $0x1d0] sm:$0xf]  ;;  %v10961_v63 = vld [vmem:[#allocation8 + $0x1d4] sm:$0xf0] }
 0x33f   :  { %6471 = vmatpush.bf16.msra.mxu2 %v9961_v6  ;;  %v9853_v6 = vor.u32 %v10910_v20, %v9850_v62  ;;  %v10056_v62 = vld [vmem:[#allocation8 + $0x1e0] sm:$0xf] }
 0x340   :  { %v10057_v9 = vor.u32 %v10963_v26, %v10056_v62 }
 0x341   :  { %6446 = vmatpush.bf16.msra.mxu0 %v9825_v28 }
 0x342   :  { %6459 = vmatpush.bf16.msra.mxu1 %v9889_v38  ;;  %v9970_v38 = vld [vmem:[#allocation8 + $0x138] sm:$0xf0] }
 0x343   :  { %6472 = vmatpush.bf16.msra.mxu2 %v9953_v30  ;;  %v9845_v30 = vor.u32 %v10908_v11, %v9842_v0  ;;  %v9973_v3 = vor.u32 %v10940_v58, %v9970_v38  ;;  %v10032_v11 = vld [vmem:[#allocation8 + $0x1b0] sm:$0xf]  ;;  %v10025_v38 = vor.u32 %v10955_v21, %v10024_v16  ;;  %v6114_v21 = vld [vmem:[#allocation10] sm:$0x3] }
 0x345   :  { %6447 = vmatpush.bf16.msra.mxu0 %v9817_v12  ;;  %v5843_v53 = vpop.f32.mrf.mxu0 }
 0x346   :  { %6460 = vmatpush.bf16.msra.mxu1 %v9881_v18  ;;  %v5844_v25 = vadd.f32 %v5843_v53, %v11479_v15  ;;  %v5856_v7 = vpop.f32.mrf.mxu1  ;;  %v9834_v15 = vld [vmem:[#allocation8 + $0x28] sm:$0xf0]  ;;  %v9965_v18 = vor.u32 %v10938_v4, %v9962_v45 }
 0x347   :  { %6473 = vmatpush.bf16.msra.mxu2 %v9945_v55  ;;  %v9837_v12 = vor.u32 %v10906_v35, %v9834_v15  ;;  %v9826_v55 = vld [vmem:[#allocation8 + $0x18] sm:$0xf0]  ;;  %v10951_v15 = vld [vmem:[#allocation8 + $0x184] sm:$0xf0] }
 0x348   :  { %6448 = vmatmul.bf16.vlgmr.msra.gmra.mxu0 %v11484_v44  ;;  %v5857_v28 = vadd.f32 %v5856_v7, %v5844_v25  ;;  %v10049_v25 = vor.u32 %v10961_v63, %v10048_v40 }
 0x349   :  { %6492 = vmatpush.bf16.msrb.mxu0 %v9877_v56  ;;  %6461 = vmatmul.bf16.vlgmr.msra.gmra.mxu1 %v11486_v42  ;;  %v9890_v56 = vld [vmem:[#allocation8 + $0x98] sm:$0xf0] }
 0x34a   :  { %6505 = vmatpush.bf16.msrb.mxu1 %v9941_v2  ;;  %6474 = vmatmul.bf16.vlgmr.msra.gmra.mxu2 %v11488_v29  ;;  %v10936_v2 = vld [vmem:[#allocation8 + $0x114] sm:$0xf]  ;;  %v9893_v17 = vor.u32 %v10920_v61, %v9890_v56 }
 0x34b   :  { %6518 = vmatpush.bf16.msrb.mxu2 %v10005_v1  ;;  %v9829_v1 = vor.u32 %v10904_v49, %v9826_v55  ;;  %v9957_v22 = vor.u32 %v10936_v2, %v9954_v10  ;;  %v10050_v49 = vld [vmem:[#allocation8 + $0x1d8] sm:$0xf0]  ;;  %v10958_v10 = vld [vmem:[#allocation8 + $0x1c4] sm:$0xf] }
 0x34d   :  { %6493 = vmatpush.bf16.msrb.mxu0 %v9869_v50  ;;  %v5869_v41 = vpop.f32.mrf.mxu2  ;;  %v5845_v47 = vpop.f32.mrf.mxu0  ;;  %v9882_v50 = vld [vmem:[#allocation8 + $0x88] sm:$0xf0] }
 0x34e   :  { %6506 = vmatpush.bf16.msrb.mxu1 %v9933_v13  ;;  %v5870_v46 = vadd.f32 %v5869_v41, %v5857_v28  ;;  %v5882_v37 = vpop.f32.mrf.mxu3  ;;  %v5858_v52 = vpop.f32.mrf.mxu1  ;;  %v10934_v13 = vld [vmem:[#allocation8 + $0x104] sm:$0xf]  ;;  %v9885_v57 = vor.u32 %v10918_v23, %v9882_v50  ;;  %v10066_v41 = vld [vmem:[#allocation8 + $0x1f8] sm:$0xf0]  ;;  %v10058_v47 = vld [vmem:[#allocation8 + $0x1e8] sm:$0xf0] }
 0x34f   :  { %6519 = vmatpush.bf16.msrb.mxu2 %v9997_v27  ;;  %v9949_v31 = vor.u32 %v10934_v13, %v9946_v24  ;;  %v10069_v4 = vor.u32 %v10964_v39, %v10066_v41  ;;  %v10954_v13 = vld [vmem:[#allocation8 + $0x1a4] sm:$0xf]  ;;  %v10026_v24 = vld [vmem:[#allocation8 + $0x1a8] sm:$0xf0]  ;;  %v10973_v39 = vld [vmem:[#allocation11 + $0x38] sm:$0xff] }
 0x350   :  { %v11494_v54 = vadd.f32 %v5882_v37, %v5870_v46  ;;  %v10962_v37 = vld [vmem:[#allocation8 + $0x1e4] sm:$0xf]  ;;  %v10981_v41 = vld [vmem:[#allocation11 + $0x78] sm:$0xff] }
 0x351   :  { %6494 = vmatpush.bf16.msrb.mxu0 %v9861_v32  ;;  %v10965_v32 = vld [vmem:[#allocation8 + $0x1f4] sm:$0xf0] }
 0x352   :  { %6507 = vmatpush.bf16.msrb.mxu1 %v9925_v60  ;;  %v10065_v60 = vor.u32 %v10965_v32, %v10064_v19 }
 0x353   :  { %6520 = vmatpush.bf16.msrb.mxu2 %v9989_v36 }
 0x354   :  { %6479 = vmatpush.bf16.msra.mxu3 %v10065_v60  ;;  %v10950_v60 = vld [vmem:[#allocation8 + $0x184] sm:$0xf] }
 0x355   :  { %6495 = vmatpush.bf16.msrb.mxu0 %v9853_v6  ;;  %v5871_v27 = vpop.f32.mrf.mxu2 }
 0x356   :  { %6508 = vmatpush.bf16.msrb.mxu1 %v9917_v51  ;;  %v5884_v8 = vpop.f32.mrf.mxu3  ;;  %v10040_v51 = vld [vmem:[#allocation8 + $0x1c0] sm:$0xf] }
 0x357   :  { %6521 = vmatpush.bf16.msrb.mxu2 %v9981_v14  ;;  %v10957_v14 = vld [vmem:[#allocation8 + $0x1b4] sm:$0xf0] }
 0x358   :  { %6480 = vmatpush.bf16.msra.mxu3 %v10057_v9  ;;  %v10033_v0 = vor.u32 %v10957_v14, %v10032_v11 }
 0x359   :  { %6496 = vmatpush.bf16.msrb.mxu0 %v9845_v30  ;;  %v10016_v30 = vld [vmem:[#allocation8 + $0x190] sm:$0xf] }
 0x35a   :  { %6509 = vmatpush.bf16.msrb.mxu1 %v9909_v33  ;;  %v10953_v33 = vld [vmem:[#allocation8 + $0x194] sm:$0xf0] }
 0x35b   :  { %6522 = vmatpush.bf16.msrb.mxu2 %v9973_v3  ;;  %v10017_v35 = vor.u32 %v10953_v33, %v10016_v30  ;;  %v10008_v3 = vld [vmem:[#allocation8 + $0x180] sm:$0xf] }
 0x35c   :  { %6481 = vmatpush.bf16.msra.mxu3 %v10049_v25  ;;  %v10009_v34 = vor.u32 %v10951_v15, %v10008_v3 }
 0x35d   :  { %6497 = vmatpush.bf16.msrb.mxu0 %v9837_v12  ;;  %v10061_v12 = vor.u32 %v10962_v37, %v10058_v47  ;;  %v10971_v37 = vld [vmem:[#allocation11 + $0x28] sm:$0xff]  ;;  %v10970_v47 = vld [vmem:[#allocation11 + $0x20] sm:$0xff] }
 0x35e   :  { %6510 = vmatpush.bf16.msrb.mxu1 %v9901_v48  ;;  %v10960_v48 = vld [vmem:[#allocation8 + $0x1d4] sm:$0xf] }
 0x35f   :  { %6523 = vmatpush.bf16.msrb.mxu2 %v9965_v18  ;;  %v10053_v52 = vor.u32 %v10960_v48, %v10050_v49  ;;  %v10969_v48 = vld [vmem:[#allocation11 + $0x18] sm:$0xff] }
 0x361   :  { %6498 = vmatpush.bf16.msrb.mxu0 %v9829_v1  ;;  %v10042_v1 = vld [vmem:[#allocation8 + $0x1c8] sm:$0xf0] }
 0x362   :  { %6511 = vmatpush.bf16.msrb.mxu1 %v9893_v17  ;;  %v10045_v17 = vor.u32 %v10958_v10, %v10042_v1 }
 0x363   :  { %6524 = vmatpush.bf16.msrb.mxu2 %v9957_v22  ;;  %v10956_v22 = vld [vmem:[#allocation8 + $0x1b4] sm:$0xf] }
 0x364   :  { %v10037_v50 = vor.u32 %v10956_v22, %v10034_v43  ;;  %v10979_v22 = vld [vmem:[#allocation11 + $0x68] sm:$0xff]  ;;  %v10966_v43 = vld [vmem:[#allocation11] sm:$0xff] }
 0x365   :  { %6499 = vmatpush.bf16.msrb.mxu0 %v9821_v59  ;;  %v5895_v20 = vpop.f32.mrf.mxu0  ;;  %v10029_v59 = vor.u32 %v10954_v13, %v10026_v24  ;;  %v10976_v13 = vld [vmem:[#allocation11 + $0x50] sm:$0xff]  ;;  %v10975_v24 = vld [vmem:[#allocation11 + $0x48] sm:$0xff] }
 0x366   :  { %6512 = vmatpush.bf16.msrb.mxu1 %v9885_v57  ;;  %v5908_v36 = vpop.f32.mrf.mxu1  ;;  %v5896_v55 = vadd.f32 %v5895_v20, %v11494_v54  ;;  %v10952_v54 = vld [vmem:[#allocation8 + $0x194] sm:$0xf]  ;;  %v10018_v57 = vld [vmem:[#allocation8 + $0x198] sm:$0xf0]  ;;  %v10010_v20 = vld [vmem:[#allocation8 + $0x188] sm:$0xf0] }
 0x367   :  { %6525 = vmatpush.bf16.msrb.mxu2 %v9949_v31  ;;  %v10021_v32 = vor.u32 %v10952_v54, %v10018_v57  ;;  %v10013_v62 = vor.u32 %v10950_v60, %v10010_v20 }
 0x368   :  { %6500 = vmatmul.bf16.vlgmr.msrb.gmra.mxu0 %v11484_v44  ;;  %v5909_v5 = vadd.f32 %v5908_v36, %v5896_v55  ;;  %v10968_v55 = vld [vmem:[#allocation11 + $0x10] sm:$0xff] }
 0x369   :  { %6513 = vmatmul.bf16.vlgmr.msrb.gmra.mxu1 %v11486_v42  ;;  %v10959_v42 = vld [vmem:[#allocation8 + $0x1c4] sm:$0xf0]  ;;  %6680 = vmatpush.bf16.msra.mxu0 %v10973_v39 }
 0x36a   :  { %6526 = vmatmul.bf16.vlgmr.msrb.gmra.mxu2 %v11488_v29  ;;  %v10041_v29 = vor.u32 %v10959_v42, %v10040_v51  ;;  %6693 = vmatpush.bf16.msra.mxu1 %v10981_v41 }
 0x36c   :  { %6482 = vmatpush.bf16.msra.mxu3 %v10041_v29 }
 0x36d   :  { %v5921_v53 = vpop.f32.mrf.mxu2  ;;  %v5897_v44 = vpop.f32.mrf.mxu0 }
 0x36e   :  { %v5934_v6 = vpop.f32.mrf.mxu3  ;;  %v5910_v7 = vpop.f32.mrf.mxu1  ;;  %v5922_v23 = vadd.f32 %v5921_v53, %v5909_v5  ;;  %v10967_v5 = vld [vmem:[#allocation11 + $0x8] sm:$0xff] }
 0x370   :  { %6483 = vmatpush.bf16.msra.mxu3 %v10033_v0  ;;  %v5935_v31 = vadd.f32 %v5934_v6, %v5922_v23  ;;  %v10978_v23 = vld [vmem:[#allocation11 + $0x60] sm:$0xff] }
 0x374   :  { %6484 = vmatpush.bf16.msra.mxu3 %v10025_v38 }
 0x375   :  { %v5923_v28 = vpop.f32.mrf.mxu2 }
 0x376   :  { %v5936_v58 = vpop.f32.mrf.mxu3  ;;  %v6116_v28 = vperm.slane %v6114_v21, 0 }
 0x378   :  { %6485 = vmatpush.bf16.msra.mxu3 %v10017_v35 }
 0x37c   :  { %6486 = vmatpush.bf16.msra.mxu3 %v10009_v34 }
 0x380   :  { %6531 = vmatpush.bf16.msrb.mxu3 %v10069_v4 }
 0x384   :  { %6532 = vmatpush.bf16.msrb.mxu3 %v10061_v12  ;;  %v6117_v12 = vperm.slane %v6114_v21, 1 }
 0x385   :  { %v5947_v45 = vpop.f32.mrf.mxu0 }
 0x386   :  { %v5960_v46 = vpop.f32.mrf.mxu1  ;;  %v5948_v19 = vadd.f32 %v5947_v45, %v5935_v31  ;;  %v10972_v45 = vld [vmem:[#allocation11 + $0x30] sm:$0xff] }
 0x387   :  { %6681 = vmatpush.bf16.msra.mxu0 %v10972_v45 }
 0x388   :  { %6533 = vmatpush.bf16.msrb.mxu3 %v10053_v52  ;;  %v5961_v36 = vadd.f32 %v5960_v46, %v5948_v19  ;;  %v10980_v46 = vld [vmem:[#allocation11 + $0x70] sm:$0xff] }
 0x389   :  { %6694 = vmatpush.bf16.msra.mxu1 %v10980_v46 }
 0x38b   :  { %6682 = vmatpush.bf16.msra.mxu0 %v10971_v37 }
 0x38c   :  { %6534 = vmatpush.bf16.msrb.mxu3 %v10045_v17 }
 0x38d   :  { %v5973_v18 = vpop.f32.mrf.mxu2  ;;  %v5949_v56 = vpop.f32.mrf.mxu0  ;;  %6695 = vmatpush.bf16.msra.mxu1 %v10979_v22 }
 0x38e   :  { %v5986_v61 = vpop.f32.mrf.mxu3  ;;  %v5962_v2 = vpop.f32.mrf.mxu1  ;;  %v5974_v26 = vadd.f32 %v5973_v18, %v5961_v36 }
 0x38f   :  { %6683 = vmatpush.bf16.msra.mxu0 %v10970_v47 }
 0x390   :  { %6535 = vmatpush.bf16.msrb.mxu3 %v10037_v50  ;;  %v5987_v9 = vadd.f32 %v5986_v61, %v5974_v26  ;;  %v10977_v50 = vld [vmem:[#allocation11 + $0x58] sm:$0xff] }
 0x391   :  { %6696 = vmatpush.bf16.msra.mxu1 %v10978_v23 }
 0x393   :  { %6684 = vmatpush.bf16.msra.mxu0 %v10969_v48 }
 0x394   :  { %6536 = vmatpush.bf16.msrb.mxu3 %v10029_v59 }
 0x395   :  { %v5975_v27 = vpop.f32.mrf.mxu2  ;;  %6697 = vmatpush.bf16.msra.mxu1 %v10977_v50 }
 0x396   :  { %v5988_v8 = vpop.f32.mrf.mxu3  ;;  %v10974_v27 = vld [vmem:[#allocation11 + $0x40] sm:$0xff] }
 0x397   :  { %6685 = vmatpush.bf16.msra.mxu0 %v10968_v55 }
 0x398   :  { %6537 = vmatpush.bf16.msrb.mxu3 %v10021_v32 }
 0x399   :  { %6698 = vmatpush.bf16.msra.mxu1 %v10976_v13 }
 0x39b   :  { %6686 = vmatpush.bf16.msra.mxu0 %v10967_v5 }
 0x39c   :  { %6538 = vmatpush.bf16.msrb.mxu3 %v10013_v62 }
 0x39d   :  { %6699 = vmatpush.bf16.msra.mxu1 %v10975_v24 }
 0x39f   :  { %6687 = vmatpush.bf16.msra.mxu0 %v10966_v43 }
 0x3a1   :  { %6700 = vmatpush.bf16.msra.mxu1 %v10974_v27 }
 0x3a5   :  { %v5999_v40 = vpop.f32.mrf.mxu0 }
 0x3a6   :  { %v6012_v63 = vpop.f32.mrf.mxu1  ;;  %v6000_v53 = vadd.f32 %v5999_v40, %v5987_v9  ;;  %v6706_v9 = vlaneseq  ;;  %v10996_v40 = vld [vmem:[#allocation13] ss:$0 sm:$0xff] }
 0x3a8   :  { %v6013_v25 = vadd.f32 %v6012_v63, %v6000_v53  ;;  %v6707_v63 = vand.u32 127, %v6706_v9 }
 0x3aa   :  { %vm6708_vm0 = vcmp.lt.s32.totalorder %v6707_v63, 10 }
 0x3ad   :  { %v6025_v44 = vpop.f32.mrf.mxu2  ;;  %v6001_v7 = vpop.f32.mrf.mxu0 }
 0x3ae   :  { %v6038_v51 = vpop.f32.mrf.mxu3  ;;  %v6026_v42 = vadd.f32 %v6025_v44, %v6013_v25  ;;  %v6014_v6 = vpop.f32.mrf.mxu1 }
 0x3b0   :  { %v6039_v29 = vadd.f32 %v6038_v51, %v6026_v42 }
 0x3b2   :  { %v6045_v11 = vmax.f32 %v6039_v29, 0.0 }
 0x3b4   :  { %v6049_v14 = vpack.c.bf16 %v6045_v11, %v6045_v11 }
 0x3b5   :  { %v6027_v0 = vpop.f32.mrf.mxu2 }
 0x3b6   :  { %v6040_v16 = vpop.f32.mrf.mxu3  ;;  %6487 = vmatmul.bf16.vlgmr.msra.gmra.mxu3 %v6049_v14 }
 0x3c5   :  { %v6449_v58 = vpop.f32.mrf.mxu0 }
 0x3c6   :  { %v6450_v38 = vadd.f32 %v6449_v58, %v6116_v28  ;;  %v6462_v30 = vpop.f32.mrf.mxu1  ;;  %6539 = vmatmul.bf16.vlgmr.msrb.gmra.mxu3 %v6049_v14 }
 0x3c8   :  { %v6463_v33 = vadd.f32 %v6462_v30, %v6450_v38 }
 0x3cd   :  { %v6475_v35 = vpop.f32.mrf.mxu2  ;;  %v6451_v15 = vpop.f32.mrf.mxu0 }
 0x3ce   :  { %v6476_v3 = vadd.f32 %v6475_v35, %v6463_v33  ;;  %v6464_v34 = vpop.f32.mrf.mxu1 }
 0x3d5   :  { %v6477_v4 = vpop.f32.mrf.mxu2 }
 0x3e5   :  { %v6501_v49 = vpop.f32.mrf.mxu0 }
 0x3e6   :  { %v6514_v52 = vpop.f32.mrf.mxu1  ;;  %v6502_v18 = vadd.f32 %v6501_v49, %v6117_v12 }
 0x3e8   :  { %v6515_v61 = vadd.f32 %v6514_v52, %v6502_v18 }
 0x3ed   :  { %v6527_v56 = vpop.f32.mrf.mxu2  ;;  %v6503_v10 = vpop.f32.mrf.mxu0 }
 0x3ee   :  { %v6528_v2 = vadd.f32 %v6527_v56, %v6515_v61  ;;  %v6516_v1 = vpop.f32.mrf.mxu1 }
 0x3f5   :  { %v6529_v17 = vpop.f32.mrf.mxu2 }
 0x439   :  { %v6488_v8 = vpop.f32.mrf.mxu3 }
 0x43a   :  { %v6489_v59 = vadd.f32 %v6488_v8, %v6476_v3 }
 0x43c   :  { %v6544_v54 = vmax.f32 %v6489_v59, 0.0 }
 0x43e   :  { %v6546_v57 = vpack.c.bf16 %v6544_v54, %v6544_v54 }
 0x440   :  { %6688 = vmatmul.bf16.vlgmr.msra.gmra.mxu0 %v6546_v57 }
 0x441   :  { %v6490_v31 = vpop.f32.mrf.mxu3 }
 0x449   :  { %v6540_v19 = vpop.f32.mrf.mxu3 }
 0x44a   :  { %v6541_v32 = vadd.f32 %v6540_v19, %v6528_v2 }
 0x44c   :  { %v6545_v60 = vmax.f32 %v6541_v32, 0.0 }
 0x44e   :  { %v6547_v20 = vpack.c.bf16 %v6545_v60, %v6545_v60 }
 0x450   :  { %6701 = vmatmul.bf16.vlgmr.msra.gmra.mxu1 %v6547_v20 }
 0x451   :  { %v6542_v36 = vpop.f32.mrf.mxu3 }
 0x4bd   :  { %v6689_v62 = vpop.f32.mrf.mxu0 }
 0x4be   :  { %v6690_v53 = vadd.f32 %v10996_v40, %v6689_v62 }
 0x4c5   :  { %v6691_v26 = vpop.f32.mrf.mxu0 }
 0x4cd   :  { %v6702_v25 = vpop.f32.mrf.mxu1 }
 0x4ce   :  { %v6703_v44 = vadd.f32 %v6702_v25, %v6690_v53 }
 0x4d0   :  { %v6709_v51 = vsel %vm6708_vm0, %v6703_v44, -3.4028235e+38 }
 0x4d1   :  { %6710 = vmax.xlane.f32.xlu0 %v6709_v51 }
 0x4d5   :  { %v6704_v42 = vpop.f32.mrf.mxu1 }
 0x544   :  { %v6711_v7 = vpop.xlane.xlu0 %6710 }
 0x545   :  { %v6712_v6 = vsub.f32 %v6709_v51, %v6711_v7 }
 0x547   :  { %v6713_v29 = vmul.f32 1.442695, %v6712_v6 }
 0x549   :  { %10997 = vpow2.f32 %v6713_v29 }
 0x54f   :  { %v10998_v11 = vpop.eup %10997 }
 0x550   :  { %6715 = vadd.xlane.f32.xlu0 %v10998_v11 }
 0x5c3   :  { %v6716_v14 = vpop.xlane.xlu0 %6715 }
 0x5c4   :  { %10999 = vlog2.f32 %v6716_v14 }
 0x5ca   :  { %v11000_v0 = vpop.eup %10999 }
 0x5cb   :  { %v6718_v16 = vmul.f32 0.6931472, %v11000_v0 }
 0x5cd   :  { %v6719_v21 = vadd.f32 %v6718_v16, %v6711_v7 }
 0x5cf   :  { %v6720_v28 = vsub.f32 %v6709_v51, %v6719_v21 }
 0x5d1   :  { %6721 = vst [vmem:[#allocation14] sm:$0xff] %v6720_v28 }
 0x5d2   :  { %6732 = dma.vmem_to_hbm [thread:$0]  %s6728_s6, 128, %s6730_s15, [#allocation4]  }
 0x5d3   :  { %11204 = dma.done.wait [#allocation4], 128  }
 0x5d4   :  { %11205 = vsyncadd [#allocation4], 4294967168 }
 0x5d5   :  { %6737 = vsyncpa [#allocation3], 1 }
 0x5d6   :  { %6738 = vsyncpa [#allocation6], 1 }
 0x5d7   :  { %6739 = vsyncpa [#allocation9], 1 }
 0x5d8   :  { %6740 = vsyncpa [#allocation12], 1 }
 0x5d9   :  { %6741 = vsyncpa [#allocation4], 1 }

</bundles_post_ra>
